<compile_context>
chip_gen: v7x
topology: tpu7x:2x2x1
jax: 0.10.0
libtpu: 0.0.40
codegen_flags: <defaults>
</compile_context>

<pallas_src>
import jax
import jax.numpy as jnp
from jax.experimental import pallas as pl
from jax.experimental.pallas import tpu as pltpu

CONV1_K, CONV1_S = 10, 5      # first strided conv: kernel 10, stride 5
CONV2_K, CONV2_S = 4, 2       # second strided conv: kernel 4, stride 2
CONV_CH = 128                 # conv feature channels (lane-dense stand-in for 512)
HIDDEN = 128                  # output hidden size (lane-dense stand-in for 768)
TILE_T2 = 256                 # conv2 output frames per grid step (multiple of 8)
AW_W = 32                     # per-frame audio window width (25 padded to 32)


def _gelu(x):
    # tanh-approx GELU (EUP-friendly; avoids erf lowering)
    c = 0.7978845608028654  # sqrt(2/pi)
    return 0.5 * x * (1.0 + jnp.tanh(c * (x + 0.044715 * x * x * x)))


# ----------------------------- fused Pallas kernel -------------------------
# aw_ref[f, :] holds audio samples [10f, 10f+25) (zero-padded to 32 lanes),
# i.e. everything conv2 output frame f depends on.  Conv1 for the four
# contributing conv1 frames (offsets 0/5/10/15, kernel 10) is one matmul
# against w1 placed at those row offsets in four column blocks of w1b.

def _ssl_kernel(aw_ref,               # [tile, 32] f32  audio windows
                w1_ref, b1_ref,       # [32, 4C] bf16, [1, 4C] f32
                w2_ref, b2_ref,       # [4C, C] bf16,  [1, C]  f32
                wp_ref, bp_ref,       # [C, H]  bf16,  [1, H]  f32 (LN folded)
                o_ref):               # [tile, H] f32
    # conv1 (k=10, s=5) for all 4 conv1 frames per conv2 frame: one MXU matmul.
    a = aw_ref[...].astype(jnp.bfloat16)
    h1 = jnp.dot(a, w1_ref[...], preferred_element_type=jnp.float32)
    h1 = _gelu(h1 + b1_ref[...])                              # [tile, 4C] = [e0|o0|e1|o1]

    # conv2 (k=4, s=2): the conv1 output is already laid out as [e0|o0|e1|o1]
    # lane blocks, so conv2 is a single K=4C MXU matmul (no concat/im2col).
    h2 = jnp.dot(h1.astype(jnp.bfloat16), w2_ref[...],
                 preferred_element_type=jnp.float32)
    h2 = _gelu(h2 + b2_ref[...])                              # [tile, C]

    # LayerNorm (gamma/beta folded into wp/bp) + projection.
    mu = jnp.mean(h2, axis=-1, keepdims=True)
    ex2 = jnp.mean(h2 * h2, axis=-1, keepdims=True)
    xn = (h2 - mu) * jax.lax.rsqrt(ex2 - mu * mu + 1e-5)
    out = jnp.dot(xn.astype(jnp.bfloat16), wp_ref[...],
                  preferred_element_type=jnp.float32) + bp_ref[...]
    o_ref[...] = out                                          # lane-dense [tile, 128] store


# ------------------------------- glue (JAX) --------------------------------

def init_params(key):
    ks = jax.random.split(key, 3)
    return {
        "w1": jax.random.normal(ks[0], (CONV1_K, CONV_CH), jnp.float32) * 0.05,
        "b1": jnp.zeros((CONV_CH,), jnp.float32),
        "w2": jax.random.normal(ks[1], (CONV2_K * CONV_CH, CONV_CH), jnp.float32) * 0.02,
        "b2": jnp.zeros((CONV_CH,), jnp.float32),
        "ln_g": jnp.ones((CONV_CH,), jnp.float32),
        "ln_b": jnp.zeros((CONV_CH,), jnp.float32),
        "wp": jax.random.normal(ks[2], (CONV_CH, HIDDEN), jnp.float32) * 0.05,
        "bp": jnp.zeros((HIDDEN,), jnp.float32),
    }


def _round8(n):
    return ((n + 7) // 8) * 8


def ssl_forward(params, ref_audio_16k):
    """ref_audio_16k: [B, T] float32 -> last_hidden_state [B, T_frames, HIDDEN]."""
    B, T = ref_audio_16k.shape
    t1 = (T - CONV1_K) // CONV1_S + 1
    t2 = (t1 - CONV2_K) // CONV2_S + 1

    # Large time tile to amortize per-grid-step overhead; keep >=2 grid steps
    # so both v7x TensorCores are fed.
    tile = min(TILE_T2, _round8(t2))
    if B * pl.cdiv(t2, tile) < 2 and t2 > 8:
        tile = _round8(pl.cdiv(t2, 2))
    nt = pl.cdiv(t2, tile)
    rows = nt * tile

    # Per-output-frame audio windows: aw[b, f, :25] = audio[b, 10f : 10f+25].
    n10 = rows + 2
    a10 = jnp.pad(ref_audio_16k, ((0, 0), (0, n10 * 10 - T))).reshape(B, n10, 10)
    aw = jnp.concatenate(
        [a10[:, :rows, :],
         a10[:, 1:rows + 1, :],
         a10[:, 2:rows + 2, :5],
         jnp.zeros((B, rows, AW_W - 25), jnp.float32)],
        axis=-1)                                               # [B, rows, 32]

    C, H = CONV_CH, HIDDEN

    # Combined conv1 weight: w1 placed at row offsets 0/5/10/15, one column
    # block per contributing conv1 frame (e0 | o0 | e1 | o1).
    w1b = jnp.zeros((AW_W, CONV2_K * C), jnp.float32)
    for k in range(CONV2_K):
        w1b = w1b.at[5 * k:5 * k + CONV1_K, k * C:(k + 1) * C].set(params["w1"])
    w1b = w1b.astype(jnp.bfloat16)
    b1b = jnp.tile(params["b1"], (CONV2_K,)).reshape(1, CONV2_K * C)

    w2 = params["w2"].astype(jnp.bfloat16)                     # [4C, C]
    b2 = params["b2"].reshape(1, C)

    # Fold LayerNorm gamma/beta into the projection (exact, done in f32).
    wp_f = (params["ln_g"][:, None] * params["wp"]).astype(jnp.bfloat16)
    bp_f = (params["bp"] + params["ln_b"] @ params["wp"]).reshape(1, H)

    wmap = lambda b, j: (0, 0)                                 # weights resident
    out = pl.pallas_call(
        _ssl_kernel,
        out_shape=jax.ShapeDtypeStruct((B, rows, H), jnp.float32),
        grid_spec=pltpu.PrefetchScalarGridSpec(
            num_scalar_prefetch=0,
            grid=(B, nt),
            in_specs=[
                pl.BlockSpec((None, tile, AW_W), lambda b, j: (b, j, 0)),  # aw
                pl.BlockSpec((AW_W, CONV2_K * C), wmap),                   # w1b (bf16)
                pl.BlockSpec((1, CONV2_K * C), wmap),                      # b1b
                pl.BlockSpec((CONV2_K * C, C), wmap),                      # w2  (bf16)
                pl.BlockSpec((1, C), wmap),                                # b2
                pl.BlockSpec((C, H), wmap),                                # wp  (bf16, LN folded)
                pl.BlockSpec((1, H), wmap),                                # bp  (LN folded)
            ],
            out_specs=pl.BlockSpec((None, tile, H), lambda b, j: (b, j, 0)),
        ),
        compiler_params=pltpu.CompilerParams(
            dimension_semantics=("parallel", "parallel"),
        ),
    )(aw, w1b, b1b, w2, b2, wp_f, bp_f)

    return out[:, :t2, :]                                      # trim row padding


if __name__ == "__main__":
    key = jax.random.PRNGKey(0)
    pkey, dkey = jax.random.split(key)
    params = init_params(pkey)

    B, T = 2, 1600                                             # small 16 kHz waveform
    ref_audio_16k = jax.random.normal(dkey, (B, T), jnp.float32)

    last_hidden_state = jax.jit(ssl_forward)(params, ref_audio_16k)
    last_hidden_state = jax.block_until_ready(last_hidden_state)

    assert last_hidden_state.shape == (B, 158, HIDDEN), last_hidden_state.shape
    assert last_hidden_state.dtype == jnp.float32
    assert bool(jnp.all(jnp.isfinite(last_hidden_state)))
    print("KERNEL_OK")
</pallas_src>

<mosaic_0001>
module attributes {stable_mosaic.version = 11 : i64} {
  func.func @_ssl_kernel(%arg0: i32, %arg1: i32, %arg2: memref<1x160x32xf32, #tpu.memory_space<vmem>>, %arg3: memref<32x512xbf16, #tpu.memory_space<vmem>>, %arg4: memref<1x512xf32, #tpu.memory_space<vmem>>, %arg5: memref<512x128xbf16, #tpu.memory_space<vmem>>, %arg6: memref<1x128xf32, #tpu.memory_space<vmem>>, %arg7: memref<128x128xbf16, #tpu.memory_space<vmem>>, %arg8: memref<1x128xf32, #tpu.memory_space<vmem>>, %arg9: memref<1x160x128xf32, #tpu.memory_space<vmem>>) attributes {dimension_semantics = [#tpu.dimension_semantics<parallel>, #tpu.dimension_semantics<parallel>], iteration_bounds = array<i64: 2, 1>, scalar_prefetch = 0 : i64, scratch_operands = 0 : i64, tpu.core_type = #tpu.core_type<tc>, window_params = [{transform_indices = @transform_0, window_bounds = array<i64: 1, 160, 32>}, {pipeline_mode = #tpu.pipeline_mode<synchronous>, transform_indices = @transform_1, window_bounds = array<i64: 32, 512>}, {pipeline_mode = #tpu.pipeline_mode<synchronous>, transform_indices = @transform_2, window_bounds = array<i64: 1, 512>}, {pipeline_mode = #tpu.pipeline_mode<synchronous>, transform_indices = @transform_3, window_bounds = array<i64: 512, 128>}, {pipeline_mode = #tpu.pipeline_mode<synchronous>, transform_indices = @transform_4, window_bounds = array<i64: 1, 128>}, {pipeline_mode = #tpu.pipeline_mode<synchronous>, transform_indices = @transform_5, window_bounds = array<i64: 128, 128>}, {pipeline_mode = #tpu.pipeline_mode<synchronous>, transform_indices = @transform_6, window_bounds = array<i64: 1, 128>}, {transform_indices = @transform_7, window_bounds = array<i64: 1, 160, 128>}]} {
    %c0 = arith.constant 0 : index
    %c0_0 = arith.constant 0 : index
    %c0_1 = arith.constant 0 : index
    %0 = vector.load %arg2[%c0, %c0_0, %c0_1] : memref<1x160x32xf32, #tpu.memory_space<vmem>>, vector<1x160x32xf32>
    %1 = vector.shape_cast %0 : vector<1x160x32xf32> to vector<160x32xf32>
    %2 = arith.truncf %1 : vector<160x32xf32> to vector<160x32xbf16>
    %c0_2 = arith.constant 0 : index
    %c0_3 = arith.constant 0 : index
    %3 = vector.load %arg3[%c0_2, %c0_3] : memref<32x512xbf16, #tpu.memory_space<vmem>>, vector<32x512xbf16>
    %cst = arith.constant dense<0.000000e+00> : vector<160x512xf32>
    %4 = tpu.matmul %2, %3, %cst {dimension_numbers = #tpu.dot_dimension_numbers<[1], [0], [0], [1], [0, 0, 1, 1], [], []>} : vector<160x32xbf16>, vector<32x512xbf16>, vector<160x512xf32> -> vector<160x512xf32>
    %c0_4 = arith.constant 0 : index
    %c0_5 = arith.constant 0 : index
    %5 = vector.load %arg4[%c0_4, %c0_5] : memref<1x512xf32, #tpu.memory_space<vmem>>, vector<1x512xf32>
    %6 = vector.broadcast %5 : vector<1x512xf32> to vector<160x512xf32>
    %7 = arith.addf %4, %6 : vector<160x512xf32>
    %cst_6 = arith.constant 5.000000e-01 : f32
    %8 = vector.broadcast %cst_6 : f32 to vector<160x512xf32>
    %9 = arith.mulf %8, %7 : vector<160x512xf32>
    %cst_7 = arith.constant 4.471500e-02 : f32
    %10 = vector.broadcast %cst_7 : f32 to vector<160x512xf32>
    %11 = arith.mulf %10, %7 : vector<160x512xf32>
    %12 = arith.mulf %11, %7 : vector<160x512xf32>
    %13 = arith.mulf %12, %7 : vector<160x512xf32>
    %14 = arith.addf %7, %13 : vector<160x512xf32>
    %cst_8 = arith.constant 0.797884583 : f32
    %15 = vector.broadcast %cst_8 : f32 to vector<160x512xf32>
    %16 = arith.mulf %15, %14 : vector<160x512xf32>
    %17 = math.tanh %16 : vector<160x512xf32>
    %cst_9 = arith.constant 1.000000e+00 : f32
    %18 = vector.broadcast %cst_9 : f32 to vector<160x512xf32>
    %19 = arith.addf %18, %17 : vector<160x512xf32>
    %20 = arith.mulf %9, %19 : vector<160x512xf32>
    %21 = arith.truncf %20 : vector<160x512xf32> to vector<160x512xbf16>
    %c0_10 = arith.constant 0 : index
    %c0_11 = arith.constant 0 : index
    %22 = vector.load %arg5[%c0_10, %c0_11] : memref<512x128xbf16, #tpu.memory_space<vmem>>, vector<512x128xbf16>
    %cst_12 = arith.constant dense<0.000000e+00> : vector<160x128xf32>
    %23 = tpu.matmul %21, %22, %cst_12 {dimension_numbers = #tpu.dot_dimension_numbers<[1], [0], [0], [1], [0, 0, 1, 1], [], []>} : vector<160x512xbf16>, vector<512x128xbf16>, vector<160x128xf32> -> vector<160x128xf32>
    %c0_13 = arith.constant 0 : index
    %c0_14 = arith.constant 0 : index
    %24 = vector.load %arg6[%c0_13, %c0_14] : memref<1x128xf32, #tpu.memory_space<vmem>>, vector<1x128xf32>
    %25 = vector.broadcast %24 : vector<1x128xf32> to vector<160x128xf32>
    %26 = arith.addf %23, %25 : vector<160x128xf32>
    %cst_15 = arith.constant 5.000000e-01 : f32
    %27 = vector.broadcast %cst_15 : f32 to vector<160x128xf32>
    %28 = arith.mulf %27, %26 : vector<160x128xf32>
    %cst_16 = arith.constant 4.471500e-02 : f32
    %29 = vector.broadcast %cst_16 : f32 to vector<160x128xf32>
    %30 = arith.mulf %29, %26 : vector<160x128xf32>
    %31 = arith.mulf %30, %26 : vector<160x128xf32>
    %32 = arith.mulf %31, %26 : vector<160x128xf32>
    %33 = arith.addf %26, %32 : vector<160x128xf32>
    %cst_17 = arith.constant 0.797884583 : f32
    %34 = vector.broadcast %cst_17 : f32 to vector<160x128xf32>
    %35 = arith.mulf %34, %33 : vector<160x128xf32>
    %36 = math.tanh %35 : vector<160x128xf32>
    %cst_18 = arith.constant 1.000000e+00 : f32
    %37 = vector.broadcast %cst_18 : f32 to vector<160x128xf32>
    %38 = arith.addf %37, %36 : vector<160x128xf32>
    %39 = arith.mulf %28, %38 : vector<160x128xf32>
    %cst_19 = arith.constant dense<0.000000e+00> : vector<160xf32>
    %40 = vector.multi_reduction <add>, %39, %cst_19 [1] : vector<160x128xf32> to vector<160xf32>
    %41 = vector.shape_cast %40 : vector<160xf32> to vector<160x1xf32>
    %cst_20 = arith.constant 1.280000e+02 : f32
    %42 = vector.broadcast %cst_20 : f32 to vector<160x1xf32>
    %43 = arith.divf %41, %42 : vector<160x1xf32>
    %44 = arith.mulf %39, %39 : vector<160x128xf32>
    %cst_21 = arith.constant dense<0.000000e+00> : vector<160xf32>
    %45 = vector.multi_reduction <add>, %44, %cst_21 [1] : vector<160x128xf32> to vector<160xf32>
    %46 = vector.shape_cast %45 : vector<160xf32> to vector<160x1xf32>
    %cst_22 = arith.constant 1.280000e+02 : f32
    %47 = vector.broadcast %cst_22 : f32 to vector<160x1xf32>
    %48 = arith.divf %46, %47 : vector<160x1xf32>
    %49 = vector.broadcast %43 : vector<160x1xf32> to vector<160x128xf32>
    %50 = arith.subf %39, %49 : vector<160x128xf32>
    %51 = arith.mulf %43, %43 : vector<160x1xf32>
    %52 = arith.subf %48, %51 : vector<160x1xf32>
    %cst_23 = arith.constant 9.99999974E-6 : f32
    %53 = vector.broadcast %cst_23 : f32 to vector<160x1xf32>
    %54 = arith.addf %52, %53 : vector<160x1xf32>
    %55 = math.rsqrt %54 : vector<160x1xf32>
    %56 = vector.broadcast %55 : vector<160x1xf32> to vector<160x128xf32>
    %57 = arith.mulf %50, %56 : vector<160x128xf32>
    %58 = arith.truncf %57 : vector<160x128xf32> to vector<160x128xbf16>
    %c0_24 = arith.constant 0 : index
    %c0_25 = arith.constant 0 : index
    %59 = vector.load %arg7[%c0_24, %c0_25] : memref<128x128xbf16, #tpu.memory_space<vmem>>, vector<128x128xbf16>
    %cst_26 = arith.constant dense<0.000000e+00> : vector<160x128xf32>
    %60 = tpu.matmul %58, %59, %cst_26 {dimension_numbers = #tpu.dot_dimension_numbers<[1], [0], [0], [1], [0, 0, 1, 1], [], []>} : vector<160x128xbf16>, vector<128x128xbf16>, vector<160x128xf32> -> vector<160x128xf32>
    %c0_27 = arith.constant 0 : index
    %c0_28 = arith.constant 0 : index
    %61 = vector.load %arg8[%c0_27, %c0_28] : memref<1x128xf32, #tpu.memory_space<vmem>>, vector<1x128xf32>
    %62 = vector.broadcast %61 : vector<1x128xf32> to vector<160x128xf32>
    %63 = arith.addf %60, %62 : vector<160x128xf32>
    %c0_29 = arith.constant 0 : index
    %c0_30 = arith.constant 0 : index
    %c0_31 = arith.constant 0 : index
    %64 = vector.load %arg9[%c0_29, %c0_30, %c0_31] : memref<1x160x128xf32, #tpu.memory_space<vmem>>, vector<1x160x128xf32>
    %65 = vector.shape_cast %64 : vector<1x160x128xf32> to vector<160x128xf32>
    %66 = vector.shape_cast %63 : vector<160x128xf32> to vector<1x160x128xf32>
    tpu.vector_store %arg9[%c0_29, %c0_30, %c0_31], %66 {strides = array<i32>} : memref<1x160x128xf32, #tpu.memory_space<vmem>>, vector<1x160x128xf32>,
    return
  }
  func.func @transform_0(%arg0: i32, %arg1: i32) -> (i32, i32, i32) {
    %c0_i32 = arith.constant 0 : i32
    %c0_i32_0 = arith.constant 0 : i32
    return %arg0, %arg1, %c0_i32 : i32, i32, i32
  }
  func.func @transform_1(%arg0: i32, %arg1: i32) -> (i32, i32) {
    %c0_i32 = arith.constant 0 : i32
    %c0_i32_0 = arith.constant 0 : i32
    %c0_i32_1 = arith.constant 0 : i32
    return %c0_i32, %c0_i32_0 : i32, i32
  }
  func.func @transform_2(%arg0: i32, %arg1: i32) -> (i32, i32) {
    %c0_i32 = arith.constant 0 : i32
    %c0_i32_0 = arith.constant 0 : i32
    %c0_i32_1 = arith.constant 0 : i32
    return %c0_i32, %c0_i32_0 : i32, i32
  }
  func.func @transform_3(%arg0: i32, %arg1: i32) -> (i32, i32) {
    %c0_i32 = arith.constant 0 : i32
    %c0_i32_0 = arith.constant 0 : i32
    %c0_i32_1 = arith.constant 0 : i32
    return %c0_i32, %c0_i32_0 : i32, i32
  }
  func.func @transform_4(%arg0: i32, %arg1: i32) -> (i32, i32) {
    %c0_i32 = arith.constant 0 : i32
    %c0_i32_0 = arith.constant 0 : i32
    %c0_i32_1 = arith.constant 0 : i32
    return %c0_i32, %c0_i32_0 : i32, i32
  }
  func.func @transform_5(%arg0: i32, %arg1: i32) -> (i32, i32) {
    %c0_i32 = arith.constant 0 : i32
    %c0_i32_0 = arith.constant 0 : i32
    %c0_i32_1 = arith.constant 0 : i32
    return %c0_i32, %c0_i32_0 : i32, i32
  }
  func.func @transform_6(%arg0: i32, %arg1: i32) -> (i32, i32) {
    %c0_i32 = arith.constant 0 : i32
    %c0_i32_0 = arith.constant 0 : i32
    %c0_i32_1 = arith.constant 0 : i32
    return %c0_i32, %c0_i32_0 : i32, i32
  }
  func.func @transform_7(%arg0: i32, %arg1: i32) -> (i32, i32, i32) {
    %c0_i32 = arith.constant 0 : i32
    %c0_i32_0 = arith.constant 0 : i32
    return %arg0, %arg1, %c0_i32 : i32, i32, i32
  }
}

</mosaic_0001>

<bundles_post_ra>
// kernel: tile.8
= control target key start
LH: loop header
LB: loop body
LE: loop exit
PB: predicated region body
PF: predicated region fallthrough
CT: control target
= control target key end

     0   :  { %s22_s0 = inlined_call_operand.vmem [shape: f32[128], index: 0, kind: input, shape index: {}]   ;;  %s23_s1 = inlined_call_operand.vmem [shape: f32[4,128], index: 1, kind: output, shape index: {}]  }
   0x1   :  { %v4_v0 = vld [vmem:[%s22_s0] ss:$0 sm:$0xff] }
   0x2   :  { %5 = vst [vmem:[%s23_s1] sm:$0xf] %v4_v0 }

// kernel: ssl_forward.1
= control target key start
LH: loop header
LB: loop body
LE: loop exit
PB: predicated region body
PF: predicated region fallthrough
CT: control target
= control target key end

     0   :  { %s3379_s24 = smov 0   ;;  %s3381_s25 = smov 0   ;;  %s4941_s0 = inlined_call_operand.vmem [shape: f32[2,160,32], index: 0, kind: input, shape index: {}]   ;;  %s4942_s1 = inlined_call_operand.vmem [shape: bf16[32,512], index: 1, kind: input, shape index: {}]   ;;  %s4943_s2 = inlined_call_operand.vmem [shape: f32[1,512], index: 2, kind: input, shape index: {}]   ;;  %s4944_s3 = inlined_call_operand.vmem [shape: bf16[512,128], index: 3, kind: input, shape index: {}]   ;;  %s4945_s4 = inlined_call_operand.vmem [shape: f32[1,128], index: 4, kind: input, shape index: {}]   ;;  %s4946_s5 = inlined_call_operand.vmem [shape: bf16[128,128], index: 5, kind: input, shape index: {}]   ;;  %s4947_s6 = inlined_call_operand.vmem [shape: f32[1,128], index: 6, kind: input, shape index: {}]   ;;  %s4948_s7 = inlined_call_operand.vmem [shape: f32[2,160,128], index: 7, kind: output, shape index: {}]  }
   0x1   :  { %s3383_s26 = smov 0  }
   0x2 LB: > { %s29_s27 = sadd.s32 1, %s3332_s25  ;;  %p2711_p0 = scmp.ge.s32.totalorder %s3336_s26, 1  ;;  %s3336_s26 = sphi %s3383_s26, %s17_s26   ;;  %s3332_s25 = sphi %s3381_s25, %s5199_s25   ;;  %s3328_s24 = sphi %s3379_s24, %s5198_s24  }
   0x3   : > { %p31_p1 = scmp.ge.s32.totalorder %s29_s27, 2  ;;  %p258_p2 = scmp.lt.s32.totalorder %s3336_s26, 3 }
   0x5   : > { %s5201_s27 = smov (%p31_p1, %s29_s27), 0  ;;  %p259_p3 = pnand %p2711_p0, %p258_p2 }
   0x7   : > { %262 = sbr.rel (%p259_p3) target bundleno = 1090 (0x442), region = 48 }
   0xe   : > { %v3022_v0 = vld [vmem:[%s4942_s1 + $0x4] ss:$16 sps:$4 sm:$0xff]   ;;  %p299_p4 = scmp.lt.s32.totalorder %s3328_s24, 1  ;;  %v3024_v1 = vld [vmem:[%s4942_s1] ss:$16 sps:$4 sm:$0xff]   ;;  %v3338_v2 = vmov 0  }
   0xf   : > { %482 = vmatprep.mubr.bf16.mxu0 %v3338_v2  ;;  %562 = vmatprep.mubr.bf16.mxu1 %v3338_v2  ;;  %v3025_v3 = vld [vmem:[%s4942_s1 + $0x24] ss:$16 sps:$4 sm:$0xff]   ;;  %v3027_v4 = vld [vmem:[%s4942_s1 + $0x20] ss:$16 sps:$4 sm:$0xff]   ;;  %v3030_v5 = vld [vmem:[%s4942_s1 + $0xc] ss:$16 sps:$4 sm:$0xff]  }
  0x10   : > { %450 = vmatprep.subr.bf16.mxu0 %v3022_v0  ;;  %2992 = vmatprep.subr.bf16.mxu1 %v3022_v0  ;;  %s5203_s24 = smov (!%p299_p4, %s3328_s24), 1  ;;  %vm419_vm0 = vcmask 261120   ;;  %v3028_v11 = vld [vmem:[%s4942_s1 + $0x8] ss:$16 sps:$4 sm:$0xff]   ;;  %v3033_v13 = vld [vmem:[%s4942_s1 + $0x2c] ss:$16 sps:$4 sm:$0xff]  }
  0x11   : > { %451 = vmatpush1.bf16.msra.mxu0 %v3024_v1  ;;  %2994 = vmatpush1.bf16.msra.mxu1 %v3024_v1  ;;  %s2996_s13 = smul.u32 160, %s5203_s24  ;;  %v3031_v18 = vld [vmem:[%s4942_s1 + $0x28] ss:$16 sps:$4 sm:$0xff]   ;;  %v3034_v19 = vld [vmem:[%s4944_s3 + $0xc0] sm:$0xff]   ;;  %v3040_v34 = vld [vmem:[%s4944_s3 + $0xd0] sm:$0xff]  }
  0x12   : > { %452 = vmatprep.subr.bf16.mxu0 %v3025_v3  ;;  %2993 = vmatprep.subr.bf16.mxu1 %v3025_v3  ;;  %v3038_v22 = vld [vmem:[%s4944_s3 + $0x40] sm:$0xff]   ;;  %v3042_v26 = vld [vmem:[%s4944_s3 + $0x48] sm:$0xff]   ;;  %v3041_v36 = vld [vmem:[%s4944_s3 + $0x90] sm:$0xff]  }
  0x13   : > { %s3422_s18 = scalar_lea.vmem %s4941_s0, %s2996_s13  ;;  %v3039_v23 = vld [vmem:[%s4944_s3] sm:$0xff]   ;;  %v3043_v27 = vld [vmem:[%s4944_s3 + $0x8] sm:$0xff]   ;;  %v3044_v49 = vld [vmem:[%s4944_s3 + $0x50] sm:$0xff]   ;;  %s4910_s28 = scalar_lea.vmem %s4948_s7, %s2996_s13 }
  0x14   : > { %v319_v6 = vld [vmem:[%s3422_s18] sm:$0xff]  ;;  %v320_v7 = vld [vmem:[%s3422_s18 + $0x8] sm:$0xff]  ;;  %v321_v14 = vld [vmem:[%s3422_s18 + $0x10] sm:$0xff] }
  0x15   : > { %453 = vmatpush1.bf16.msra.mxu0 %v3027_v4  ;;  %2995 = vmatpush1.bf16.msra.mxu1 %v3027_v4  ;;  %v335_v8 = vld [vmem:[%s3422_s18 + $0x80] sm:$0xff]  ;;  %v339_v9 = vpack.c.bf16 %v320_v7, %v319_v6  ;;  %v336_v10 = vld [vmem:[%s3422_s18 + $0x88] sm:$0xff]  ;;  %v322_v15 = vld [vmem:[%s3422_s18 + $0x18] sm:$0xff]  ;;  %v359_v7 = vlaneseq }
  0x16   : > { %583 = vmatprep.subr.bf16.mxu1 %v3030_v5  ;;  %v3431_v12 = vpack.c.bf16 %v336_v10, %v335_v8  ;;  %v337_v16 = vld [vmem:[%s3422_s18 + $0x90] sm:$0xff]  ;;  %v338_v17 = vld [vmem:[%s3422_s18 + $0x98] sm:$0xff]  ;;  %v340_v20 = vpack.c.bf16 %v322_v15, %v321_v14  ;;  %v323_v24 = vld [vmem:[%s3422_s18 + $0x20] sm:$0xff]  ;;  %2786 = vmatprep.subr.bf16.mxu0 %v3038_v22 }
  0x17   : > { %v3451_v21 = vpack.c.bf16 %v338_v17, %v337_v16  ;;  %v324_v25 = vld [vmem:[%s3422_s18 + $0x28] sm:$0xff]  ;;  %v3035_v29 = vld [vmem:[%s4944_s3 + $0x80] sm:$0xff]   ;;  %v325_v31 = vld [vmem:[%s3422_s18 + $0x30] sm:$0xff]  ;;  %v360_v8 = vshrl.u32 %v359_v7, 7 }
  0x18   : > { %2722 = vmatmul.mubr.msk.bf16.vlgmr.msra.gmra.mrb[0].mxu0 %vm419_vm0, %v339_v9  ;;  %2730 = vmatmul.mubr.msk.bf16.vlgmr.msra.gmra.mrb[0].mxu1 %vm419_vm0, %v3431_v12  ;;  %v341_v28 = vpack.c.bf16 %v324_v25, %v323_v24  ;;  %v3036_v30 = vld [vmem:[%s4944_s3 + $0xc8] sm:$0xff]   ;;  %v326_v32 = vld [vmem:[%s3422_s18 + $0x38] sm:$0xff]  ;;  %v327_v37 = vld [vmem:[%s3422_s18 + $0x40] sm:$0xff] }
  0x19   : > { %492 = vmatprep.mubr.bf16.mxu0 %v3338_v2  ;;  %584 = vmatpush1.bf16.msra.mxu1 %v3028_v11  ;;  %v3037_v33 = vld [vmem:[%s4944_s3 + $0x88] sm:$0xff]   ;;  %v342_v35 = vpack.c.bf16 %v326_v32, %v325_v31  ;;  %v329_v40 = vld [vmem:[%s3422_s18 + $0x50] sm:$0xff]  ;;  %v330_v41 = vld [vmem:[%s3422_s18 + $0x58] sm:$0xff]  ;;  %v365_v11 = vsub.s32 1, %v360_v8  ;;  %v369_v31 = vsub.s32 2, %v360_v8 }
  0x1a   : > { %572 = vmatprep.mubr.bf16.mxu1 %v3338_v2  ;;  %585 = vmatprep.subr.bf16.mxu1 %v3033_v13  ;;  %v328_v38 = vld [vmem:[%s3422_s18 + $0x48] sm:$0xff]  ;;  %v344_v42 = vpack.c.bf16 %v330_v41, %v329_v40  ;;  %v331_v43 = vld [vmem:[%s3422_s18 + $0x60] sm:$0xff]  ;;  %v333_v46 = vld [vmem:[%s3422_s18 + $0x70] sm:$0xff] }
  0x1b   : > { %2787 = vmatpush3.bf16.msra.mxu0 %v3039_v23  ;;  %v343_v39 = vpack.c.bf16 %v328_v38, %v327_v37  ;;  %v332_v44 = vld [vmem:[%s3422_s18 + $0x68] sm:$0xff]  ;;  %v334_v47 = vld [vmem:[%s3422_s18 + $0x78] sm:$0xff]  ;;  %v3046_v50 = vld [vmem:[%s4944_s3 + $0x10] sm:$0xff]   ;;  %v373_v37 = vsub.s32 3, %v360_v8 }
  0x1c   : > { %2788 = vmatprep.subr.bf16.mxu0 %v3042_v26  ;;  %v345_v45 = vpack.c.bf16 %v332_v44, %v331_v43  ;;  %v346_v48 = vpack.c.bf16 %v334_v47, %v333_v46  ;;  %v3045_v51 = vld [vmem:[%s4944_s3 + $0xd8] sm:$0xff]   ;;  %v3050_v55 = vld [vmem:[%s4944_s3 + $0xe0] sm:$0xff]   ;;  %v3056_v59 = vld [vmem:[%s4944_s3 + $0x68] sm:$0xff]  }
  0x1d   : > { %586 = vmatpush1.bf16.msra.mxu1 %v3031_v18  ;;  %v3047_v52 = vld [vmem:[%s4944_s3 + $0x98] sm:$0xff]   ;;  %v3052_v56 = vld [vmem:[%s4944_s3 + $0x60] sm:$0xff]   ;;  %v3057_v60 = vld [vmem:[%s4944_s3 + $0x28] sm:$0xff]  }
  0x1e   : > { %2862 = vmatprep.subr.bf16.mxu1 %v3034_v19  ;;  %v3048_v53 = vld [vmem:[%s4944_s3 + $0x58] sm:$0xff]   ;;  %v3053_v57 = vld [vmem:[%s4944_s3 + $0x20] sm:$0xff]   ;;  %v3058_v61 = vld [vmem:[%s4944_s3 + $0x70] sm:$0xff]  }
  0x1f   : > { %2789 = vmatpush3.bf16.msra.mxu0 %v3043_v27  ;;  %v3049_v54 = vld [vmem:[%s4944_s3 + $0x18] sm:$0xff]   ;;  %v3051_v58 = vld [vmem:[%s4944_s3 + $0xa0] sm:$0xff]   ;;  %v3059_v62 = vld [vmem:[%s4944_s3 + $0x30] sm:$0xff]  }
  0x20   : > { %2723 = vmatmul.mubr.msk.bf16.gmra.mrb[4].mxu0 %vm419_vm0, %v340_v20  ;;  %2731 = vmatmul.mubr.msk.bf16.gmra.mrb[4].mxu1 %vm419_vm0, %v3451_v21  ;;  %v3054_v63 = vld [vmem:[%s4944_s3 + $0xe8] sm:$0xff]   ;;  %v3060_v1 = vld [vmem:[%s4944_s3 + $0x78] sm:$0xff]   ;;  %v3061_v3 = vld [vmem:[%s4944_s3 + $0xf0] sm:$0xff]  }
  0x21   : > { %502 = vmatprep.mubr.bf16.mxu0 %v3338_v2  ;;  %615 = vmatprep.mubr.bf16.mxu1 %v3338_v2  ;;  %v3055_v0 = vld [vmem:[%s4944_s3 + $0xa8] sm:$0xff]   ;;  %v3063_v4 = vld [vmem:[%s4944_s3 + $0xb0] sm:$0xff]   ;;  %v3064_v5 = vld [vmem:[%s4944_s3 + $0xf8] sm:$0xff]  }
  0x22   : > { %2790 = vmatprep.subr.bf16.mxu0 %v3044_v49  ;;  %v3065_v6 = vld [vmem:[%s4944_s3 + $0xb8] sm:$0xff]   ;;  %v357_v10 = vld [vmem:[%s4943_s2] sm:$0xf] }
  0x23   : > { %2791 = vmatpush3.bf16.msra.mxu0 %v3046_v50  ;;  %v3600_v13 = vrot.slane %v357_v10, %v365_v11  ;;  %v3628_v44 = vrot.slane %v357_v10, %v369_v31 }
  0x24   : > { %2792 = vmatprep.subr.bf16.mxu0 %v3048_v53 }
  0x27   : > { %2793 = vmatpush3.bf16.msra.mxu0 %v3049_v54 }
  0x28   : > { %2724 = vmatmul.mubr.msk.bf16.gmra.mrb[8].mxu0 %vm419_vm0, %v341_v28  ;;  %2732 = vmatmul.mubr.msk.bf16.vlgmr.msra.gmra.mrb[8].mxu1 %vm419_vm0, %v339_v9  ;;  %v361_v9 = vsub.s32 0, %v360_v8 }
  0x29   : > { %512 = vmatprep.mubr.bf16.mxu0 %v3338_v2  ;;  %625 = vmatprep.mubr.bf16.mxu1 %v3338_v2 }
  0x2a   : > { %2863 = vmatpush3.bf16.msra.mxu1 %v3035_v29  ;;  %2794 = vmatprep.subr.bf16.mxu0 %v3052_v56 }
  0x2b   : > { %2864 = vmatprep.subr.bf16.mxu1 %v3036_v30  ;;  %2795 = vmatpush3.bf16.msra.mxu0 %v3053_v57 }
  0x2c   : > { %2796 = vmatprep.subr.bf16.mxu0 %v3056_v59 }
  0x2e   : > { %2865 = vmatpush3.bf16.msra.mxu1 %v3037_v33 }
  0x2f   : > { %2866 = vmatprep.subr.bf16.mxu1 %v3040_v34  ;;  %2797 = vmatpush3.bf16.msra.mxu0 %v3057_v60 }
  0x30   : > { %2725 = vmatmul.mubr.msk.bf16.gmra.mrb[12].mxu0 %vm419_vm0, %v342_v35  ;;  %2733 = vmatmul.mubr.msk.bf16.gmra.mrb[12].mxu1 %vm419_vm0, %v340_v20 }
  0x31   : > { %522 = vmatprep.mubr.bf16.mxu0 %v3338_v2  ;;  %635 = vmatprep.mubr.bf16.mxu1 %v3338_v2 }
  0x32   : > { %2867 = vmatpush3.bf16.msra.mxu1 %v3041_v36  ;;  %2798 = vmatprep.subr.bf16.mxu0 %v3058_v61 }
  0x33   : > { %2868 = vmatprep.subr.bf16.mxu1 %v3045_v51  ;;  %2799 = vmatpush3.bf16.msra.mxu0 %v3059_v62  ;;  %v3646_v62 = vrot.slane %v357_v10, %v373_v37 }
  0x34   : > { %2800 = vmatprep.subr.bf16.mxu0 %v3060_v1 }
  0x36   : > { %2869 = vmatpush3.bf16.msra.mxu1 %v3047_v52 }
  0x37   : > { %2870 = vmatprep.subr.bf16.mxu1 %v3050_v55 }
  0x38   : > { %2726 = vmatmul.mubr.msk.bf16.gmra.mrb[16].mxu0 %vm419_vm0, %v343_v39  ;;  %2734 = vmatmul.mubr.msk.bf16.gmra.mrb[16].mxu1 %vm419_vm0, %v341_v28 }
  0x39   : > { %532 = vmatprep.mubr.bf16.mxu0 %v3338_v2  ;;  %645 = vmatprep.mubr.bf16.mxu1 %v3338_v2 }
  0x3a   : > { %2871 = vmatpush3.bf16.msra.mxu1 %v3051_v58 }
  0x3b   : > { %2872 = vmatprep.subr.bf16.mxu1 %v3054_v63 }
  0x3e   : > { %2873 = vmatpush3.bf16.msra.mxu1 %v3055_v0 }
  0x3f   : > { %2874 = vmatprep.subr.bf16.mxu1 %v3061_v3 }
  0x40   : > { %2727 = vmatmul.mubr.msk.bf16.gmra.mrb[20].mxu0 %vm419_vm0, %v344_v42  ;;  %2735 = vmatmul.mubr.msk.bf16.gmra.mrb[20].mxu1 %vm419_vm0, %v342_v35 }
  0x41   : > { %542 = vmatprep.mubr.bf16.mxu0 %v3338_v2  ;;  %655 = vmatprep.mubr.bf16.mxu1 %v3338_v2 }
  0x42   : > { %2875 = vmatpush3.bf16.msra.mxu1 %v3063_v4 }
  0x43   : > { %2876 = vmatprep.subr.bf16.mxu1 %v3064_v5 }
  0x46   : > { %2877 = vmatpush3.bf16.msra.mxu1 %v3065_v6 }
  0x48   : > { %2728 = vmatmul.mubr.msk.bf16.gmra.mrb[24].mxu0 %vm419_vm0, %v345_v45  ;;  %2736 = vmatmul.mubr.msk.bf16.gmra.mrb[24].mxu1 %vm419_vm0, %v343_v39 }
  0x49   : > { %552 = vmatprep.mubr.bf16.mxu0 %v3338_v2  ;;  %665 = vmatprep.mubr.bf16.mxu1 %v3338_v2 }
  0x50   : > { %2729 = vmatmul.mubr.msk.bf16.gmra.mrb[28].mxu0 %vm419_vm0, %v346_v48  ;;  %2737 = vmatmul.mubr.msk.bf16.gmra.mrb[28].mxu1 %vm419_vm0, %v344_v42 }
  0x51   : > { %675 = vmatprep.mubr.bf16.mxu1 %v3338_v2 }
  0x58   : > { %2738 = vmatmul.mubr.msk.bf16.gmra.mrb[32].mxu1 %vm419_vm0, %v345_v45 }
  0x59   : > { %685 = vmatprep.mubr.bf16.mxu1 %v3338_v2 }
  0x60   : > { %2739 = vmatmul.mubr.msk.bf16.gmra.mrb[36].mxu1 %vm419_vm0, %v346_v48 }
  0x61   : > { %695 = vmatprep.mubr.bf16.mxu1 %v3338_v2 }
  0x68   : > { %2740 = vmatmul.mubr.msk.bf16.gmra.mrb[40].mxu1 %vm419_vm0, %v3431_v12  ;;  %v3598_v12 = vrot.slane %v357_v10, %v361_v9 }
  0x69   : > { %705 = vmatprep.mubr.bf16.mxu1 %v3338_v2  ;;  %v3062_v2 = vld [vmem:[%s4944_s3 + $0x38] sm:$0xff]  }
  0x6a   : > { %2801 = vmatpush3.bf16.msra.mxu0 %v3062_v2 }
  0x70   : > { %2741 = vmatmul.mubr.msk.bf16.gmra.mrb[44].mxu1 %vm419_vm0, %v3451_v21 }
  0xeb   : > { %v484_v14 = vpop.f32.mrb[0].mxu0  ;;  %v564_v16 = vpop.f32.mrb[0].mxu1 }
  0xec   : > { %v485_v15 = vadd.f32 %v484_v14, %v3598_v12  ;;  %v486_v17 = vpop.f32.mrb[1].mxu0  ;;  %v3604_v18 = vadd.f32 %v564_v16, %v3598_v12  ;;  %v566_v20 = vpop.f32.mrb[1].mxu1 }
  0xed   : > { %v3607_v19 = vadd.f32 %v486_v17, %v3600_v13  ;;  %v488_v21 = vpop.f32.mrb[2].mxu0  ;;  %v3610_v23 = vadd.f32 %v566_v20, %v3600_v13  ;;  %v568_v25 = vpop.f32.mrb[2].mxu1 }
  0xee   : > { %5021 = vst [vmem:[#allocation2_spill] sm:$0xff] %v3604_v18  ;;  %v796_v22 = vmul.f32 0.044715, %v485_v15  ;;  %v489_v24 = vadd.f32 %v488_v21, %v3598_v12  ;;  %v490_v26 = vpop.f32.mrb[3].mxu0  ;;  %v860_v27 = vmul.f32 0.044715, %v3604_v18  ;;  %v3615_v28 = vadd.f32 %v568_v25, %v3598_v12 }
  0xef   : > { %5022 = vst [vmem:[#allocation3_spill] sm:$0xff] %v3610_v23  ;;  %v3618_v29 = vadd.f32 %v490_v26, %v3600_v13  ;;  %v570_v30 = vpop.f32.mrb[3].mxu1  ;;  %v797_v33 = vmul.f32 0.044715, %v3607_v19  ;;  %v861_v34 = vmul.f32 0.044715, %v3610_v23 }
  0xf0   : > { %5023 = vst [vmem:[#allocation4_spill] sm:$0xff] %v3615_v28  ;;  %v876_v32 = vmul.f32 %v796_v22, %v485_v15  ;;  %v800_v35 = vmul.f32 0.044715, %v489_v24  ;;  %v864_v36 = vmul.f32 0.044715, %v3615_v28  ;;  %v3625_v41 = vadd.f32 %v570_v30, %v3600_v13 }
  0xf1   : > { %v801_v40 = vmul.f32 0.044715, %v3618_v29  ;;  %v940_v42 = vmul.f32 %v860_v27, %v3604_v18  ;;  %v877_v46 = vmul.f32 %v797_v33, %v3607_v19  ;;  %v941_v47 = vmul.f32 %v861_v34, %v3610_v23 }
  0xf2   : > { %v956_v38 = vmul.f32 %v876_v32, %v485_v15  ;;  %v880_v39 = vmul.f32 %v800_v35, %v489_v24  ;;  %5024 = vst [vmem:[#allocation5_spill] sm:$0xff] %v3625_v41  ;;  %v944_v51 = vmul.f32 %v864_v36, %v3615_v28  ;;  %v865_v52 = vmul.f32 0.044715, %v3625_v41 }
  0xf3   : > { %v494_v43 = vpop.f32.mrb[4].mxu0  ;;  %v574_v49 = vpop.f32.mrb[4].mxu1  ;;  %v3640_v57 = vmul.f32 0.5, %v485_v15  ;;  %v881_v58 = vmul.f32 %v801_v40, %v3618_v29  ;;  %v3655_v4 = vmul.f32 %v940_v42, %v3604_v18  ;;  %v3657_v5 = vmul.f32 0.5, %v489_v24 }
  0xf4   : > { %v1036_v45 = vadd.f32 %v956_v38, %v485_v15  ;;  %v960_v48 = vmul.f32 %v880_v39, %v489_v24  ;;  %v496_v50 = vpop.f32.mrb[5].mxu0  ;;  %v3635_v53 = vadd.f32 %v494_v43, %v3598_v12  ;;  %v3638_v54 = vadd.f32 %v574_v49, %v3598_v12  ;;  %v576_v55 = vpop.f32.mrb[5].mxu1 }
  0xf5   : > { %v498_v56 = vpop.f32.mrb[6].mxu0  ;;  %v3644_v59 = vadd.f32 %v496_v50, %v3600_v13  ;;  %v578_v60 = vpop.f32.mrb[6].mxu1  ;;  %v3649_v1 = vadd.f32 %v576_v55, %v3600_v13  ;;  %5027 = vst [vmem:[#allocation8_spill] sm:$0xff] %v3655_v4  ;;  %v3662_v8 = vmul.f32 %v877_v46, %v3607_v19  ;;  %v3665_v9 = vmul.f32 %v941_v47, %v3610_v23 }
  0xf6   : > { %5025 = vst [vmem:[#allocation6_spill] sm:$0xff] %v3638_v54  ;;  %v500_v61 = vpop.f32.mrb[7].mxu0  ;;  %v1116_v63 = vmul.f32 0.7978846, %v1036_v45  ;;  %v1040_v0 = vadd.f32 %v960_v48, %v489_v24  ;;  %v3652_v2 = vadd.f32 %v498_v56, %v3598_v12  ;;  %v580_v3 = vpop.f32.mrb[7].mxu1  ;;  %v3668_v10 = vmul.f32 %v944_v51, %v3615_v28 }
  0xf7   : > { %5026 = vst [vmem:[#allocation7_spill] sm:$0xff] %v3649_v1  ;;  %v804_v6 = vmul.f32 0.044715, %v3635_v53  ;;  %v868_v7 = vmul.f32 0.044715, %v3638_v54  ;;  %5028 = vst [vmem:[#allocation9_spill] sm:$0xff] %v3665_v9  ;;  %v945_v11 = vmul.f32 %v865_v52, %v3625_v41  ;;  %v3674_v16 = vadd.f32 %v578_v60, %v3598_v12 }
  0xf8   : > { %5029 = vst [vmem:[#allocation10_spill] sm:$0xff] %v3668_v10  ;;  %v805_v14 = vmul.f32 0.044715, %v3644_v59  ;;  %v869_v15 = vmul.f32 0.044715, %v3649_v1  ;;  %v3677_v17 = vadd.f32 %v500_v61, %v3600_v13  ;;  %3074 = vtanh.f32 %v1116_v63 }
  0xf9   : > { %5030 = vst [vmem:[#allocation11_spill] sm:$0xff] %v3674_v16  ;;  %v1120_v20 = vmul.f32 0.7978846, %v1040_v0  ;;  %v3680_v21 = vmul.f32 %v881_v58, %v3618_v29  ;;  %v808_v22 = vmul.f32 0.044715, %v3652_v2  ;;  %v884_v25 = vmul.f32 %v804_v6, %v3635_v53 }
  0xfa   : > { %v948_v26 = vmul.f32 %v868_v7, %v3638_v54  ;;  %v872_v27 = vmul.f32 0.044715, %v3674_v16  ;;  %v3687_v30 = vadd.f32 %v580_v3, %v3600_v13  ;;  %v3690_v33 = vmul.f32 %v945_v11, %v3625_v41 }
  0xfb   : > { %v504_v24 = vpop.f32.mrb[8].mxu0  ;;  %v617_v31 = vpop.f32.mrb[8].mxu1  ;;  %v809_v34 = vmul.f32 0.044715, %v3677_v17  ;;  %v885_v39 = vmul.f32 %v805_v14, %v3644_v59  ;;  %v949_v40 = vmul.f32 %v869_v15, %v3649_v1  ;;  %v888_v47 = vmul.f32 %v808_v22, %v3652_v2 }
  0xfc   : > { %5031 = vst [vmem:[#allocation12_spill] sm:$0xff] %v3687_v30  ;;  %v506_v32 = vpop.f32.mrb[9].mxu0  ;;  %5032 = vst [vmem:[#allocation13_spill] sm:$0xff] %v3690_v33  ;;  %v3694_v35 = vadd.f32 %v504_v24, %v3598_v12  ;;  %v618_v36 = vadd.f32 %v617_v31, %v3628_v44  ;;  %v619_v37 = vpop.f32.mrb[9].mxu1  ;;  %v873_v42 = vmul.f32 0.044715, %v3687_v30  ;;  %3076 = vtanh.f32 %v1120_v20 }
  0xfd   : > { %v508_v38 = vpop.f32.mrb[10].mxu0  ;;  %v3701_v43 = vadd.f32 %v506_v32, %v3600_v13  ;;  %v621_v45 = vpop.f32.mrb[10].mxu1  ;;  %v3706_v50 = vadd.f32 %v619_v37, %v3646_v62  ;;  %v3709_v52 = vmul.f32 %v884_v25, %v3635_v53  ;;  %v3712_v55 = vmul.f32 %v948_v26, %v3638_v54 }
  0xfe   : > { %v510_v46 = vpop.f32.mrb[11].mxu0  ;;  %v812_v48 = vmul.f32 0.044715, %v3694_v35  ;;  %v798_v49 = vmul.f32 0.044715, %v618_v36  ;;  %v623_v51 = vpop.f32.mrb[11].mxu1  ;;  %v952_v56 = vmul.f32 %v872_v27, %v3674_v16  ;;  %v889_v58 = vmul.f32 %v809_v34, %v3677_v17 }
  0xff   : > { %5033 = vst [vmem:[#allocation14_spill] sm:$0xff] %v3712_v55  ;;  %v813_v61 = vmul.f32 0.044715, %v3701_v43  ;;  %v3718_v63 = vadd.f32 %v508_v38, %v3598_v12  ;;  %v3721_v0 = vmul.f32 %v885_v39, %v3644_v59  ;;  %v3724_v3 = vmul.f32 %v949_v40, %v3649_v1 }
 0x100   : > { %v878_v60 = vmul.f32 %v798_v49, %v618_v36  ;;  %v953_v6 = vmul.f32 %v873_v42, %v3687_v30  ;;  %v622_v7 = vadd.f32 %v621_v45, %v3628_v44  ;;  %v3729_v11 = vmul.f32 %v888_v47, %v3652_v2 }
 0x101   : > { %5034 = vst [vmem:[#allocation15_spill] sm:$0xff] %v3724_v3  ;;  %v892_v14 = vmul.f32 %v812_v48, %v3694_v35  ;;  %v799_v15 = vmul.f32 0.044715, %v3706_v50  ;;  %v3734_v20 = vadd.f32 %v510_v46, %v3600_v13  ;;  %v3736_v24 = vmul.f32 0.5, %v618_v36 }
 0x102   : > { %v958_v25 = vmul.f32 %v878_v60, %v618_v36  ;;  %v816_v26 = vmul.f32 0.044715, %v3718_v63  ;;  %v802_v27 = vmul.f32 0.044715, %v622_v7  ;;  %v3739_v32 = vpop.eup %3074  ;;  %v3742_v34 = vmul.f32 %v952_v56, %v3674_v16 }
 0x103   : > { %v514_v22 = vpop.f32.mrb[12].mxu0  ;;  %5035 = vst [vmem:[#allocation16_spill] sm:$0xff] %v3736_v24  ;;  %v627_v31 = vpop.f32.mrb[12].mxu1  ;;  %v3745_v37 = vmul.f32 %v889_v58, %v3677_v17  ;;  %v893_v38 = vmul.f32 %v813_v61, %v3701_v43  ;;  %v3749_v39 = vadd.f32 %v623_v51, %v3646_v62  ;;  %v3752_v45 = vmul.f32 %v953_v6, %v3687_v30 }
 0x104   : > { %5036 = vst [vmem:[#allocation17_spill] sm:$0xff] %v3742_v34  ;;  %v516_v40 = vpop.f32.mrb[13].mxu0  ;;  %v629_v42 = vpop.f32.mrb[13].mxu1  ;;  %v882_v46 = vmul.f32 %v802_v27, %v622_v7  ;;  %v3755_v47 = vadd.f32 %v514_v22, %v3598_v12  ;;  %v3758_v48 = vadd.f32 %v627_v31, %v3628_v44  ;;  %v3761_v58 = vmul.f32 %v892_v14, %v3694_v35 }
 0x105   : > { %5037 = vst [vmem:[#allocation18_spill] sm:$0xff] %v3752_v45  ;;  %v518_v49 = vpop.f32.mrb[14].mxu0  ;;  %v631_v56 = vpop.f32.mrb[14].mxu1  ;;  %v879_v51 = vmul.f32 %v799_v15, %v3706_v50  ;;  %v817_v60 = vmul.f32 0.044715, %v3734_v20  ;;  %v3766_v61 = vadd.f32 %v516_v40, %v3600_v13  ;;  %v1038_v34 = vadd.f32 %v958_v25, %v618_v36 }
 0x106   : > { %5038 = vst [vmem:[#allocation19_spill] sm:$0xff] %v3755_v47  ;;  %5039 = vst [vmem:[#allocation20_spill] sm:$0xff] %v3758_v48  ;;  %v520_v6 = vpop.f32.mrb[15].mxu0  ;;  %v633_v27 = vpop.f32.mrb[15].mxu1  ;;  %v896_v22 = vmul.f32 %v816_v26, %v3718_v63  ;;  %v962_v16 = vmul.f32 %v882_v46, %v622_v7  ;;  %v803_v31 = vmul.f32 0.044715, %v3749_v39  ;;  %v3771_v55 = vmul.f32 %v893_v38, %v3701_v43 }
 0x107   : > { %5040 = vst [vmem:[#allocation21_spill] sm:$0xff] %v3766_v61  ;;  %v820_v14 = vmul.f32 0.044715, %v3755_v47  ;;  %v806_v15 = vmul.f32 0.044715, %v3758_v48  ;;  %v3776_v54 = vadd.f32 %v629_v42, %v3646_v62  ;;  %v3778_v40 = vpop.eup %3076  ;;  %v3780_v45 = vmul.f32 0.5, %v622_v7 }
 0x108   : > { %v1042_v36 = vadd.f32 %v962_v16, %v622_v7  ;;  %v821_v25 = vmul.f32 0.044715, %v3766_v61  ;;  %v3784_v26 = vadd.f32 %v518_v49, %v3598_v12  ;;  %v3787_v38 = vmul.f32 %v879_v51, %v3706_v50 }
 0x109   : > { %5041 = vst [vmem:[#allocation22_spill] sm:$0xff] %v3776_v54  ;;  %5042 = vst [vmem:[#allocation23_spill] sm:$0xff] %v3780_v45  ;;  %v897_v46 = vmul.f32 %v817_v60, %v3734_v20  ;;  %v807_v30 = vmul.f32 0.044715, %v3776_v54  ;;  %v3792_v42 = vadd.f32 %v631_v56, %v3628_v44  ;;  %v1118_v1 = vmul.f32 0.7978846, %v1038_v34 }
 0x10a   : > { %5043 = vst [vmem:[#allocation24_spill] sm:$0xff] %v3784_v26  ;;  %v3795_v10 = vmul.f32 %v896_v22, %v3718_v63  ;;  %v883_v16 = vmul.f32 %v803_v31, %v3749_v39  ;;  %v824_v7 = vmul.f32 0.044715, %v3784_v26  ;;  %v900_v51 = vmul.f32 %v820_v14, %v3755_v47 }
 0x10b   : > { %5044 = vst [vmem:[#allocation25_spill] sm:$0xff] %v3792_v42  ;;  %v524_v3 = vpop.f32.mrb[16].mxu0  ;;  %v637_v49 = vpop.f32.mrb[16].mxu1  ;;  %v886_v60 = vmul.f32 %v806_v15, %v3758_v48  ;;  %v810_v4 = vmul.f32 0.044715, %v3792_v42  ;;  %v3803_v56 = vadd.f32 %v520_v6, %v3600_v13  ;;  %v901_v22 = vmul.f32 %v821_v25, %v3766_v61 }
 0x10c   : > { %5045 = vst [vmem:[#allocation26_spill] sm:$0xff] %v3795_v10  ;;  %v526_v28 = vpop.f32.mrb[17].mxu0  ;;  %v639_v18 = vpop.f32.mrb[17].mxu1  ;;  %v1122_v33 = vmul.f32 0.7978846, %v1042_v36  ;;  %v3807_v31 = vadd.f32 %v633_v27, %v3646_v62  ;;  %v3810_v41 = vadd.f32 %v524_v3, %v3598_v12  ;;  %v887_v15 = vmul.f32 %v807_v30, %v3776_v54 }
 0x10d   : > { %5046 = vst [vmem:[#allocation27_spill] sm:$0xff] %v3803_v56  ;;  %v528_v34 = vpop.f32.mrb[18].mxu0  ;;  %v641_v9 = vpop.f32.mrb[18].mxu1  ;;  %v904_v23 = vmul.f32 %v824_v7, %v3784_v26  ;;  %v890_v6 = vmul.f32 %v810_v4, %v3792_v42  ;;  %v3816_v45 = vadd.f32 %v637_v49, %v3628_v44  ;;  %v3819_v25 = vmul.f32 %v897_v46, %v3734_v20 }
 0x10e   : > { %5047 = vst [vmem:[#allocation28_spill] sm:$0xff] %v3807_v31  ;;  %5048 = vst [vmem:[#allocation29_spill] sm:$0xff] %v3810_v41  ;;  %v530_v14 = vpop.f32.mrb[19].mxu0  ;;  %v643_v36 = vpop.f32.mrb[19].mxu1  ;;  %v825_v27 = vmul.f32 0.044715, %v3803_v56  ;;  %v3824_v24 = vadd.f32 %v526_v28, %v3600_v13  ;;  %3078 = vtanh.f32 %v1118_v1  ;;  %v3827_v30 = vmul.f32 %v883_v16, %v3749_v39 }
 0x10f   : > { %5049 = vst [vmem:[#allocation30_spill] sm:$0xff] %v3816_v45  ;;  %v811_v3 = vmul.f32 0.044715, %v3807_v31  ;;  %v828_v4 = vmul.f32 0.044715, %v3810_v41  ;;  %v3831_v7 = vadd.f32 %v639_v18, %v3646_v62  ;;  %3080 = vtanh.f32 %v1122_v33 }
 0x110   : > { %5050 = vst [vmem:[#allocation31_spill] sm:$0xff] %v3824_v24  ;;  %v3834_v46 = vmul.f32 %v900_v51, %v3755_v47  ;;  %v3837_v49 = vmul.f32 %v886_v60, %v3758_v48  ;;  %v3840_v10 = vmul.f32 %v901_v22, %v3766_v61  ;;  %v3843_v28 = vmul.f32 %v887_v15, %v3776_v54 }
 0x111   : > { %5051 = vst [vmem:[#allocation32_spill] sm:$0xff] %v3831_v7  ;;  %v3846_v1 = vmul.f32 %v904_v23, %v3784_v26  ;;  %v3849_v16 = vmul.f32 %v890_v6, %v3792_v42  ;;  %v814_v18 = vmul.f32 0.044715, %v3816_v45  ;;  %v905_v51 = vmul.f32 %v825_v27, %v3803_v56 }
 0x112   : > { %5052 = vst [vmem:[#allocation33_spill] sm:$0xff] %v3834_v46  ;;  %5053 = vst [vmem:[#allocation34_spill] sm:$0xff] %v3837_v49  ;;  %v891_v60 = vmul.f32 %v811_v3, %v3807_v31  ;;  %v829_v49 = vmul.f32 0.044715, %v3824_v24  ;;  %v1037_v22 = vadd.f32 %v3662_v8, %v3607_v19  ;;  %v908_v23 = vmul.f32 %v828_v4, %v3810_v41 }
 0x113   : > { %5054 = vst [vmem:[#allocation35_spill] sm:$0xff] %v3840_v10  ;;  %5055 = vst [vmem:[#allocation36_spill] sm:$0xff] %v3843_v28  ;;  %v534_v33 = vpop.f32.mrb[20].mxu0  ;;  %v647_v15 = vpop.f32.mrb[20].mxu1  ;;  %v1041_v6 = vadd.f32 %v3680_v21, %v3618_v29  ;;  %v3865_v3 = vmul.f32 0.5, %v3607_v19  ;;  %v3868_v8 = vadd.f32 %v641_v9, %v3628_v44  ;;  %v1276_v46 = vadd.f32 1.0, %v3739_v32 }
 0x114   : > { %5056 = vst [vmem:[#allocation37_spill] sm:$0xff] %v3846_v1  ;;  %5057 = vst [vmem:[#allocation38_spill] sm:$0xff] %v3849_v16  ;;  %v536_v48 = vpop.f32.mrb[21].mxu0  ;;  %v815_v1 = vmul.f32 0.044715, %v3831_v7  ;;  %v3862_v16 = vadd.f32 %v528_v34, %v3598_v12  ;;  %v649_v27 = vpop.f32.mrb[21].mxu1  ;;  %v894_v28 = vmul.f32 %v814_v18, %v3816_v45  ;;  %v909_v19 = vmul.f32 %v829_v49, %v3824_v24 }
 0x115   : > { %v538_v42 = vpop.f32.mrb[22].mxu0  ;;  %v1117_v26 = vmul.f32 0.7978846, %v1037_v22  ;;  %5059 = vst [vmem:[#allocation40_spill] sm:$0xff] %v3868_v8  ;;  %v651_v4 = vpop.f32.mrb[22].mxu1  ;;  %v1280_v54 = vadd.f32 1.0, %v3778_v40  ;;  %v3881_v22 = vadd.f32 %v530_v14, %v3600_v13  ;;  %v3884_v32 = vmul.f32 %v1276_v46, %v3640_v57 }
 0x116   : > { %5058 = vst [vmem:[#allocation39_spill] sm:$0xff] %v3862_v16  ;;  %v3871_v47 = vpop.f32.mrb[23].mxu0  ;;  %v1121_v21 = vmul.f32 0.7978846, %v1041_v6  ;;  %v832_v34 = vmul.f32 0.044715, %v3862_v16  ;;  %v3890_v6 = vadd.f32 %v643_v36, %v3646_v62  ;;  %v895_v40 = vmul.f32 %v815_v1, %v3831_v7 }
 0x117   : > { %v3876_v10 = vpop.f32.mrb[23].mxu1  ;;  %3082 = vtanh.f32 %v1117_v26  ;;  %v818_v9 = vmul.f32 0.044715, %v3868_v8  ;;  %5060 = vst [vmem:[#allocation41_spill] sm:$0xff] %v3881_v22  ;;  %v3887_v18 = vmul.f32 %v1280_v54, %v3657_v5  ;;  %v833_v49 = vmul.f32 0.044715, %v3881_v22 }
 0x118   : > { %3084 = vtanh.f32 %v1121_v21  ;;  %v3895_v26 = vadd.f32 %v534_v33, %v3598_v12  ;;  %v3898_v14 = vadd.f32 %v647_v15, %v3628_v44  ;;  %v3900_v21 = vpop.eup %3078  ;;  %v912_v57 = vmul.f32 %v832_v34, %v3862_v16 }
 0x119   : > { %5062 = vst [vmem:[#allocation43_spill] sm:$0xff] %v3900_v21  ;;  %v898_v54 = vmul.f32 %v818_v9, %v3868_v8  ;;  %v819_v36 = vmul.f32 0.044715, %v3890_v6  ;;  %v3909_v1 = vpop.eup %3080  ;;  %v3912_v33 = vmul.f32 %v905_v51, %v3803_v56  ;;  %v3915_v15 = vmul.f32 %v891_v60, %v3807_v31 }
 0x11a   : > { %5061 = vst [vmem:[#allocation42_spill] sm:$0xff] %v3898_v14  ;;  %5063 = vst [vmem:[#allocation44_spill] sm:$0xff] %v3909_v1  ;;  %v721_v61 = vmul.f32 0.5, %v3618_v29  ;;  %v3919_v34 = vadd.f32 %v536_v48, %v3600_v13  ;;  %v3926_v21 = vmul.f32 %v908_v23, %v3810_v41  ;;  %v3929_v1 = vmul.f32 %v894_v28, %v3816_v45 }
 0x11b   : > { %v3907_v46 = vpop.f32.mrb[24].mxu0  ;;  %5064 = vst [vmem:[#allocation45_spill] sm:$0xff] %v3912_v33  ;;  %5065 = vst [vmem:[#allocation46_spill] sm:$0xff] %v3915_v15  ;;  %v3921_v9 = vpop.f32.mrb[24].mxu1  ;;  %v913_v51 = vmul.f32 %v833_v49, %v3881_v22  ;;  %v3933_v60 = vadd.f32 %v649_v27, %v3646_v62  ;;  %v3940_v48 = vmul.f32 %v909_v19, %v3824_v24  ;;  %v836_v23 = vmul.f32 0.044715, %v3895_v26 }
 0x11c   : > { %v3923_v5 = vpop.f32.mrb[25].mxu0  ;;  %5066 = vst [vmem:[#allocation47_spill] sm:$0xff] %v3926_v21  ;;  %5067 = vst [vmem:[#allocation48_spill] sm:$0xff] %v3929_v1  ;;  %v3935_v15 = vpop.f32.mrb[25].mxu1  ;;  %v3943_v31 = vmul.f32 %v895_v40, %v3831_v7  ;;  %v822_v28 = vmul.f32 0.044715, %v3898_v14  ;;  %v3952_v27 = vmul.f32 %v912_v57, %v3862_v16  ;;  %v3955_v45 = vmul.f32 %v898_v54, %v3868_v8 }
 0x11d   : > { %v3937_v29 = vpop.f32.mrb[26].mxu0  ;;  %5068 = vst [vmem:[#allocation49_spill] sm:$0xff] %v3940_v48  ;;  %v3947_v1 = vpop.f32.mrb[26].mxu1  ;;  %v899_v19 = vmul.f32 %v819_v36, %v3890_v6  ;;  %v1045_v40 = vadd.f32 %v3721_v0, %v3644_v59  ;;  %v837_v41 = vmul.f32 0.044715, %v3919_v34  ;;  %v1049_v7 = vadd.f32 %v3745_v37, %v3677_v17 }
 0x11e   : > { %5069 = vst [vmem:[#allocation50_spill] sm:$0xff] %v3943_v31  ;;  %v3949_v49 = vpop.f32.mrb[27].mxu0  ;;  %5070 = vst [vmem:[#allocation51_spill] sm:$0xff] %v3952_v27  ;;  %v3960_v21 = vpop.f32.mrb[27].mxu1  ;;  %v3964_v31 = vmul.f32 0.5, %v3644_v59  ;;  %v3969_v57 = vadd.f32 %v538_v42, %v3598_v12  ;;  %v3972_v54 = vmul.f32 %v913_v51, %v3881_v22  ;;  %v3976_v0 = vadd.f32 %v651_v4, %v3628_v44 }
 0x11f   : > { %5071 = vst [vmem:[#allocation52_spill] sm:$0xff] %v3955_v45  ;;  %v823_v36 = vmul.f32 0.044715, %v3933_v60  ;;  %v1125_v45 = vmul.f32 0.7978846, %v1045_v40  ;;  %v916_v27 = vmul.f32 %v836_v23, %v3895_v26  ;;  %v902_v59 = vmul.f32 %v822_v28, %v3898_v14 }
 0x120   : > { %5072 = vst [vmem:[#allocation53_spill] sm:$0xff] %v3972_v54  ;;  %5073 = vst [vmem:[#allocation54_spill] sm:$0xff] %v3976_v0  ;;  %v1129_v16 = vmul.f32 0.7978846, %v1049_v7  ;;  %v840_v37 = vmul.f32 0.044715, %v3969_v57  ;;  %v917_v54 = vmul.f32 %v837_v41, %v3919_v34  ;;  %v1044_v23 = vadd.f32 %v3709_v52, %v3635_v53 }
 0x121   : > { %v3083_v8 = vpop.eup %3082  ;;  %v3982_v24 = vmul.f32 0.5, %v3677_v17  ;;  %3086 = vtanh.f32 %v1125_v45  ;;  %v826_v51 = vmul.f32 0.044715, %v3976_v0  ;;  %v1048_v45 = vadd.f32 %v3729_v11, %v3652_v2 }
 0x122   : > { %v3085_v48 = vpop.eup %3084  ;;  %v1277_v42 = vadd.f32 1.0, %v3083_v8  ;;  %3088 = vtanh.f32 %v1129_v16  ;;  %v903_v8 = vmul.f32 %v823_v36, %v3933_v60  ;;  %v920_v17 = vmul.f32 %v840_v37, %v3969_v57 }
 0x123   : > { %v3985_v40 = vpop.f32.mrb[28].mxu0  ;;  %v1281_v4 = vadd.f32 1.0, %v3085_v48  ;;  %v3990_v7 = vpop.f32.mrb[28].mxu1  ;;  %v4000_v48 = vadd.f32 %v3871_v47, %v3600_v13  ;;  %v1124_v33 = vmul.f32 0.7978846, %v1044_v23  ;;  %v4009_v36 = vadd.f32 %v3876_v10, %v3646_v62 }
 0x124   : > { %v3992_v28 = vpop.f32.mrb[29].mxu0  ;;  %v4002_v41 = vpop.f32.mrb[29].mxu1  ;;  %v1357_v52 = vmul.f32 %v1277_v42, %v3865_v3  ;;  %v906_v11 = vmul.f32 %v826_v51, %v3976_v0  ;;  %v1128_v47 = vmul.f32 0.7978846, %v1048_v45  ;;  %v4026_v42 = vadd.f32 %v3921_v9, %v3628_v44 }
 0x125   : > { %5074 = vst [vmem:[#allocation55_spill] sm:$0xff] %v3992_v28  ;;  %v4004_v16 = vpop.f32.mrb[30].mxu0  ;;  %v1361_v22 = vmul.f32 %v1281_v4, %v721_v61  ;;  %v4011_v37 = vpop.f32.mrb[30].mxu1  ;;  %v841_v28 = vmul.f32 0.044715, %v4000_v48  ;;  %3090 = vtanh.f32 %v1124_v33  ;;  %v4029_v4 = vmul.f32 %v899_v19, %v3890_v6 }
 0x126   : > { %5075 = vst [vmem:[#allocation56_spill] sm:$0xff] %v4004_v16  ;;  %v4013_v56 = vpop.f32.mrb[31].mxu0  ;;  %v4019_v16 = vadd.f32 %v3907_v46, %v3598_v12  ;;  %v4021_v3 = vpop.f32.mrb[31].mxu1  ;;  %v827_v10 = vmul.f32 0.044715, %v4009_v36  ;;  %5077 = vst [vmem:[#allocation58_spill] sm:$0xff] %v4026_v42  ;;  %v4032_v51 = vmul.f32 %v916_v27, %v3895_v26  ;;  %3092 = vtanh.f32 %v1128_v47 }
 0x127   : > { %v1437_v61 = vpack.c.bf16 %v1361_v22, %v1357_v52  ;;  %v921_v46 = vmul.f32 %v841_v28, %v4000_v48  ;;  %v4036_v23 = vmul.f32 %v902_v59, %v3898_v14  ;;  %v4039_v22 = vmul.f32 %v917_v54, %v3919_v34 }
 0x128   : > { %5076 = vst [vmem:[#allocation57_spill] sm:$0xff] %v4019_v16  ;;  %v844_v33 = vmul.f32 0.044715, %v4019_v16  ;;  %v4044_v9 = vadd.f32 %v3923_v5, %v3600_v13  ;;  %v5080_v27 = vpack.c.bf16 %v3887_v18, %v3884_v32  ;;  %v4050_v19 = vmul.f32 %v903_v8, %v3933_v60 }
 0x129   : > { %1771 = vmatprep.mubr.bf16.mxu0 %v1437_v61  ;;  %5078 = vst [vmem:[#allocation59_spill] sm:$0xff] %v4036_v23  ;;  %v724_v28 = vmul.f32 0.5, %v3635_v53  ;;  %v728_v59 = vmul.f32 0.5, %v3652_v2  ;;  %v907_v54 = vmul.f32 %v827_v10, %v4009_v36  ;;  %v4056_v45 = vmul.f32 %v920_v17, %v3969_v57 }
 0x12a   : > { %5079 = vst [vmem:[#allocation60_spill] sm:$0xff] %v4044_v9  ;;  %1772 = vmatmul.mubr.bf16.vlgmr.msra.gmra.mrb[32].mxu0 %v5080_v27  ;;  %v4059_v52 = vmul.f32 %v906_v11, %v3976_v0  ;;  %v830_v5 = vmul.f32 0.044715, %v4026_v42  ;;  %v1053_v32 = vadd.f32 %v3771_v55, %v3701_v43  ;;  %v4067_v53 = vmul.f32 %v921_v46, %v4000_v48 }
 0x12b   : > { %5081 = vst [vmem:[#allocation61_spill] sm:$0xff] %v4056_v45  ;;  %v4064_v18 = vpop.f32.mrb[32].mxu1  ;;  %v3087_v8 = vpop.eup %3086  ;;  %v4071_v2 = vadd.f32 %v3935_v15, %v3646_v62  ;;  %v4074_v17 = vmul.f32 0.5, %v3701_v43  ;;  %v1057_v11 = vadd.f32 %v3819_v25, %v3734_v20  ;;  %v924_v10 = vmul.f32 %v844_v33, %v4019_v16  ;;  %v5114_v45 = vld [vmem:[#allocation46_spill] sm:$0xff] }
 0x12c   : > { %5082 = vst [vmem:[#allocation62_spill] sm:$0xff] %v4059_v52  ;;  %v4078_v47 = vpop.f32.mrb[33].mxu1  ;;  %v3089_v61 = vpop.eup %3088  ;;  %v1285_v55 = vadd.f32 1.0, %v3087_v8  ;;  %v845_v27 = vmul.f32 0.044715, %v4044_v9  ;;  %v4085_v15 = vmul.f32 %v907_v54, %v4009_v36  ;;  %v4088_v43 = vmul.f32 0.5, %v3734_v20 }
 0x12d   : > { %5083 = vst [vmem:[#allocation63_spill] sm:$0xff] %v4071_v2  ;;  %v1133_v46 = vmul.f32 0.7978846, %v1053_v32  ;;  %v4082_v52 = vpop.f32.mrb[34].mxu1  ;;  %v1289_v0 = vadd.f32 1.0, %v3089_v61  ;;  %v910_v8 = vmul.f32 %v830_v5, %v4026_v42  ;;  %v1039_v33 = vadd.f32 %v3787_v38, %v3706_v50 }
 0x12e   : > { %v1137_v23 = vmul.f32 0.7978846, %v1057_v11  ;;  %v4090_v25 = vpop.f32.mrb[35].mxu1  ;;  %v1365_v14 = vmul.f32 %v1285_v55, %v3964_v31  ;;  %v1043_v54 = vadd.f32 %v3827_v30, %v3749_v39  ;;  %v4101_v20 = vadd.f32 %v3937_v29, %v3598_v12 }
 0x12f   : > { %3094 = vtanh.f32 %v1133_v46  ;;  %v1369_v32 = vmul.f32 %v1289_v0, %v3982_v24  ;;  %v3091_v11 = vpop.eup %3090  ;;  %v4104_v61 = vmul.f32 %v924_v10, %v4019_v16  ;;  %v925_v31 = vmul.f32 %v845_v27, %v4044_v9 }
 0x130   : > { %3096 = vtanh.f32 %v1137_v23  ;;  %5084 = vst [vmem:[#allocation64_spill] sm:$0xff] %v4101_v20  ;;  %v831_v5 = vmul.f32 0.044715, %v4071_v2  ;;  %v1119_v55 = vmul.f32 0.7978846, %v1039_v33  ;;  %v3093_v38 = vpop.eup %3092  ;;  %v1284_v24 = vadd.f32 1.0, %v3091_v11 }
 0x131   : > { %5085 = vst [vmem:[#allocation65_spill] sm:$0xff] %v4104_v61  ;;  %v1441_v46 = vpack.c.bf16 %v1369_v32, %v1365_v14  ;;  %v1123_v0 = vmul.f32 0.7978846, %v1043_v54  ;;  %v4110_v30 = vadd.f32 %v3947_v1, %v3628_v44  ;;  %v1288_v23 = vadd.f32 1.0, %v3093_v38  ;;  %v5088_v1 = vld [vmem:[#allocation26_spill] sm:$0xff]  ;;  %v5089_v38 = vld [vmem:[#allocation43_spill] sm:$0xff] }
 0x132   : > { %v4113_v29 = vmul.f32 0.5, %v3706_v50  ;;  %3098 = vtanh.f32 %v1119_v55  ;;  %v1052_v10 = vadd.f32 %v3761_v58, %v3694_v35  ;;  %v4120_v33 = vmul.f32 %v910_v8, %v4026_v42  ;;  %v5090_v8 = vld [vmem:[#allocation44_spill] sm:$0xff] }
 0x133   : > { %5086 = vst [vmem:[#allocation66_spill] sm:$0xff] %v4110_v30  ;;  %v4117_v27 = vpop.f32.mrb[36].mxu1  ;;  %1779 = vmatprep.mubr.bf16.mxu0 %v1441_v46  ;;  %3100 = vtanh.f32 %v1123_v0  ;;  %v848_v14 = vmul.f32 0.044715, %v4101_v20  ;;  %v1056_v32 = vadd.f32 %v5088_v1, %v3718_v63  ;;  %v1364_v50 = vmul.f32 %v1284_v24, %v724_v28 }
 0x134   : > { %5087 = vst [vmem:[#allocation67_spill] sm:$0xff] %v4120_v33  ;;  %v4125_v54 = vpop.f32.mrb[37].mxu1  ;;  %v1368_v11 = vmul.f32 %v1288_v23, %v728_v59  ;;  %v1132_v55 = vmul.f32 0.7978846, %v1052_v10  ;;  %v1278_v61 = vadd.f32 1.0, %v5089_v38  ;;  %v1282_v33 = vadd.f32 1.0, %v5090_v8 }
 0x135   : > { %v4128_v58 = vpop.f32.mrb[38].mxu1  ;;  %v834_v46 = vmul.f32 0.044715, %v4110_v30  ;;  %v1136_v16 = vmul.f32 0.7978846, %v1056_v32  ;;  %v4134_v0 = vadd.f32 %v3949_v49, %v3600_v13  ;;  %v911_v28 = vmul.f32 %v831_v5, %v4071_v2  ;;  %v5093_v59 = vld [vmem:[#allocation16_spill] sm:$0xff] }
 0x136   : > { %v4136_v42 = vpop.f32.mrb[39].mxu1  ;;  %v1440_v1 = vpack.c.bf16 %v1368_v11, %v1364_v50  ;;  %3102 = vtanh.f32 %v1132_v55  ;;  %v4140_v24 = vmul.f32 %v1278_v61, %v5093_v59  ;;  %v5094_v23 = vld [vmem:[#allocation23_spill] sm:$0xff]  ;;  %v4148_v38 = vadd.f32 %v3960_v21, %v3646_v62 }
 0x137   : > { %5091 = vst [vmem:[#allocation26_spill] sm:$0xff] %v4134_v0  ;;  %5092 = vst [vmem:[#allocation43_spill] sm:$0xff] %v4136_v42  ;;  %3104 = vtanh.f32 %v1136_v16  ;;  %v4143_v10 = vmul.f32 %v1282_v33, %v5094_v23  ;;  %v849_v32 = vmul.f32 0.044715, %v4134_v0  ;;  %v4151_v50 = vmul.f32 %v925_v31, %v4044_v9  ;;  %v5098_v31 = vld [vmem:[#allocation55_spill] sm:$0xff] }
 0x138   : > { %1780 = vmatmul.mubr.bf16.gmra.mrb[36].mxu0 %v1440_v1  ;;  %v928_v5 = vmul.f32 %v848_v14, %v4101_v20  ;;  %v4156_v61 = vadd.f32 %v3985_v40, %v3598_v12  ;;  %v4160_v16 = vadd.f32 %v3990_v7, %v3628_v44  ;;  %v914_v21 = vmul.f32 %v834_v46, %v4110_v30 }
 0x139   : > { %v3095_v49 = vpop.eup %3094  ;;  %5095 = vst [vmem:[#allocation44_spill] sm:$0xff] %v4151_v50  ;;  %v1438_v55 = vpack.c.bf16 %v4143_v10, %v4140_v24  ;;  %v4167_v8 = vadd.f32 %v5098_v31, %v3600_v13  ;;  %v723_v1 = vmul.f32 0.5, %v3749_v39  ;;  %v929_v40 = vmul.f32 %v849_v32, %v4134_v0 }
 0x13a   : > { %5096 = vst [vmem:[#allocation16_spill] sm:$0xff] %v4156_v61  ;;  %5097 = vst [vmem:[#allocation23_spill] sm:$0xff] %v4160_v16  ;;  %v3097_v33 = vpop.eup %3096  ;;  %v1293_v11 = vadd.f32 1.0, %v3095_v49  ;;  %v835_v59 = vmul.f32 0.044715, %v4148_v38  ;;  %v4173_v7 = vmul.f32 %v911_v28, %v4071_v2  ;;  %v732_v23 = vmul.f32 0.5, %v3694_v35 }
 0x13b   : > { %v1297_v14 = vadd.f32 1.0, %v3097_v33  ;;  %v852_v46 = vmul.f32 0.044715, %v4156_v61  ;;  %v838_v24 = vmul.f32 0.044715, %v4160_v16  ;;  %v4178_v10 = vpop.f32.mrb[40].mxu1  ;;  %v4185_v31 = vadd.f32 %v4002_v41, %v3646_v62 }
 0x13c   : > { %5099 = vst [vmem:[#allocation55_spill] sm:$0xff] %v4173_v7  ;;  %5100 = vst [vmem:[#allocation68_spill] sm:$0xff] %v4178_v10  ;;  %v3099_v49 = vpop.eup %3098  ;;  %v1373_v33 = vmul.f32 %v1293_v11, %v4074_v17  ;;  %v736_v32 = vmul.f32 0.5, %v3718_v63  ;;  %v4187_v28 = vpop.f32.mrb[41].mxu1  ;;  %v4190_v2 = vmul.f32 %v928_v5, %v4101_v20  ;;  %v4193_v50 = vmul.f32 %v914_v21, %v4110_v30  ;;  %v5106_v41 = vld [vmem:[#allocation21_spill] sm:$0xff] }
 0x13d   : > { %v1377_v39 = vmul.f32 %v1297_v14, %v4088_v43  ;;  %5101 = vst [vmem:[#allocation69_spill] sm:$0xff] %v4187_v28  ;;  %v3101_v35 = vpop.eup %3100  ;;  %v1279_v7 = vadd.f32 1.0, %v3099_v49  ;;  %v853_v17 = vmul.f32 0.044715, %v4167_v8  ;;  %v4196_v11 = vpop.f32.mrb[42].mxu1  ;;  %v4199_v14 = vmul.f32 %v929_v40, %v4134_v0  ;;  %v5110_v20 = vld [vmem:[#allocation45_spill] sm:$0xff] }
 0x13e   : > { %5102 = vst [vmem:[#allocation70_spill] sm:$0xff] %v4190_v2  ;;  %5103 = vst [vmem:[#allocation71_spill] sm:$0xff] %v4193_v50  ;;  %v1283_v63 = vadd.f32 1.0, %v3101_v35  ;;  %v4202_v9 = vmul.f32 0.5, %v5106_v41  ;;  %v4204_v28 = vpop.f32.mrb[43].mxu1  ;;  %v915_v5 = vmul.f32 %v835_v59, %v4148_v38  ;;  %v932_v49 = vmul.f32 %v852_v46, %v4156_v61  ;;  %v5108_v50 = vld [vmem:[#allocation35_spill] sm:$0xff] }
 0x13f   : > { %5104 = vst [vmem:[#allocation72_spill] sm:$0xff] %v4196_v11  ;;  %v1445_v43 = vpack.c.bf16 %v1377_v39, %v1373_v33  ;;  %5105 = vst [vmem:[#allocation73_spill] sm:$0xff] %v4199_v14  ;;  %v918_v21 = vmul.f32 %v838_v24, %v4160_v16  ;;  %v1061_v30 = vadd.f32 %v5108_v50, %v5106_v41  ;;  %v839_v39 = vmul.f32 0.044715, %v4185_v31  ;;  %v5109_v35 = vld [vmem:[#allocation27_spill] sm:$0xff]  ;;  %v5111_v0 = vld [vmem:[#allocation22_spill] sm:$0xff] }
 0x140   : > { %5107 = vst [vmem:[#allocation21_spill] sm:$0xff] %v4204_v28  ;;  %v3103_v2 = vpop.eup %3102  ;;  %v1359_v33 = vmul.f32 %v1279_v7, %v4113_v29  ;;  %v1363_v40 = vmul.f32 %v1283_v63, %v723_v1  ;;  %v1065_v11 = vadd.f32 %v5110_v20, %v5109_v35  ;;  %v933_v59 = vmul.f32 %v853_v17, %v4167_v8  ;;  %v5112_v24 = vld [vmem:[#allocation36_spill] sm:$0xff] }
 0x141   : > { %1787 = vmatprep.mubr.bf16.mxu0 %v1445_v43  ;;  %v3105_v28 = vpop.eup %3104  ;;  %v1292_v14 = vadd.f32 1.0, %v3103_v2  ;;  %v1141_v46 = vmul.f32 0.7978846, %v1061_v30  ;;  %v1047_v10 = vadd.f32 %v5112_v24, %v5111_v0  ;;  %v5113_v43 = vld [vmem:[#allocation28_spill] sm:$0xff]  ;;  %v5125_v24 = vld [vmem:[#allocation37_spill] sm:$0xff] }
 0x142   : > { %v1439_v42 = vpack.c.bf16 %v1363_v40, %v1359_v33  ;;  %v1296_v50 = vadd.f32 1.0, %v3105_v28  ;;  %v1145_v41 = vmul.f32 0.7978846, %v1065_v11  ;;  %v1051_v29 = vadd.f32 %v5114_v45, %v5113_v43  ;;  %v5115_v20 = vld [vmem:[#allocation56_spill] sm:$0xff] }
 0x143   : > { %v4220_v1 = vpop.f32.mrb[44].mxu1  ;;  %v1372_v7 = vmul.f32 %v1292_v14, %v732_v23  ;;  %3106 = vtanh.f32 %v1141_v46  ;;  %v1127_v63 = vmul.f32 0.7978846, %v1047_v10  ;;  %v4224_v2 = vadd.f32 %v5115_v20, %v3598_v12  ;;  %v5122_v14 = vld [vmem:[#allocation33_spill] sm:$0xff]  ;;  %v5124_v46 = vld [vmem:[#allocation24_spill] sm:$0xff]  ;;  %v5129_v20 = vld [vmem:[#allocation38_spill] sm:$0xff] }
 0x144   : > { %v4226_v17 = vpop.f32.mrb[45].mxu1  ;;  %1884 = vmatprep.mubr.bf16.mxu1 %v1439_v42  ;;  %v1376_v30 = vmul.f32 %v1296_v50, %v736_v32  ;;  %3108 = vtanh.f32 %v1145_v41  ;;  %v1131_v33 = vmul.f32 0.7978846, %v1051_v29  ;;  %v4230_v28 = vadd.f32 %v4011_v37, %v3628_v44  ;;  %v5121_v37 = vld [vmem:[#allocation19_spill] sm:$0xff]  ;;  %v5127_v29 = vld [vmem:[#allocation34_spill] sm:$0xff] }
 0x145   : > { %5116 = vst [vmem:[#allocation35_spill] sm:$0xff] %v4224_v2  ;;  %v4232_v45 = vpop.f32.mrb[46].mxu1  ;;  %1885 = vmatmul.mubr.bf16.vlgmr.msra.gmra.mrb[48].mxu1 %v1438_v55  ;;  %v4235_v23 = vmul.f32 %v915_v5, %v4148_v38  ;;  %v4238_v10 = vmul.f32 %v932_v49, %v4156_v61  ;;  %v745_v12 = vmul.f32 0.5, %v5109_v35  ;;  %3110 = vtanh.f32 %v1127_v63  ;;  %v5128_v63 = vld [vmem:[#allocation25_spill] sm:$0xff] }
 0x146   : > { %5117 = vst [vmem:[#allocation27_spill] sm:$0xff] %v4230_v28  ;;  %5118 = vst [vmem:[#allocation45_spill] sm:$0xff] %v4232_v45  ;;  %v4241_v42 = vpop.f32.mrb[47].mxu1  ;;  %v1444_v32 = vpack.c.bf16 %v1376_v30, %v1372_v7  ;;  %v919_v11 = vmul.f32 %v839_v39, %v4185_v31  ;;  %3112 = vtanh.f32 %v1131_v33  ;;  %v1060_v40 = vadd.f32 %v5122_v14, %v5121_v37  ;;  %v5126_v39 = vld [vmem:[#allocation20_spill] sm:$0xff] }
 0x147   : > { %5119 = vst [vmem:[#allocation22_spill] sm:$0xff] %v4238_v10  ;;  %5120 = vst [vmem:[#allocation36_spill] sm:$0xff] %v4241_v42  ;;  %v4247_v55 = vmul.f32 %v918_v21, %v4160_v16  ;;  %v856_v5 = vmul.f32 0.044715, %v4224_v2  ;;  %v842_v49 = vmul.f32 0.044715, %v4230_v28  ;;  %v1064_v35 = vadd.f32 %v5125_v24, %v5124_v46 }
 0x148   : > { %1788 = vmatmul.mubr.bf16.gmra.mrb[40].mxu0 %v1444_v32  ;;  %v4254_v50 = vmul.f32 %v933_v59, %v4167_v8  ;;  %v1140_v41 = vmul.f32 0.7978846, %v1060_v40  ;;  %v1046_v7 = vadd.f32 %v5127_v29, %v5126_v39  ;;  %v1050_v30 = vadd.f32 %v5129_v20, %v5128_v63 }
 0x149   : > { %5123 = vst [vmem:[#allocation28_spill] sm:$0xff] %v4247_v55  ;;  %v727_v21 = vmul.f32 0.5, %v5111_v0  ;;  %v731_v33 = vmul.f32 0.5, %v5113_v43  ;;  %v1144_v14 = vmul.f32 0.7978846, %v1064_v35  ;;  %v4264_v42 = vadd.f32 %v4013_v56, %v3600_v13 }
 0x14a   : > { %v4267_v32 = vmul.f32 %v919_v11, %v4185_v31  ;;  %3114 = vtanh.f32 %v1140_v41  ;;  %v1126_v59 = vmul.f32 0.7978846, %v1046_v7  ;;  %v1130_v40 = vmul.f32 0.7978846, %v1050_v30  ;;  %v5132_v7 = vld [vmem:[#allocation49_spill] sm:$0xff] }
 0x14b   : > { %v936_v24 = vmul.f32 %v856_v5, %v4224_v2  ;;  %v922_v29 = vmul.f32 %v842_v49, %v4230_v28  ;;  %3116 = vtanh.f32 %v1144_v14  ;;  %v4273_v0 = vadd.f32 %v4021_v3, %v3646_v62  ;;  %v5133_v30 = vld [vmem:[#allocation41_spill] sm:$0xff] }
 0x14c   : > { %5130 = vst [vmem:[#allocation46_spill] sm:$0xff] %v4267_v32  ;;  %v740_v43 = vmul.f32 0.5, %v5121_v37  ;;  %v744_v13 = vmul.f32 0.5, %v5124_v46  ;;  %3118 = vtanh.f32 %v1126_v59  ;;  %v4279_v56 = vadd.f32 %v4064_v18, %v3628_v44  ;;  %v5131_v46 = vld [vmem:[#allocation31_spill] sm:$0xff]  ;;  %v5134_v18 = vld [vmem:[#allocation53_spill] sm:$0xff] }
 0x14d   : > { %v3107_v11 = vpop.eup %3106  ;;  %v726_v35 = vmul.f32 0.5, %v5126_v39  ;;  %v730_v5 = vmul.f32 0.5, %v5128_v63  ;;  %3120 = vtanh.f32 %v1130_v40  ;;  %v857_v49 = vmul.f32 0.044715, %v4264_v42 }
 0x14e   : > { %v3109_v41 = vpop.eup %3108  ;;  %v1301_v3 = vadd.f32 1.0, %v3107_v11  ;;  %v4286_v37 = vadd.f32 %v4078_v47, %v3646_v62  ;;  %v1069_v20 = vadd.f32 %v5132_v7, %v5131_v46  ;;  %v1073_v14 = vadd.f32 %v5134_v18, %v5133_v30 }
 0x14f   : > { %v3111_v59 = vpop.eup %3110  ;;  %v1305_v55 = vadd.f32 1.0, %v3109_v41  ;;  %v4293_v39 = vmul.f32 %v936_v24, %v4224_v2  ;;  %v4296_v63 = vmul.f32 %v922_v29, %v4230_v28  ;;  %v843_v40 = vmul.f32 0.044715, %v4273_v0 }
 0x150   : > { %v3113_v11 = vpop.eup %3112  ;;  %v1287_v16 = vadd.f32 1.0, %v3111_v59  ;;  %v846_v47 = vmul.f32 0.044715, %v4279_v56  ;;  %v4301_v10 = vmul.f32 0.5, %v5131_v46  ;;  %v1149_v7 = vmul.f32 0.7978846, %v1069_v20 }
 0x151   : > { %5135 = vst [vmem:[#allocation56_spill] sm:$0xff] %v4293_v39  ;;  %5136 = vst [vmem:[#allocation19_spill] sm:$0xff] %v4296_v63  ;;  %v1381_v18 = vmul.f32 %v1301_v3, %v4202_v9  ;;  %v1385_v61 = vmul.f32 %v1305_v55, %v745_v12  ;;  %v1291_v41 = vadd.f32 1.0, %v3113_v11  ;;  %v1153_v45 = vmul.f32 0.7978846, %v1073_v14  ;;  %v5137_v12 = vld [vmem:[#allocation32_spill] sm:$0xff] }
 0x152   : > { %v937_v24 = vmul.f32 %v857_v49, %v4264_v42  ;;  %v847_v29 = vmul.f32 0.044715, %v4286_v37  ;;  %v4307_v63 = vmul.f32 0.5, %v5133_v30  ;;  %3122 = vtanh.f32 %v1149_v7  ;;  %v5138_v55 = vld [vmem:[#allocation50_spill] sm:$0xff] }
 0x153   : > { %v1449_v59 = vpack.c.bf16 %v1385_v61, %v1381_v18  ;;  %v1367_v28 = vmul.f32 %v1287_v16, %v727_v21  ;;  %v1371_v39 = vmul.f32 %v1291_v41, %v731_v33  ;;  %3124 = vtanh.f32 %v1153_v45  ;;  %v5139_v16 = vld [vmem:[#allocation29_spill] sm:$0xff]  ;;  %v5140_v45 = vld [vmem:[#allocation47_spill] sm:$0xff] }
 0x154   : > { %v3115_v46 = vpop.eup %3114  ;;  %v923_v20 = vmul.f32 %v843_v40, %v4273_v0  ;;  %v926_v9 = vmul.f32 %v846_v47, %v4279_v56  ;;  %v1055_v3 = vadd.f32 %v5138_v55, %v5137_v12  ;;  %v1059_v49 = vadd.f32 %v4029_v4, %v3890_v6  ;;  %v5141_v18 = vld [vmem:[#allocation39_spill] sm:$0xff] }
 0x155   : > { %v3117_v14 = vpop.eup %3116  ;;  %1795 = vmatprep.mubr.bf16.mxu0 %v1449_v59  ;;  %v1443_v30 = vpack.c.bf16 %v1371_v39, %v1367_v28  ;;  %v1300_v11 = vadd.f32 1.0, %v3115_v46  ;;  %v4317_v61 = vadd.f32 %v4082_v52, %v3628_v44  ;;  %v1068_v21 = vadd.f32 %v5140_v45, %v5139_v16  ;;  %v5142_v41 = vld [vmem:[#allocation51_spill] sm:$0xff] }
 0x156   : > { %v3119_v33 = vpop.eup %3118  ;;  %v1304_v40 = vadd.f32 1.0, %v3117_v14  ;;  %v1135_v47 = vmul.f32 0.7978846, %v1055_v3  ;;  %v1139_v7 = vmul.f32 0.7978846, %v1059_v49  ;;  %v1072_v55 = vadd.f32 %v5142_v41, %v5141_v18 }
 0x157   : > { %v3121_v2 = vpop.eup %3120  ;;  %1892 = vmatprep.mubr.bf16.mxu1 %v1443_v30  ;;  %v1380_v4 = vmul.f32 %v1300_v11, %v740_v43  ;;  %v1286_v59 = vadd.f32 1.0, %v3119_v33  ;;  %v927_v28 = vmul.f32 %v847_v29, %v4286_v37  ;;  %v1148_v39 = vmul.f32 0.7978846, %v1068_v21  ;;  %v5145_v21 = vld [vmem:[#allocation40_spill] sm:$0xff] }
 0x158   : > { %v1384_v46 = vmul.f32 %v1304_v40, %v744_v13  ;;  %v1290_v52 = vadd.f32 1.0, %v3121_v2  ;;  %3126 = vtanh.f32 %v1135_v47  ;;  %v1152_v32 = vmul.f32 0.7978846, %v1072_v55  ;;  %v5143_v2 = vld [vmem:[#allocation30_spill] sm:$0xff]  ;;  %v5144_v13 = vld [vmem:[#allocation48_spill] sm:$0xff] }
 0x159   : > { %v4325_v45 = vmul.f32 %v937_v24, %v4264_v42  ;;  %v4328_v3 = vmul.f32 %v923_v20, %v4273_v0  ;;  %3128 = vtanh.f32 %v1139_v7  ;;  %v850_v49 = vmul.f32 0.044715, %v4317_v61  ;;  %v5146_v24 = vld [vmem:[#allocation52_spill] sm:$0xff] }
 0x15a   : > { %v1448_v14 = vpack.c.bf16 %v1384_v46, %v1380_v4  ;;  %v1366_v30 = vmul.f32 %v1286_v59, %v726_v35  ;;  %v1370_v43 = vmul.f32 %v1290_v52, %v730_v5  ;;  %3130 = vtanh.f32 %v1148_v39 }
 0x15b   : > { %v4332_v29 = vmul.f32 %v926_v9, %v4279_v56  ;;  %3132 = vtanh.f32 %v1152_v32  ;;  %v1054_v11 = vadd.f32 %v5144_v13, %v5143_v2  ;;  %v1058_v33 = vadd.f32 %v5146_v24, %v5145_v21 }
 0x15c   : > { %v3123_v40 = vpop.eup %3122  ;;  %1796 = vmatmul.mubr.bf16.gmra.mrb[44].mxu0 %v1448_v14  ;;  %v1442_v20 = vpack.c.bf16 %v1370_v43, %v1366_v30  ;;  %v4339_v47 = vmul.f32 %v927_v28, %v4286_v37  ;;  %v735_v35 = vmul.f32 0.5, %v5137_v12  ;;  %v739_v5 = vmul.f32 0.5, %v3890_v6 }
 0x15d   : > { %v3125_v7 = vpop.eup %3124  ;;  %v1309_v9 = vadd.f32 1.0, %v3123_v40  ;;  %v930_v32 = vmul.f32 %v850_v49, %v4317_v61  ;;  %v1134_v41 = vmul.f32 0.7978846, %v1054_v11  ;;  %v1138_v55 = vmul.f32 0.7978846, %v1058_v33 }
 0x15e   : > { %1893 = vmatmul.mubr.bf16.gmra.mrb[52].mxu1 %v1442_v20  ;;  %v1313_v4 = vadd.f32 1.0, %v3125_v7  ;;  %v748_v59 = vmul.f32 0.5, %v5139_v16  ;;  %v4347_v39 = vadd.f32 %v4090_v25, %v3646_v62  ;;  %v4351_v28 = vadd.f32 %v4117_v27, %v3628_v44 }
 0x15f   : > { %v752_v6 = vmul.f32 0.5, %v5141_v18  ;;  %v4355_v12 = vmul.f32 0.5, %v5143_v2  ;;  %3134 = vtanh.f32 %v1134_v41  ;;  %v1077_v46 = vadd.f32 %v4039_v22, %v3919_v34 }
 0x160   : > { %v1389_v52 = vmul.f32 %v1309_v9, %v4301_v10  ;;  %v1393_v16 = vmul.f32 %v1313_v4, %v4307_v63  ;;  %3136 = vtanh.f32 %v1138_v55  ;;  %v4363_v25 = vadd.f32 %v4125_v54, %v3646_v62 }
 0x161   : > { %v4366_v27 = vmul.f32 %v930_v32, %v4317_v61  ;;  %v738_v18 = vmul.f32 0.5, %v5145_v21  ;;  %v1081_v49 = vadd.f32 %v4067_v53, %v4000_v48  ;;  %v1157_v14 = vmul.f32 0.7978846, %v1077_v46 }
 0x162   : > { %v3127_v30 = vpop.eup %3126  ;;  %v1453_v22 = vpack.c.bf16 %v1393_v16, %v1389_v52  ;;  %v851_v10 = vmul.f32 0.044715, %v4347_v39  ;;  %v854_v63 = vmul.f32 0.044715, %v4351_v28  ;;  %v4374_v43 = vmul.f32 0.5, %v3919_v34  ;;  %v5147_v16 = vld [vmem:[#allocation61_spill] sm:$0xff] }
 0x163   : > { %v3129_v54 = vpop.eup %3128  ;;  %v1295_v2 = vadd.f32 1.0, %v3127_v30  ;;  %v4377_v13 = vmul.f32 0.5, %v4000_v48  ;;  %v1161_v11 = vmul.f32 0.7978846, %v1081_v49  ;;  %3138 = vtanh.f32 %v1157_v14 }
 0x164   : > { %v3131_v21 = vpop.eup %3130  ;;  %1803 = vmatprep.mubr.bf16.mxu0 %v1453_v22  ;;  %v1299_v53 = vadd.f32 1.0, %v3129_v54  ;;  %v855_v24 = vmul.f32 0.044715, %v4363_v25  ;;  %v1063_v33 = vadd.f32 %v4050_v19, %v3933_v60  ;;  %v1067_v40 = vadd.f32 %v4085_v15, %v4009_v36 }
 0x165   : > { %v3133_v34 = vpop.eup %3132  ;;  %v1375_v20 = vmul.f32 %v1295_v2, %v735_v35  ;;  %v1308_v7 = vadd.f32 1.0, %v3131_v21  ;;  %3140 = vtanh.f32 %v1161_v11  ;;  %v4386_v48 = vadd.f32 %v4128_v58, %v3628_v44  ;;  %v5148_v2 = vld [vmem:[#allocation42_spill] sm:$0xff]  ;;  %v5149_v11 = vld [vmem:[#allocation59_spill] sm:$0xff] }
 0x166   : > { %v1379_v9 = vmul.f32 %v1299_v53, %v739_v5  ;;  %v1312_v32 = vadd.f32 1.0, %v3133_v34  ;;  %v1143_v41 = vmul.f32 0.7978846, %v1063_v33  ;;  %v1147_v55 = vmul.f32 0.7978846, %v1067_v40  ;;  %v5150_v33 = vld [vmem:[#allocation54_spill] sm:$0xff] }
 0x167   : > { %v1388_v4 = vmul.f32 %v1308_v7, %v748_v59  ;;  %v931_v46 = vmul.f32 %v851_v10, %v4347_v39  ;;  %v934_v19 = vmul.f32 %v854_v63, %v4351_v28  ;;  %v1076_v15 = vadd.f32 %v4032_v51, %v3895_v26  ;;  %v5151_v40 = vld [vmem:[#allocation62_spill] sm:$0xff] }
 0x168   : > { %v1447_v52 = vpack.c.bf16 %v1379_v9, %v1375_v20  ;;  %v1392_v35 = vmul.f32 %v1312_v32, %v752_v6  ;;  %3142 = vtanh.f32 %v1143_v41  ;;  %v1080_v49 = vadd.f32 %v5147_v16, %v3969_v57 }
 0x169   : > { %v3135_v58 = vpop.eup %3134  ;;  %v935_v5 = vmul.f32 %v855_v24, %v4363_v25  ;;  %3144 = vtanh.f32 %v1147_v55  ;;  %v858_v14 = vmul.f32 0.044715, %v4386_v48  ;;  %v1156_v59 = vmul.f32 0.7978846, %v1076_v15 }
 0x16a   : > { %v3137_v30 = vpop.eup %3136  ;;  %1900 = vmatprep.mubr.bf16.mxu1 %v1447_v52  ;;  %v1452_v22 = vpack.c.bf16 %v1392_v35, %v1388_v4  ;;  %v1294_v10 = vadd.f32 1.0, %v3135_v58  ;;  %v743_v63 = vmul.f32 0.5, %v3933_v60  ;;  %v1160_v51 = vmul.f32 0.7978846, %v1080_v49  ;;  %v5154_v49 = vld [vmem:[#allocation69_spill] sm:$0xff] }
 0x16b   : > { %v1298_v54 = vadd.f32 1.0, %v3137_v30  ;;  %v4398_v6 = vmul.f32 %v931_v46, %v4347_v39  ;;  %3146 = vtanh.f32 %v1156_v59  ;;  %v1062_v21 = vadd.f32 %v5149_v11, %v5148_v2  ;;  %v5152_v46 = vld [vmem:[#allocation43_spill] sm:$0xff]  ;;  %v5155_v59 = vld [vmem:[#allocation60_spill] sm:$0xff]  ;;  %v5157_v11 = vld [vmem:[#allocation26_spill] sm:$0xff] }
 0x16c   : > { %1804 = vmatmul.mubr.bf16.gmra.mrb[48].mxu0 %v1452_v22  ;;  %v4403_v53 = vmul.f32 %v934_v19, %v4351_v28  ;;  %v747_v24 = vmul.f32 0.5, %v4009_v36  ;;  %3148 = vtanh.f32 %v1160_v51  ;;  %v1066_v34 = vadd.f32 %v5151_v40, %v5150_v33  ;;  %v5156_v30 = vld [vmem:[#allocation44_spill] sm:$0xff] }
 0x16d   : > { %v3139_v60 = vpop.eup %3138  ;;  %v1374_v20 = vmul.f32 %v1294_v10, %v4355_v12  ;;  %v1378_v7 = vmul.f32 %v1298_v54, %v738_v18  ;;  %v938_v9 = vmul.f32 %v858_v14, %v4386_v48  ;;  %v1142_v32 = vmul.f32 0.7978846, %v1062_v21  ;;  %v5153_v12 = vld [vmem:[#allocation68_spill] sm:$0xff]  ;;  %v5158_v21 = vld [vmem:[#allocation73_spill] sm:$0xff] }
 0x16e   : > { %v4411_v41 = vmul.f32 %v935_v5, %v4363_v25  ;;  %v1317_v55 = vadd.f32 1.0, %v3139_v60  ;;  %v1146_v4 = vmul.f32 0.7978846, %v1066_v34  ;;  %v4415_v19 = vadd.f32 %v5152_v46, %v3646_v62  ;;  %v5160_v46 = vld [vmem:[#allocation55_spill] sm:$0xff] }
 0x16f   : > { %v3141_v36 = vpop.eup %3140  ;;  %v1446_v15 = vpack.c.bf16 %v1378_v7, %v1374_v20  ;;  %v756_v52 = vmul.f32 0.5, %v3895_v26  ;;  %3150 = vtanh.f32 %v1142_v32  ;;  %v4420_v18 = vadd.f32 %v5153_v12, %v3628_v44 }
 0x170   : > { %v1321_v35 = vadd.f32 1.0, %v3141_v36  ;;  %v760_v16 = vmul.f32 0.5, %v3969_v57  ;;  %3152 = vtanh.f32 %v1146_v4  ;;  %v4425_v58 = vadd.f32 %v5154_v49, %v3646_v62  ;;  %v5159_v4 = vld [vmem:[#allocation63_spill] sm:$0xff] }
 0x171   : > { %1901 = vmatmul.mubr.bf16.gmra.mrb[56].mxu1 %v1446_v15  ;;  %v4428_v5 = vmul.f32 %v938_v9, %v4386_v48  ;;  %v742_v14 = vmul.f32 0.5, %v5148_v2  ;;  %v746_v26 = vmul.f32 0.5, %v5150_v33  ;;  %v1085_v22 = vadd.f32 %v5156_v30, %v5155_v59 }
 0x172   : > { %v3143_v10 = vpop.eup %3142  ;;  %v1397_v51 = vmul.f32 %v1317_v55, %v4374_v43  ;;  %v1401_v57 = vmul.f32 %v1321_v35, %v4377_v13  ;;  %v859_v54 = vmul.f32 0.044715, %v4415_v19  ;;  %v1089_v40 = vadd.f32 %v5158_v21, %v5157_v11 }
 0x173   : > { %v3145_v34 = vpop.eup %3144  ;;  %v1303_v60 = vadd.f32 1.0, %v3143_v10  ;;  %v862_v20 = vmul.f32 0.044715, %v4420_v18  ;;  %v4441_v2 = vmul.f32 0.5, %v5155_v59  ;;  %v1165_v33 = vmul.f32 0.7978846, %v1085_v22 }
 0x174   : > { %v1457_v7 = vpack.c.bf16 %v1401_v57, %v1397_v51  ;;  %v1307_v9 = vadd.f32 1.0, %v3145_v34  ;;  %v863_v32 = vmul.f32 0.044715, %v4425_v58  ;;  %v1169_v43 = vmul.f32 0.7978846, %v1089_v40  ;;  %v5161_v59 = vld [vmem:[#allocation72_spill] sm:$0xff] }
 0x175   : > { %v3147_v55 = vpop.eup %3146  ;;  %v1383_v13 = vmul.f32 %v1303_v60, %v743_v63  ;;  %3154 = vtanh.f32 %v1165_v33  ;;  %v1071_v36 = vadd.f32 %v5160_v46, %v5159_v4  ;;  %v1075_v15 = vadd.f32 %v4235_v23, %v4148_v38  ;;  %v5163_v33 = vld [vmem:[#allocation65_spill] sm:$0xff] }
 0x176   : > { %v3149_v12 = vpop.eup %3148  ;;  %1811 = vmatprep.mubr.bf16.mxu0 %v1457_v7  ;;  %v1387_v35 = vmul.f32 %v1307_v9, %v747_v24  ;;  %v1316_v49 = vadd.f32 1.0, %v3147_v55  ;;  %3156 = vtanh.f32 %v1169_v43  ;;  %v4450_v30 = vadd.f32 %v5161_v59, %v3628_v44  ;;  %v5162_v24 = vld [vmem:[#allocation57_spill] sm:$0xff]  ;;  %v5164_v9 = vld [vmem:[#allocation64_spill] sm:$0xff]  ;;  %v5165_v43 = vld [vmem:[#allocation70_spill] sm:$0xff] }
 0x177   : > { %v1320_v22 = vadd.f32 1.0, %v3149_v12  ;;  %v939_v10 = vmul.f32 %v859_v54, %v4415_v19  ;;  %v1151_v63 = vmul.f32 0.7978846, %v1071_v36  ;;  %v1155_v51 = vmul.f32 0.7978846, %v1075_v15  ;;  %v5167_v59 = vld [vmem:[#allocation67_spill] sm:$0xff] }
 0x178   : > { %v1451_v57 = vpack.c.bf16 %v1387_v35, %v1383_v13  ;;  %v1396_v21 = vmul.f32 %v1316_v49, %v756_v52  ;;  %v942_v40 = vmul.f32 %v862_v20, %v4420_v18  ;;  %v943_v23 = vmul.f32 %v863_v32, %v4425_v58  ;;  %v5166_v49 = vld [vmem:[#allocation58_spill] sm:$0xff] }
 0x179   : > { %v3151_v34 = vpop.eup %3150  ;;  %v1400_v60 = vmul.f32 %v1320_v22, %v760_v16  ;;  %3158 = vtanh.f32 %v1151_v63  ;;  %v1084_v7 = vadd.f32 %v5163_v33, %v5162_v24  ;;  %v1088_v55 = vadd.f32 %v5165_v43, %v5164_v9 }
 0x17a   : > { %v3153_v46 = vpop.eup %3152  ;;  %1908 = vmatprep.mubr.bf16.mxu1 %v1451_v57  ;;  %v1302_v54 = vadd.f32 1.0, %v3151_v34  ;;  %v769_v36 = vmul.f32 0.5, %v5157_v11  ;;  %3160 = vtanh.f32 %v1155_v51  ;;  %v866_v52 = vmul.f32 0.044715, %v4450_v30  ;;  %v5168_v51 = vld [vmem:[#allocation66_spill] sm:$0xff]  ;;  %v5169_v57 = vld [vmem:[#allocation71_spill] sm:$0xff] }
 0x17b   : > { %v1456_v20 = vpack.c.bf16 %v1400_v60, %v1396_v21  ;;  %v1306_v13 = vadd.f32 1.0, %v3153_v46  ;;  %v1164_v32 = vmul.f32 0.7978846, %v1084_v7  ;;  %v1168_v15 = vmul.f32 0.7978846, %v1088_v55  ;;  %v5170_v60 = vld [vmem:[#allocation21_spill] sm:$0xff] }
 0x17c   : > { %v4462_v16 = vmul.f32 %v939_v10, %v4415_v19  ;;  %v4465_v12 = vmul.f32 %v942_v40, %v4420_v18  ;;  %v751_v35 = vmul.f32 0.5, %v5159_v4  ;;  %v1070_v22 = vadd.f32 %v5167_v59, %v5166_v49 }
 0x17d   : > { %1812 = vmatmul.mubr.bf16.gmra.mrb[52].mxu0 %v1456_v20  ;;  %v1382_v11 = vmul.f32 %v1302_v54, %v742_v14  ;;  %v1386_v63 = vmul.f32 %v1306_v13, %v746_v26  ;;  %3162 = vtanh.f32 %v1164_v32  ;;  %v1074_v21 = vadd.f32 %v5169_v57, %v5168_v51 }
 0x17e   : > { %v946_v34 = vmul.f32 %v866_v52, %v4450_v30  ;;  %3164 = vtanh.f32 %v1168_v15  ;;  %v1150_v10 = vmul.f32 0.7978846, %v1070_v22  ;;  %v4475_v40 = vadd.f32 %v5170_v60, %v3646_v62 }
 0x17f   : > { %v3155_v33 = vpop.eup %3154  ;;  %v1450_v4 = vpack.c.bf16 %v1386_v63, %v1382_v11  ;;  %v4478_v7 = vmul.f32 %v943_v23, %v4425_v58  ;;  %v755_v14 = vmul.f32 0.5, %v4148_v38  ;;  %v1154_v26 = vmul.f32 0.7978846, %v1074_v21 }
 0x180   : > { %v3157_v43 = vpop.eup %3156  ;;  %v1325_v55 = vadd.f32 1.0, %v3155_v33  ;;  %v764_v46 = vmul.f32 0.5, %v5162_v24  ;;  %3166 = vtanh.f32 %v1150_v10  ;;  %v4484_v54 = vadd.f32 %v4220_v1, %v3628_v44 }
 0x181   : > { %1909 = vmatmul.mubr.bf16.gmra.mrb[60].mxu1 %v1450_v4  ;;  %v1329_v52 = vadd.f32 1.0, %v3157_v43  ;;  %v768_v20 = vmul.f32 0.5, %v5164_v9  ;;  %3168 = vtanh.f32 %v1154_v26  ;;  %v4489_v23 = vadd.f32 %v4226_v17, %v3646_v62 }
 0x182   : > { %v4492_v38 = vmul.f32 %v946_v34, %v4450_v30  ;;  %v750_v13 = vmul.f32 0.5, %v5166_v49  ;;  %v867_v24 = vmul.f32 0.044715, %v4475_v40  ;;  %v1093_v1 = vadd.f32 %v4254_v50, %v4167_v8 }
 0x183   : > { %v3159_v32 = vpop.eup %3158  ;;  %v1405_v15 = vmul.f32 %v1325_v55, %v4441_v2  ;;  %v1409_v59 = vmul.f32 %v1329_v52, %v769_v36  ;;  %v754_v9 = vmul.f32 0.5, %v5168_v51  ;;  %v1097_v17 = vadd.f32 %v4325_v45, %v4264_v42  ;;  %v5171_v36 = vld [vmem:[#allocation46_spill] sm:$0xff] }
 0x184   : > { %v3161_v22 = vpop.eup %3160  ;;  %v1311_v11 = vadd.f32 1.0, %v3159_v32  ;;  %v870_v63 = vmul.f32 0.044715, %v4484_v54  ;;  %v4504_v49 = vmul.f32 0.5, %v4167_v8  ;;  %v1173_v57 = vmul.f32 0.7978846, %v1093_v1 }
 0x185   : > { %v1461_v21 = vpack.c.bf16 %v1409_v59, %v1405_v15  ;;  %v1315_v34 = vadd.f32 1.0, %v3161_v22  ;;  %v871_v50 = vmul.f32 0.044715, %v4489_v23  ;;  %v1177_v10 = vmul.f32 0.7978846, %v1097_v17  ;;  %v5172_v15 = vld [vmem:[#allocation45_spill] sm:$0xff] }
 0x186   : > { %v947_v2 = vmul.f32 %v867_v24, %v4475_v40  ;;  %3170 = vtanh.f32 %v1173_v57  ;;  %v1079_v51 = vadd.f32 %v5171_v36, %v4185_v31  ;;  %v1083_v45 = vadd.f32 %v4328_v3, %v4273_v0  ;;  %v5173_v3 = vld [vmem:[#allocation16_spill] sm:$0xff]  ;;  %v5174_v17 = vld [vmem:[#allocation22_spill] sm:$0xff] }
 0x187   : > { %v3163_v60 = vpop.eup %3162  ;;  %1819 = vmatprep.mubr.bf16.mxu0 %v1461_v21  ;;  %v1391_v33 = vmul.f32 %v1311_v11, %v751_v35  ;;  %v1395_v8 = vmul.f32 %v1315_v34, %v755_v14  ;;  %v777_v4 = vmul.f32 0.5, %v4264_v42  ;;  %3172 = vtanh.f32 %v1177_v10  ;;  %v5175_v11 = vld [vmem:[#allocation35_spill] sm:$0xff] }
 0x188   : > { %v3165_v26 = vpop.eup %3164  ;;  %v1324_v43 = vadd.f32 1.0, %v3163_v60  ;;  %v950_v55 = vmul.f32 %v870_v63, %v4484_v54  ;;  %v1159_v52 = vmul.f32 0.7978846, %v1079_v51  ;;  %v1163_v24 = vmul.f32 0.7978846, %v1083_v45  ;;  %v5176_v63 = vld [vmem:[#allocation56_spill] sm:$0xff] }
 0x189   : > { %v1455_v1 = vpack.c.bf16 %v1395_v8, %v1391_v33  ;;  %v1328_v32 = vadd.f32 1.0, %v3165_v26  ;;  %v4516_v59 = vadd.f32 %v5172_v15, %v3628_v44  ;;  %v1092_v22 = vadd.f32 %v5174_v17, %v5173_v3  ;;  %v5177_v8 = vld [vmem:[#allocation23_spill] sm:$0xff]  ;;  %v5178_v26 = vld [vmem:[#allocation28_spill] sm:$0xff] }
 0x18a   : > { %v3167_v35 = vpop.eup %3166  ;;  %v4521_v14 = vmul.f32 %v947_v2, %v4475_v40  ;;  %v951_v42 = vmul.f32 %v871_v50, %v4489_v23  ;;  %3174 = vtanh.f32 %v1159_v52  ;;  %v1096_v57 = vadd.f32 %v5176_v63, %v5175_v11  ;;  %v5181_v63 = vld [vmem:[#allocation3_spill] sm:$0xff] }
 0x18b   : > { %v3169_v21 = vpop.eup %3168  ;;  %1916 = vmatprep.mubr.bf16.mxu1 %v1455_v1  ;;  %v1404_v34 = vmul.f32 %v1324_v43, %v764_v46  ;;  %v1408_v10 = vmul.f32 %v1328_v32, %v768_v20  ;;  %v1310_v36 = vadd.f32 1.0, %v3167_v35  ;;  %3176 = vtanh.f32 %v1163_v24  ;;  %v5179_v46 = vld [vmem:[#allocation27_spill] sm:$0xff] }
 0x18c   : > { %v1314_v44 = vadd.f32 1.0, %v3169_v21  ;;  %v759_v51 = vmul.f32 0.5, %v4185_v31  ;;  %v1172_v45 = vmul.f32 0.7978846, %v1092_v22  ;;  %v1176_v60 = vmul.f32 0.7978846, %v1096_v57 }
 0x18d   : > { %v1460_v33 = vpack.c.bf16 %v1408_v10, %v1404_v34  ;;  %v4528_v2 = vmul.f32 %v950_v55, %v4484_v54  ;;  %v874_v50 = vmul.f32 0.044715, %v4516_v59  ;;  %v1078_v52 = vadd.f32 %v5178_v26, %v5177_v8  ;;  %v5180_v20 = vld [vmem:[#allocation19_spill] sm:$0xff]  ;;  %v5183_v10 = vld [vmem:[#allocation5_spill] sm:$0xff] }
 0x18e   : > { %v1390_v15 = vmul.f32 %v1310_v36, %v750_v13  ;;  %v1394_v1 = vmul.f32 %v1314_v44, %v754_v9  ;;  %3178 = vtanh.f32 %v1172_v45  ;;  %v1082_v43 = vadd.f32 %v5180_v20, %v5179_v46  ;;  %v5182_v13 = vld [vmem:[#allocation9_spill] sm:$0xff] }
 0x18f   : > { %1820 = vmatmul.mubr.bf16.gmra.mrb[56].mxu0 %v1460_v33  ;;  %v4536_v31 = vmul.f32 %v951_v42, %v4489_v23  ;;  %v763_v24 = vmul.f32 0.5, %v4273_v0  ;;  %3180 = vtanh.f32 %v1176_v60  ;;  %v1158_v55 = vmul.f32 0.7978846, %v1078_v52  ;;  %v5184_v42 = vld [vmem:[#allocation13_spill] sm:$0xff]  ;;  %v5185_v60 = vld [vmem:[#allocation36_spill] sm:$0xff] }
 0x190   : > { %v3171_v32 = vpop.eup %3170  ;;  %v1454_v17 = vpack.c.bf16 %v1394_v1, %v1390_v15  ;;  %v772_v22 = vmul.f32 0.5, %v5173_v3  ;;  %v1162_v35 = vmul.f32 0.7978846, %v1082_v43  ;;  %v1101_v9 = vadd.f32 %v5182_v13, %v5181_v63 }
 0x191   : > { %v3173_v57 = vpop.eup %3172  ;;  %v1333_v21 = vadd.f32 1.0, %v3171_v32  ;;  %v776_v34 = vmul.f32 0.5, %v5175_v11  ;;  %3182 = vtanh.f32 %v1158_v55  ;;  %v1105_v36 = vadd.f32 %v5184_v42, %v5183_v10 }
 0x192   : > { %1917 = vmatmul.mubr.bf16.gmra.mrb[64].mxu1 %v1454_v17  ;;  %v1337_v0 = vadd.f32 1.0, %v3173_v57  ;;  %v954_v44 = vmul.f32 %v874_v50, %v4516_v59  ;;  %3184 = vtanh.f32 %v1162_v35  ;;  %v1181_v45 = vmul.f32 0.7978846, %v1101_v9  ;;  %v5188_v9 = vld [vmem:[#allocation4_spill] sm:$0xff] }
 0x193   : > { %v758_v3 = vmul.f32 0.5, %v5177_v8  ;;  %v4549_v33 = vadd.f32 %v5185_v60, %v3646_v62  ;;  %v1185_v26 = vmul.f32 0.7978846, %v1105_v36  ;;  %v1087_v11 = vadd.f32 %v4339_v47, %v4286_v37 }
 0x194   : > { %v3175_v52 = vpop.eup %3174  ;;  %v1413_v15 = vmul.f32 %v1333_v21, %v4504_v49  ;;  %v1417_v1 = vmul.f32 %v1337_v0, %v777_v4  ;;  %3186 = vtanh.f32 %v1181_v45  ;;  %v1091_v50 = vadd.f32 %v4398_v6, %v4347_v39  ;;  %v5186_v49 = vld [vmem:[#allocation2_spill] sm:$0xff]  ;;  %v5187_v4 = vld [vmem:[#allocation8_spill] sm:$0xff] }
 0x195   : > { %v3177_v20 = vpop.eup %3176  ;;  %v1319_v43 = vadd.f32 1.0, %v3175_v52  ;;  %v762_v8 = vmul.f32 0.5, %v5179_v46  ;;  %3188 = vtanh.f32 %v1185_v26  ;;  %v1167_v55 = vmul.f32 0.7978846, %v1087_v11  ;;  %v5189_v6 = vld [vmem:[#allocation10_spill] sm:$0xff] }
 0x196   : > { %v1465_v62 = vpack.c.bf16 %v1417_v1, %v1413_v15  ;;  %v1323_v32 = vadd.f32 1.0, %v3177_v20  ;;  %v4558_v17 = vmul.f32 %v954_v44, %v4516_v59  ;;  %v1171_v47 = vmul.f32 0.7978846, %v1091_v50 }
 0x197   : > { %v875_v35 = vmul.f32 0.044715, %v4549_v33  ;;  %3190 = vtanh.f32 %v1167_v55  ;;  %v1100_v13 = vadd.f32 %v5187_v4, %v5186_v49  ;;  %v1104_v57 = vadd.f32 %v5189_v6, %v5188_v9  ;;  %v5192_v4 = vld [vmem:[#allocation12_spill] sm:$0xff] }
 0x198   : > { %v3179_v21 = vpop.eup %3178  ;;  %1827 = vmatprep.mubr.bf16.mxu0 %v1465_v62  ;;  %v1399_v46 = vmul.f32 %v1319_v43, %v759_v51  ;;  %v1403_v42 = vmul.f32 %v1323_v32, %v763_v24  ;;  %v781_v36 = vmul.f32 0.5, %v5181_v63  ;;  %3192 = vtanh.f32 %v1171_v47  ;;  %v5190_v32 = vld [vmem:[#allocation7_spill] sm:$0xff] }
 0x199   : > { %v3181_v0 = vpop.eup %3180  ;;  %v1332_v44 = vadd.f32 1.0, %v3179_v21  ;;  %v1180_v45 = vmul.f32 0.7978846, %v1100_v13  ;;  %v1184_v60 = vmul.f32 0.7978846, %v1104_v57  ;;  %v1086_v26 = vadd.f32 %v4332_v29, %v4279_v56  ;;  %v5191_v47 = vld [vmem:[#allocation15_spill] sm:$0xff] }
 0x19a   : > { %v1459_v11 = vpack.c.bf16 %v1403_v42, %v1399_v46  ;;  %v1336_v52 = vadd.f32 1.0, %v3181_v0  ;;  %v785_v15 = vmul.f32 0.5, %v5183_v10  ;;  %v1090_v1 = vadd.f32 %v4366_v27, %v4317_v61  ;;  %v5193_v13 = vld [vmem:[#allocation18_spill] sm:$0xff] }
 0x19b   : > { %v3183_v50 = vpop.eup %3182  ;;  %v1412_v51 = vmul.f32 %v1332_v44, %v772_v22  ;;  %v955_v24 = vmul.f32 %v875_v35, %v4549_v33  ;;  %3194 = vtanh.f32 %v1180_v45  ;;  %v1166_v63 = vmul.f32 0.7978846, %v1086_v26 }
 0x19c   : > { %v3185_v20 = vpop.eup %3184  ;;  %1924 = vmatprep.mubr.bf16.mxu1 %v1459_v11  ;;  %v1416_v43 = vmul.f32 %v1336_v52, %v776_v34  ;;  %v1318_v55 = vadd.f32 1.0, %v3183_v50  ;;  %3196 = vtanh.f32 %v1184_v60  ;;  %v1170_v62 = vmul.f32 0.7978846, %v1090_v1 }
 0x19d   : > { %v1322_v29 = vadd.f32 1.0, %v3185_v20  ;;  %3198 = vtanh.f32 %v1166_v63  ;;  %v1109_v10 = vadd.f32 %v5191_v47, %v5190_v32  ;;  %v1113_v27 = vadd.f32 %v5193_v13, %v5192_v4  ;;  %v5194_v20 = vld [vmem:[#allocation6_spill] sm:$0xff] }
 0x19e   : > { %v3187_v6 = vpop.eup %3186  ;;  %v1464_v22 = vpack.c.bf16 %v1416_v43, %v1412_v51  ;;  %v1398_v57 = vmul.f32 %v1318_v55, %v758_v3  ;;  %v767_v35 = vmul.f32 0.5, %v4286_v37  ;;  %3200 = vtanh.f32 %v1170_v62  ;;  %v5195_v43 = vld [vmem:[#allocation14_spill] sm:$0xff] }
 0x19f   : > { %v3189_v21 = vpop.eup %3188  ;;  %v1402_v46 = vmul.f32 %v1322_v29, %v762_v8  ;;  %v1341_v34 = vadd.f32 1.0, %v3187_v6  ;;  %v1189_v42 = vmul.f32 0.7978846, %v1109_v10  ;;  %v1193_v0 = vmul.f32 0.7978846, %v1113_v27 }
 0x1a0   : > { %1828 = vmatmul.mubr.bf16.gmra.mrb[60].mxu0 %v1464_v22  ;;  %v1345_v44 = vadd.f32 1.0, %v3189_v21  ;;  %v771_v45 = vmul.f32 0.5, %v4347_v39  ;;  %v1095_v60 = vadd.f32 %v4411_v41, %v4363_v25  ;;  %v1099_v26 = vadd.f32 %v4462_v16, %v4415_v19 }
 0x1a1   : > { %v3191_v11 = vpop.eup %3190  ;;  %v1458_v3 = vpack.c.bf16 %v1402_v46, %v1398_v57  ;;  %v4583_v37 = vmul.f32 %v955_v24, %v4549_v33  ;;  %v1421_v52 = vmul.f32 %v1341_v34, %v781_v36  ;;  %3202 = vtanh.f32 %v1189_v42  ;;  %v5196_v24 = vld [vmem:[#allocation11_spill] sm:$0xff]  ;;  %v5197_v36 = vld [vmem:[#allocation17_spill] sm:$0xff] }
 0x1a2   : > { %v3193_v8 = vpop.eup %3192  ;;  %v1425_v1 = vmul.f32 %v1345_v44, %v785_v15  ;;  %v1327_v50 = vadd.f32 1.0, %v3191_v11  ;;  %3204 = vtanh.f32 %v1193_v0  ;;  %v1175_v51 = vmul.f32 0.7978846, %v1095_v60 }
 0x1a3   : > { %1925 = vmatmul.mubr.bf16.gmra.mrb[68].mxu1 %v1458_v3  ;;  %v1331_v39 = vadd.f32 1.0, %v3193_v8  ;;  %v780_v63 = vmul.f32 0.5, %v5186_v49  ;;  %v1179_v41 = vmul.f32 0.7978846, %v1099_v26  ;;  %v1108_v16 = vadd.f32 %v5195_v43, %v5194_v20 }
 0x1a4   : > { %v1469_v55 = vpack.c.bf16 %v1425_v1, %v1421_v52  ;;  %v784_v62 = vmul.f32 0.5, %v5188_v9  ;;  %3206 = vtanh.f32 %v1175_v51  ;;  %v1112_v29 = vadd.f32 %v5197_v36, %v5196_v24 }
 0x1a5   : > { %v3195_v47 = vpop.eup %3194  ;;  %v1407_v15 = vmul.f32 %v1327_v50, %v767_v35  ;;  %v1411_v10 = vmul.f32 %v1331_v39, %v771_v45  ;;  %3208 = vtanh.f32 %v1179_v41  ;;  %v1188_v13 = vmul.f32 0.7978846, %v1108_v16 }
 0x1a6   : > { %v3197_v27 = vpop.eup %3196  ;;  %1835 = vmatprep.mubr.bf16.mxu0 %v1469_v55  ;;  %v1340_v6 = vadd.f32 1.0, %v3195_v47  ;;  %v766_v49 = vmul.f32 0.5, %v4279_v56  ;;  %v1192_v22 = vmul.f32 0.7978846, %v1112_v29  ;;  %v1094_v57 = vadd.f32 %v4403_v53, %v4351_v28 }
 0x1a7   : > { %v3199_v21 = vpop.eup %3198  ;;  %v1463_v9 = vpack.c.bf16 %v1411_v10, %v1407_v15  ;;  %v1344_v46 = vadd.f32 1.0, %v3197_v27  ;;  %3210 = vtanh.f32 %v1188_v13  ;;  %v1098_v34 = vadd.f32 %v4428_v5, %v4386_v48 }
 0x1a8   : > { %v3201_v35 = vpop.eup %3200  ;;  %v770_v42 = vmul.f32 0.5, %v4317_v61  ;;  %v1326_v0 = vadd.f32 1.0, %v3199_v21  ;;  %3212 = vtanh.f32 %v1192_v22  ;;  %v1174_v44 = vmul.f32 0.7978846, %v1094_v57 }
 0x1a9   : > { %1932 = vmatprep.mubr.bf16.mxu1 %v1463_v9  ;;  %v1420_v45 = vmul.f32 %v1340_v6, %v780_v63  ;;  %v1424_v56 = vmul.f32 %v1344_v46, %v784_v62  ;;  %v1330_v60 = vadd.f32 1.0, %v3201_v35  ;;  %v1178_v26 = vmul.f32 0.7978846, %v1098_v34 }
 0x1aa   : > { %v1406_v11 = vmul.f32 %v1326_v0, %v766_v49  ;;  %v789_v53 = vmul.f32 0.5, %v5190_v32  ;;  %3214 = vtanh.f32 %v1174_v44  ;;  %v1103_v3 = vadd.f32 %v4478_v7, %v4425_v58 }
 0x1ab   : > { %v3203_v52 = vpop.eup %3202  ;;  %v1468_v5 = vpack.c.bf16 %v1424_v56, %v1420_v45  ;;  %v1410_v8 = vmul.f32 %v1330_v60, %v770_v42  ;;  %3216 = vtanh.f32 %v1178_v26  ;;  %v1107_v61 = vadd.f32 %v4521_v14, %v4475_v40 }
 0x1ac   : > { %v3205_v1 = vpop.eup %3204  ;;  %v793_v50 = vmul.f32 0.5, %v5192_v4  ;;  %v1349_v51 = vadd.f32 1.0, %v3203_v52  ;;  %v775_v39 = vmul.f32 0.5, %v4363_v25  ;;  %v1183_v63 = vmul.f32 0.7978846, %v1103_v3 }
 0x1ad   : > { %1836 = vmatmul.mubr.bf16.gmra.mrb[64].mxu0 %v1468_v5  ;;  %v1462_v32 = vpack.c.bf16 %v1410_v8, %v1406_v11  ;;  %v1353_v41 = vadd.f32 1.0, %v3205_v1  ;;  %v1187_v43 = vmul.f32 0.7978846, %v1107_v61  ;;  %v1102_v7 = vadd.f32 %v4465_v12, %v4420_v18 }
 0x1ae   : > { %v3207_v16 = vpop.eup %3206  ;;  %v1429_v55 = vmul.f32 %v1349_v51, %v789_v53  ;;  %v779_v62 = vmul.f32 0.5, %v4415_v19  ;;  %3218 = vtanh.f32 %v1183_v63  ;;  %v1106_v14 = vadd.f32 %v4492_v38, %v4450_v30 }
 0x1af   : > { %v3209_v4 = vpop.eup %3208  ;;  %1933 = vmatmul.mubr.bf16.gmra.mrb[72].mxu1 %v1462_v32  ;;  %v1433_v36 = vmul.f32 %v1353_v41, %v793_v50  ;;  %v1335_v25 = vadd.f32 1.0, %v3207_v16  ;;  %3220 = vtanh.f32 %v1187_v43  ;;  %v1182_v29 = vmul.f32 0.7978846, %v1102_v7 }
 0x1b0   : > { %v1339_v47 = vadd.f32 1.0, %v3209_v4  ;;  %v788_v15 = vmul.f32 0.5, %v5194_v20  ;;  %v1186_v10 = vmul.f32 0.7978846, %v1106_v14  ;;  %v1111_v12 = vadd.f32 %v4536_v31, %v4489_v23 }
 0x1b1   : > { %v3211_v13 = vpop.eup %3210  ;;  %v1473_v27 = vpack.c.bf16 %v1433_v36, %v1429_v55  ;;  %v1415_v19 = vmul.f32 %v1335_v25, %v775_v39  ;;  %3222 = vtanh.f32 %v1182_v29  ;;  %v1115_v38 = vadd.f32 %v4583_v37, %v4549_v33 }
 0x1b2   : > { %v3213_v6 = vpop.eup %3212  ;;  %v1419_v49 = vmul.f32 %v1339_v47, %v779_v62  ;;  %v1348_v22 = vadd.f32 1.0, %v3211_v13  ;;  %3224 = vtanh.f32 %v1186_v10  ;;  %v1191_v57 = vmul.f32 0.7978846, %v1111_v12 }
 0x1b3   : > { %1843 = vmatprep.mubr.bf16.mxu0 %v1473_v27  ;;  %v792_v21 = vmul.f32 0.5, %v5196_v24  ;;  %v1352_v20 = vadd.f32 1.0, %v3213_v6  ;;  %v1195_v9 = vmul.f32 0.7978846, %v1115_v38  ;;  %v1110_v35 = vadd.f32 %v4528_v2, %v4484_v54 }
 0x1b4   : > { %v3215_v46 = vpop.eup %3214  ;;  %v1467_v34 = vpack.c.bf16 %v1419_v49, %v1415_v19  ;;  %v1428_v31 = vmul.f32 %v1348_v22, %v788_v15  ;;  %3226 = vtanh.f32 %v1191_v57  ;;  %v1114_v44 = vadd.f32 %v4558_v17, %v4516_v59 }
 0x1b5   : > { %v3217_v42 = vpop.eup %3216  ;;  %v1432_v0 = vmul.f32 %v1352_v20, %v792_v21  ;;  %v1334_v37 = vadd.f32 1.0, %v3215_v46  ;;  %3228 = vtanh.f32 %v1195_v9  ;;  %v774_v45 = vmul.f32 0.5, %v4351_v28 }
 0x1b6   : > { %1940 = vmatprep.mubr.bf16.mxu1 %v1467_v34  ;;  %v778_v24 = vmul.f32 0.5, %v4386_v48  ;;  %v1338_v56 = vadd.f32 1.0, %v3217_v42  ;;  %v1190_v60 = vmul.f32 0.7978846, %v1110_v35  ;;  %v1194_v11 = vmul.f32 0.7978846, %v1114_v44 }
 0x1b7   : > { %v1472_v26 = vpack.c.bf16 %v1432_v0, %v1428_v31  ;;  %v1414_v3 = vmul.f32 %v1334_v37, %v774_v45  ;;  %v783_v17 = vmul.f32 0.5, %v4425_v58  ;;  %v787_v61 = vmul.f32 0.5, %v4475_v40 }
 0x1b8   : > { %v3219_v53 = vpop.eup %3218  ;;  %v1418_v52 = vmul.f32 %v1338_v56, %v778_v24  ;;  %3230 = vtanh.f32 %v1190_v60  ;;  %v782_v63 = vmul.f32 0.5, %v4420_v18  ;;  %v786_v32 = vmul.f32 0.5, %v4450_v30 }
 0x1b9   : > { %v3221_v2 = vpop.eup %3220  ;;  %1844 = vmatmul.mubr.bf16.gmra.mrb[68].mxu0 %v1472_v26  ;;  %v1343_v5 = vadd.f32 1.0, %v3219_v53  ;;  %3232 = vtanh.f32 %v1194_v11  ;;  %v791_v40 = vmul.f32 0.5, %v4489_v23  ;;  %v795_v14 = vmul.f32 0.5, %v4549_v33 }
 0x1ba   : > { %v1466_v8 = vpack.c.bf16 %v1418_v52, %v1414_v3  ;;  %v1347_v28 = vadd.f32 1.0, %v3221_v2  ;;  %v790_v10 = vmul.f32 0.5, %v4484_v54  ;;  %v794_v12 = vmul.f32 0.5, %v4516_v59  ;;  %v4632_v59 = vld [vmem:[%s4945_s4] ss:$0 sm:$0xff] }
 0x1bb   : > { %v3223_v1 = vpop.eup %3222  ;;  %v1423_v50 = vmul.f32 %v1343_v5, %v783_v17 }
 0x1bc   : > { %v3225_v48 = vpop.eup %3224  ;;  %1941 = vmatmul.mubr.bf16.gmra.mrb[76].mxu1 %v1466_v8  ;;  %v1427_v51 = vmul.f32 %v1347_v28, %v787_v61  ;;  %v1342_v39 = vadd.f32 1.0, %v3223_v1 }
 0x1bd   : > { %v1346_v41 = vadd.f32 1.0, %v3225_v48 }
 0x1be   : > { %v3227_v43 = vpop.eup %3226  ;;  %v1471_v7 = vpack.c.bf16 %v1427_v51, %v1423_v50  ;;  %v1422_v55 = vmul.f32 %v1342_v39, %v782_v63 }
 0x1bf   : > { %v3229_v16 = vpop.eup %3228  ;;  %v1426_v62 = vmul.f32 %v1346_v41, %v786_v32  ;;  %v1351_v58 = vadd.f32 1.0, %v3227_v43 }
 0x1c0   : > { %1948 = vmatprep.mubr.bf16.mxu1 %v1471_v7  ;;  %v1355_v4 = vadd.f32 1.0, %v3229_v16 }
 0x1c1   : > { %v1470_v36 = vpack.c.bf16 %v1426_v62, %v1422_v55  ;;  %v1431_v29 = vmul.f32 %v1351_v58, %v791_v40 }
 0x1c2   : > { %v3231_v25 = vpop.eup %3230  ;;  %v1435_v47 = vmul.f32 %v1355_v4, %v795_v14 }
 0x1c3   : > { %v3233_v18 = vpop.eup %3232  ;;  %v1350_v15 = vadd.f32 1.0, %v3231_v25 }
 0x1c4   : > { %1949 = vmatmul.mubr.bf16.gmra.mrb[80].mxu1 %v1470_v36  ;;  %v1475_v30 = vpack.c.bf16 %v1435_v47, %v1431_v29  ;;  %v1354_v13 = vadd.f32 1.0, %v3233_v18 }
 0x1c5   : > { %v1430_v27 = vmul.f32 %v1350_v15, %v790_v10 }
 0x1c6   : > { %1956 = vmatprep.mubr.bf16.mxu1 %v1475_v30  ;;  %v1434_v19 = vmul.f32 %v1354_v13, %v794_v12 }
 0x1c8   : > { %v1474_v23 = vpack.c.bf16 %v1434_v19, %v1430_v27 }
 0x1cc   : > { %1957 = vmatmul.mubr.bf16.gmra.mrb[84].mxu1 %v1474_v23 }
 0x1fd   : > { %v2802_v33 = vpop.f32.mrb[32].mxu0 }
 0x1fe   : > { %v2803_v38 = vpop.f32.mrb[33].mxu0 }
 0x1ff   : > { %v2804_v6 = vadd.f32 %v2803_v38, %v2802_v33  ;;  %v2805_v49 = vpop.f32.mrb[34].mxu0 }
 0x200   : > { %v2806_v22 = vpop.f32.mrb[35].mxu0 }
 0x201   : > { %v2807_v57 = vadd.f32 %v2806_v22, %v2805_v49  ;;  %v1774_v42 = vadd.f32 %v2804_v6, %v4632_v59 }
 0x203   : > { %v1777_v24 = vadd.f32 %v2807_v57, %v4632_v59 }
 0x20b   : > { %v2808_v21 = vpop.f32.mrb[36].mxu0 }
 0x20c   : > { %v2809_v20 = vpop.f32.mrb[37].mxu0 }
 0x20d   : > { %v2810_v9 = vadd.f32 %v2809_v20, %v2808_v21  ;;  %v2811_v46 = vpop.f32.mrb[38].mxu0 }
 0x20e   : > { %v2812_v34 = vpop.f32.mrb[39].mxu0 }
 0x20f   : > { %v2813_v54 = vadd.f32 %v2812_v34, %v2811_v46  ;;  %v1782_v55 = vadd.f32 %v2810_v9, %v4632_v59 }
 0x211   : > { %v1785_v18 = vadd.f32 %v2813_v54, %v4632_v59 }
 0x218   : > { %v2878_v31 = vpop.f32.mrb[48].mxu1 }
 0x219   : > { %v2879_v35 = vpop.f32.mrb[49].mxu1 }
 0x21a   : > { %v2880_v0 = vadd.f32 %v2879_v35, %v2878_v31  ;;  %v2881_v37 = vpop.f32.mrb[50].mxu1 }
 0x21b   : > { %v2814_v44 = vpop.f32.mrb[40].mxu0  ;;  %v2882_v45 = vpop.f32.mrb[51].mxu1 }
 0x21c   : > { %v2815_v56 = vpop.f32.mrb[41].mxu0  ;;  %v1887_v60 = vadd.f32 %v2880_v0, %v1774_v42  ;;  %v2883_v26 = vadd.f32 %v2882_v45, %v2881_v37 }
 0x21d   : > { %v4636_v11 = vadd.f32 %v2815_v56, %v2814_v44  ;;  %v2817_v53 = vpop.f32.mrb[42].mxu0  ;;  %v3067_v56 = vld [vmem:[%s4946_s5 + $0x8] sm:$0xff]  }
 0x21e   : > { %v1985_v3 = vmul.f32 0.044715, %v1887_v60  ;;  %v2818_v52 = vpop.f32.mrb[43].mxu0  ;;  %v1890_v2 = vadd.f32 %v2883_v26, %v1777_v24  ;;  %v1965_v36 = vmul.f32 0.5, %v1887_v60  ;;  %v3066_v24 = vld [vmem:[%s4946_s5] sm:$0xff]  }
 0x21f   : > { %v4638_v5 = vadd.f32 %v2818_v52, %v2817_v53  ;;  %2956 = vmatprep.subr.bf16.mxu0 %v3066_v24 }
 0x220   : > { %v1986_v8 = vmul.f32 0.044715, %v1890_v2  ;;  %v2005_v17 = vmul.f32 %v1985_v3, %v1887_v60  ;;  %v1966_v12 = vmul.f32 0.5, %v1890_v2  ;;  %2957 = vmatpush3.bf16.msra.mxu0 %v3066_v24 }
 0x221   : > { %v1793_v52 = vadd.f32 %v4638_v5, %v4632_v59  ;;  %2958 = vmatprep.subr.bf16.mxu0 %v3067_v56 }
 0x222   : > { %v2025_v61 = vmul.f32 %v2005_v17, %v1887_v60  ;;  %v2006_v28 = vmul.f32 %v1986_v8, %v1890_v2 }
 0x224   : > { %v2045_v1 = vadd.f32 %v2025_v61, %v1887_v60  ;;  %v2026_v48 = vmul.f32 %v2006_v28, %v1890_v2  ;;  %v1790_v60 = vadd.f32 %v4636_v11, %v4632_v59  ;;  %2959 = vmatpush3.bf16.msra.mxu0 %v3067_v56 }
 0x226   : > { %v2065_v50 = vmul.f32 0.7978846, %v2045_v1  ;;  %v2046_v51 = vadd.f32 %v2026_v48, %v1890_v2 }
 0x228   : > { %3234 = vtanh.f32 %v2065_v50  ;;  %v2066_v39 = vmul.f32 0.7978846, %v2046_v51 }
 0x22a   : > { %3236 = vtanh.f32 %v2066_v39 }
 0x22f   : > { %v2820_v63 = vpop.f32.mrb[44].mxu0 }
 0x230   : > { %v2821_v32 = vpop.f32.mrb[45].mxu0 }
 0x231   : > { %v2884_v41 = vpop.f32.mrb[52].mxu1  ;;  %v4640_v43 = vadd.f32 %v2821_v32, %v2820_v63  ;;  %v2823_v7 = vpop.f32.mrb[46].mxu0 }
 0x232   : > { %v3235_v16 = vpop.eup %3234  ;;  %v2885_v62 = vpop.f32.mrb[53].mxu1 }
 0x233   : > { %v2824_v58 = vpop.f32.mrb[47].mxu0  ;;  %v2886_v40 = vadd.f32 %v2885_v62, %v2884_v41  ;;  %v2887_v14 = vpop.f32.mrb[54].mxu1  ;;  %v2105_v25 = vadd.f32 1.0, %v3235_v16 }
 0x234   : > { %v4643_v4 = vadd.f32 %v2824_v58, %v2823_v7  ;;  %v3237_v29 = vpop.eup %3236  ;;  %v2888_v47 = vpop.f32.mrb[55].mxu1 }
 0x235   : > { %v1895_v15 = vadd.f32 %v2886_v40, %v1782_v55  ;;  %v2889_v30 = vadd.f32 %v2888_v47, %v2887_v14  ;;  %v4646_v10 = vmul.f32 %v2105_v25, %v1965_v36  ;;  %v2106_v13 = vadd.f32 1.0, %v3237_v29 }
 0x237   : > { %v1987_v27 = vmul.f32 0.044715, %v1895_v15  ;;  %v1898_v19 = vadd.f32 %v2889_v30, %v1785_v18  ;;  %2145 = vadd.xlane.f32.xlu0 %v4646_v10  ;;  %v4649_v23 = vmul.f32 %v2106_v13, %v1966_v12  ;;  %v2206_v21 = vmul.f32 %v4646_v10, %v4646_v10 }
 0x238   : > { %v1967_v48 = vmul.f32 0.5, %v1895_v15  ;;  %v1798_v13 = vadd.f32 %v4640_v43, %v4632_v59 }
 0x239   : > { %v1988_v33 = vmul.f32 0.044715, %v1898_v19  ;;  %v2007_v38 = vmul.f32 %v1987_v27, %v1895_v15  ;;  %v2207_v6 = vmul.f32 %v4649_v23, %v4649_v23  ;;  %v1968_v5 = vmul.f32 0.5, %v1898_v19 }
 0x23b   : > { %2147 = vadd.xlane.f32.xlu0 %v4649_v23  ;;  %v2027_v49 = vmul.f32 %v2007_v38, %v1895_v15  ;;  %v2008_v22 = vmul.f32 %v1988_v33, %v1898_v19  ;;  %2228 = vadd.xlane.f32.xlu1 %v2207_v6  ;;  %v1801_v6 = vadd.f32 %v4643_v4, %v4632_v59 }
 0x23d   : > { %v2047_v57 = vadd.f32 %v2027_v49, %v1895_v15  ;;  %v2028_v20 = vmul.f32 %v2008_v22, %v1898_v19 }
 0x23f   : > { %v2826_v9 = vpop.f32.mrb[48].mxu0  ;;  %v2067_v46 = vmul.f32 0.7978846, %v2047_v57  ;;  %2226 = vadd.xlane.f32.xlu0 %v2206_v21  ;;  %v2048_v34 = vadd.f32 %v2028_v20, %v1898_v19 }
 0x240   : > { %v2827_v54 = vpop.f32.mrb[49].mxu0 }
 0x241   : > { %v4656_v31 = vadd.f32 %v2827_v54, %v2826_v9  ;;  %v2829_v35 = vpop.f32.mrb[50].mxu0  ;;  %3238 = vtanh.f32 %v2067_v46  ;;  %v2068_v42 = vmul.f32 0.7978846, %v2048_v34 }
 0x242   : > { %v2830_v0 = vpop.f32.mrb[51].mxu0 }
 0x243   : > { %v4658_v37 = vadd.f32 %v2830_v0, %v2829_v35  ;;  %3240 = vtanh.f32 %v2068_v42 }
 0x244   : > { %v2890_v44 = vpop.f32.mrb[56].mxu1 }
 0x245   : > { %v2891_v45 = vpop.f32.mrb[57].mxu1 }
 0x246   : > { %v2892_v26 = vadd.f32 %v2891_v45, %v2890_v44  ;;  %v2893_v53 = vpop.f32.mrb[58].mxu1  ;;  %v3068_v45 = vld [vmem:[%s4946_s5 + $0x10] sm:$0xff]  }
 0x247   : > { %v2894_v3 = vpop.f32.mrb[59].mxu1  ;;  %2960 = vmatprep.subr.bf16.mxu0 %v3068_v45 }
 0x248   : > { %v1903_v2 = vadd.f32 %v2892_v26, %v1790_v60  ;;  %v2895_v8 = vadd.f32 %v2894_v3, %v2893_v53  ;;  %2961 = vmatpush3.bf16.msra.mxu0 %v3068_v45 }
 0x24a   : > { %v1989_v17 = vmul.f32 0.044715, %v1903_v2  ;;  %v1906_v61 = vadd.f32 %v2895_v8, %v1793_v52  ;;  %v1969_v54 = vmul.f32 0.5, %v1903_v2 }
 0x24b   : > { %v3239_v28 = vpop.eup %3238 }
 0x24c   : > { %v1990_v1 = vmul.f32 0.044715, %v1906_v61  ;;  %v2107_v50 = vadd.f32 1.0, %v3239_v28  ;;  %v2009_v51 = vmul.f32 %v1989_v17, %v1903_v2  ;;  %v1970_v24 = vmul.f32 0.5, %v1906_v61 }
 0x24d   : > { %v3241_v11 = vpop.eup %3240 }
 0x24e   : > { %v4670_v39 = vmul.f32 %v2107_v50, %v1967_v48  ;;  %v2108_v63 = vadd.f32 1.0, %v3241_v11  ;;  %v2029_v32 = vmul.f32 %v2009_v51, %v1903_v2  ;;  %v2010_v41 = vmul.f32 %v1990_v1, %v1906_v61 }
 0x24f   : > { %v1806_v51 = vadd.f32 %v4656_v31, %v4632_v59 }
 0x250   : > { %v2832_v7 = vpop.f32.mrb[52].mxu0  ;;  %2149 = vadd.xlane.f32.xlu1 %v4670_v39  ;;  %v2208_v16 = vmul.f32 %v4670_v39, %v4670_v39  ;;  %v2049_v55 = vadd.f32 %v2029_v32, %v1903_v2  ;;  %v2030_v62 = vmul.f32 %v2010_v41, %v1906_v61  ;;  %v4677_v36 = vmul.f32 %v2108_v63, %v1968_v5 }
 0x251   : > { %v2833_v58 = vpop.f32.mrb[53].mxu0 }
 0x252   : > { %v4675_v40 = vadd.f32 %v2833_v58, %v2832_v7  ;;  %v2835_v14 = vpop.f32.mrb[54].mxu0  ;;  %2230 = vadd.xlane.f32.xlu0 %v2208_v16  ;;  %v2069_v25 = vmul.f32 0.7978846, %v2049_v55  ;;  %v2050_v29 = vadd.f32 %v2030_v62, %v1906_v61  ;;  %v2209_v33 = vmul.f32 %v4677_v36, %v4677_v36 }
 0x253   : > { %v2836_v47 = vpop.f32.mrb[55].mxu0  ;;  %v1809_v7 = vadd.f32 %v4658_v37, %v4632_v59 }
 0x254   : > { %v2896_v18 = vpop.f32.mrb[60].mxu1  ;;  %v4679_v15 = vadd.f32 %v2836_v47, %v2835_v14  ;;  %2151 = vadd.xlane.f32.xlu1 %v4677_v36  ;;  %3242 = vtanh.f32 %v2069_v25  ;;  %v2070_v30 = vmul.f32 0.7978846, %v2050_v29 }
 0x255   : > { %v2897_v12 = vpop.f32.mrb[61].mxu1 }
 0x256   : > { %v2898_v27 = vadd.f32 %v2897_v12, %v2896_v18  ;;  %v2899_v19 = vpop.f32.mrb[62].mxu1  ;;  %3244 = vtanh.f32 %v2070_v30 }
 0x257   : > { %v2900_v38 = vpop.f32.mrb[63].mxu1 }
 0x258   : > { %v1911_v49 = vadd.f32 %v2898_v27, %v1798_v13  ;;  %v2901_v22 = vadd.f32 %v2900_v38, %v2899_v19  ;;  %2232 = vadd.xlane.f32.xlu1 %v2209_v33 }
 0x25a   : > { %v1991_v57 = vmul.f32 0.044715, %v1911_v49  ;;  %v1914_v21 = vadd.f32 %v2901_v22, %v1801_v6  ;;  %v1971_v29 = vmul.f32 0.5, %v1911_v49 }
 0x25c   : > { %v1992_v20 = vmul.f32 0.044715, %v1914_v21  ;;  %v2011_v9 = vmul.f32 %v1991_v57, %v1911_v49  ;;  %v1972_v12 = vmul.f32 0.5, %v1914_v21 }
 0x25e   : > { %v3243_v46 = vpop.eup %3242  ;;  %v2031_v34 = vmul.f32 %v2011_v9, %v1911_v49  ;;  %v2012_v43 = vmul.f32 %v1992_v20, %v1914_v21 }
 0x25f   : > { %v2109_v35 = vadd.f32 1.0, %v3243_v46 }
 0x260   : > { %v3245_v42 = vpop.eup %3244  ;;  %v2051_v0 = vadd.f32 %v2031_v34, %v1911_v49  ;;  %v2032_v44 = vmul.f32 %v2012_v43, %v1914_v21  ;;  %v3069_v49 = vld [vmem:[%s4946_s5 + $0x18] sm:$0xff]  }
 0x261   : > { %v4691_v4 = vmul.f32 %v2109_v35, %v1969_v54  ;;  %v2110_v56 = vadd.f32 1.0, %v3245_v42  ;;  %2962 = vmatprep.subr.bf16.mxu0 %v3069_v49 }
 0x262   : > { %v2838_v60 = vpop.f32.mrb[56].mxu0  ;;  %v2071_v26 = vmul.f32 0.7978846, %v2051_v0  ;;  %v2052_v53 = vadd.f32 %v2032_v44, %v1914_v21  ;;  %2963 = vmatpush3.bf16.msra.mxu0 %v3069_v49  ;;  %v1814_v0 = vadd.f32 %v4675_v40, %v4632_v59 }
 0x263   : > { %v2839_v3 = vpop.f32.mrb[57].mxu0  ;;  %2153 = vadd.xlane.f32.xlu0 %v4691_v4  ;;  %v4694_v52 = vmul.f32 %v2110_v56, %v1970_v24  ;;  %v2210_v61 = vmul.f32 %v4691_v4, %v4691_v4  ;;  %v1817_v56 = vadd.f32 %v4679_v15, %v4632_v59 }
 0x264   : > { %v4696_v2 = vadd.f32 %v2839_v3, %v2838_v60  ;;  %v2841_v8 = vpop.f32.mrb[58].mxu0  ;;  %3246 = vtanh.f32 %v2071_v26  ;;  %v2072_v17 = vmul.f32 0.7978846, %v2052_v53  ;;  %v3070_v53 = vld [vmem:[%s4946_s5 + $0x20] sm:$0xff]  }
 0x265   : > { %v2902_v28 = vpop.f32.mrb[64].mxu1  ;;  %v2842_v1 = vpop.f32.mrb[59].mxu0  ;;  %2155 = vadd.xlane.f32.xlu1 %v4694_v52  ;;  %v2211_v32 = vmul.f32 %v4694_v52, %v4694_v52  ;;  %2964 = vmatprep.subr.bf16.mxu0 %v3070_v53 }
 0x266   : > { %v2903_v48 = vpop.f32.mrb[65].mxu1  ;;  %v4701_v50 = vadd.f32 %v2842_v1, %v2841_v8  ;;  %3248 = vtanh.f32 %v2072_v17  ;;  %2965 = vmatpush3.bf16.msra.mxu0 %v3070_v53 }
 0x267   : > { %v2904_v11 = vadd.f32 %v2903_v48, %v2902_v28  ;;  %v2905_v63 = vpop.f32.mrb[66].mxu1  ;;  %2234 = vadd.xlane.f32.xlu0 %v2210_v61 }
 0x268   : > { %v2906_v41 = vpop.f32.mrb[67].mxu1 }
 0x269   : > { %v1919_v5 = vadd.f32 %v2904_v11, %v1806_v51  ;;  %v2907_v16 = vadd.f32 %v2906_v41, %v2905_v63  ;;  %2236 = vadd.xlane.f32.xlu1 %v2211_v32 }
 0x26b   : > { %v1993_v55 = vmul.f32 0.044715, %v1919_v5  ;;  %v1922_v62 = vadd.f32 %v2907_v16, %v1809_v7  ;;  %v1973_v15 = vmul.f32 0.5, %v1919_v5 }
 0x26d   : > { %v1994_v58 = vmul.f32 0.044715, %v1922_v62  ;;  %v2013_v14 = vmul.f32 %v1993_v55, %v1919_v5  ;;  %v1974_v32 = vmul.f32 0.5, %v1922_v62 }
 0x26e   : > { %v3247_v25 = vpop.eup %3246 }
 0x26f   : > { %v2111_v31 = vadd.f32 1.0, %v3247_v25  ;;  %v2033_v47 = vmul.f32 %v2013_v14, %v1919_v5  ;;  %v2014_v18 = vmul.f32 %v1994_v58, %v1922_v62 }
 0x270   : > { %v3249_v30 = vpop.eup %3248 }
 0x271   : > { %v4709_v13 = vmul.f32 %v2111_v31, %v1971_v29  ;;  %v2112_v27 = vadd.f32 1.0, %v3249_v30  ;;  %v2053_v19 = vadd.f32 %v2033_v47, %v1919_v5  ;;  %v2034_v33 = vmul.f32 %v2014_v18, %v1922_v62  ;;  %v3071_v31 = vld [vmem:[%s4946_s5 + $0x28] sm:$0xff]  }
 0x272   : > { %2966 = vmatprep.subr.bf16.mxu0 %v3071_v31 }
 0x273   : > { %v2844_v37 = vpop.f32.mrb[60].mxu0  ;;  %2157 = vadd.xlane.f32.xlu0 %v4709_v13  ;;  %v4712_v38 = vmul.f32 %v2112_v27, %v1972_v12  ;;  %v2073_v6 = vmul.f32 0.7978846, %v2053_v19  ;;  %v2054_v22 = vadd.f32 %v2034_v33, %v1922_v62  ;;  %v2212_v9 = vmul.f32 %v4709_v13, %v4709_v13  ;;  %2967 = vmatpush3.bf16.msra.mxu0 %v3071_v31 }
 0x274   : > { %v2845_v57 = vpop.f32.mrb[61].mxu0  ;;  %v1822_v62 = vadd.f32 %v4696_v2, %v4632_v59 }
 0x275   : > { %v4717_v20 = vadd.f32 %v2845_v57, %v2844_v37  ;;  %v2847_v21 = vpop.f32.mrb[62].mxu0  ;;  %2159 = vadd.xlane.f32.xlu1 %v4712_v38  ;;  %3250 = vtanh.f32 %v2073_v6  ;;  %v2074_v46 = vmul.f32 0.7978846, %v2054_v22  ;;  %v2213_v42 = vmul.f32 %v4712_v38, %v4712_v38 }
 0x276   : > { %v2908_v34 = vpop.f32.mrb[68].mxu1  ;;  %v2848_v43 = vpop.f32.mrb[63].mxu0  ;;  %v1825_v37 = vadd.f32 %v4701_v50, %v4632_v59 }
 0x277   : > { %v2909_v54 = vpop.f32.mrb[69].mxu1  ;;  %v4722_v35 = vadd.f32 %v2848_v43, %v2847_v21  ;;  %2238 = vadd.xlane.f32.xlu0 %v2212_v9  ;;  %3252 = vtanh.f32 %v2074_v46 }
 0x278   : > { %v2910_v44 = vadd.f32 %v2909_v54, %v2908_v34  ;;  %v2911_v45 = vpop.f32.mrb[70].mxu1  ;;  %v3072_v34 = vld [vmem:[%s4946_s5 + $0x30] sm:$0xff]  }
 0x279   : > { %v2912_v24 = vpop.f32.mrb[71].mxu1  ;;  %2240 = vadd.xlane.f32.xlu1 %v2213_v42  ;;  %2968 = vmatprep.subr.bf16.mxu0 %v3072_v34 }
 0x27a   : > { %v4730_v60 = vadd.f32 %v2910_v44, %v1814_v0  ;;  %v2913_v26 = vadd.f32 %v2912_v24, %v2911_v45  ;;  %2969 = vmatpush3.bf16.msra.mxu0 %v3072_v34 }
 0x27c   : > { %v1995_v3 = vmul.f32 0.044715, %v4730_v60  ;;  %v4736_v8 = vadd.f32 %v2913_v26, %v1817_v56 }
 0x27e   : > { %v1996_v40 = vmul.f32 0.044715, %v4736_v8  ;;  %v2015_v17 = vmul.f32 %v1995_v3, %v4730_v60 }
 0x27f   : > { %v3251_v28 = vpop.eup %3250 }
 0x280   : > { %v2850_v1 = vpop.f32.mrb[64].mxu0  ;;  %v2113_v61 = vadd.f32 1.0, %v3251_v28  ;;  %v2035_v48 = vmul.f32 %v2015_v17, %v4730_v60  ;;  %v2016_v51 = vmul.f32 %v1996_v40, %v4736_v8 }
 0x281   : > { %v3253_v11 = vpop.eup %3252  ;;  %v2851_v63 = vpop.f32.mrb[65].mxu0 }
 0x282   : > { %v2914_v41 = vpop.f32.mrb[72].mxu1  ;;  %v4742_v7 = vadd.f32 %v2851_v63, %v2850_v1  ;;  %v2853_v16 = vpop.f32.mrb[66].mxu0  ;;  %v4744_v55 = vmul.f32 %v2113_v61, %v1973_v15  ;;  %v2114_v58 = vadd.f32 1.0, %v3253_v11  ;;  %v2055_v14 = vadd.f32 %v2035_v48, %v4730_v60 }
 0x283   : > { %v2915_v25 = vpop.f32.mrb[73].mxu1  ;;  %v2854_v29 = vpop.f32.mrb[67].mxu0  ;;  %v2036_v5 = vmul.f32 %v2016_v51, %v4736_v8  ;;  %v1830_v15 = vadd.f32 %v4717_v20, %v4632_v59  ;;  %v1975_v11 = vmul.f32 0.5, %v4730_v60  ;;  %v3073_v60 = vld [vmem:[%s4946_s5 + $0x38] sm:$0xff]  }
 0x284   : > { %v2916_v47 = vadd.f32 %v2915_v25, %v2914_v41  ;;  %v2917_v18 = vpop.f32.mrb[74].mxu1  ;;  %v4753_v30 = vadd.f32 %v2854_v29, %v2853_v16  ;;  %2161 = vadd.xlane.f32.xlu0 %v4744_v55  ;;  %v4756_v12 = vmul.f32 %v2114_v58, %v1974_v32  ;;  %v2075_v19 = vmul.f32 0.7978846, %v2055_v14  ;;  %2970 = vmatprep.subr.bf16.mxu0 %v3073_v60 }
 0x285   : > { %v2918_v27 = vpop.f32.mrb[75].mxu1  ;;  %v2056_v33 = vadd.f32 %v2036_v5, %v4736_v8  ;;  %v2214_v2 = vmul.f32 %v4744_v55, %v4744_v55  ;;  %v1833_v16 = vadd.f32 %v4722_v35, %v4632_v59  ;;  %v1976_v29 = vmul.f32 0.5, %v4736_v8  ;;  %2971 = vmatpush3.bf16.msra.mxu0 %v3073_v60 }
 0x286   : > { %v4761_v6 = vadd.f32 %v2916_v47, %v1822_v62  ;;  %v2919_v22 = vadd.f32 %v2918_v27, %v2917_v18  ;;  %2163 = vadd.xlane.f32.xlu1 %v4756_v12  ;;  %3254 = vtanh.f32 %v2075_v19  ;;  %v2215_v9 = vmul.f32 %v4756_v12, %v4756_v12 }
 0x287   : > { %v2076_v49 = vmul.f32 0.7978846, %v2056_v33  ;;  %v1838_v19 = vadd.f32 %v4742_v7, %v4632_v59 }
 0x288   : > { %v1997_v57 = vmul.f32 0.044715, %v4761_v6  ;;  %v4767_v21 = vadd.f32 %v2919_v22, %v1825_v37  ;;  %2242 = vadd.xlane.f32.xlu0 %v2214_v2 }
 0x289   : > { %3256 = vtanh.f32 %v2076_v49  ;;  %v1841_v49 = vadd.f32 %v4753_v30, %v4632_v59 }
 0x28a   : > { %v1998_v50 = vmul.f32 0.044715, %v4767_v21  ;;  %2244 = vadd.xlane.f32.xlu1 %v2215_v9  ;;  %v2017_v46 = vmul.f32 %v1997_v57, %v4761_v6 }
 0x28c   : > { %v2856_v43 = vpop.f32.mrb[68].mxu0  ;;  %v2037_v54 = vmul.f32 %v2017_v46, %v4761_v6  ;;  %v2018_v42 = vmul.f32 %v1998_v50, %v4767_v21 }
 0x28d   : > { %v2857_v0 = vpop.f32.mrb[69].mxu0 }
 0x28e   : > { %v4778_v44 = vadd.f32 %v2857_v0, %v2856_v43  ;;  %v2859_v45 = vpop.f32.mrb[70].mxu0  ;;  %v2057_v24 = vadd.f32 %v2037_v54, %v4761_v6  ;;  %v2038_v56 = vmul.f32 %v2018_v42, %v4767_v21  ;;  %v1977_v54 = vmul.f32 0.5, %v4761_v6 }
 0x28f   : > { %v2920_v26 = vpop.f32.mrb[76].mxu1  ;;  %v2860_v53 = vpop.f32.mrb[71].mxu0 }
 0x290   : > { %v2921_v3 = vpop.f32.mrb[77].mxu1  ;;  %v4782_v40 = vadd.f32 %v2860_v53, %v2859_v45  ;;  %v2077_v17 = vmul.f32 0.7978846, %v2057_v24  ;;  %v2058_v28 = vadd.f32 %v2038_v56, %v4767_v21  ;;  %v3255_v1 = vpop.eup %3254  ;;  %v1978_v56 = vmul.f32 0.5, %v4767_v21 }
 0x291   : > { %v2922_v61 = vadd.f32 %v2921_v3, %v2920_v26  ;;  %v2923_v48 = vpop.f32.mrb[78].mxu1  ;;  %v2115_v63 = vadd.f32 1.0, %v3255_v1 }
 0x292   : > { %v2924_v51 = vpop.f32.mrb[79].mxu1  ;;  %3258 = vtanh.f32 %v2077_v17  ;;  %v2078_v32 = vmul.f32 0.7978846, %v2058_v28 }
 0x293   : > { %v3257_v41 = vpop.eup %3256  ;;  %v4790_v58 = vadd.f32 %v2922_v61, %v1830_v15  ;;  %v2925_v14 = vadd.f32 %v2924_v51, %v2923_v48  ;;  %v4792_v25 = vmul.f32 %v2115_v63, %v1975_v11  ;;  %v1846_v61 = vadd.f32 %v4778_v44, %v4632_v59 }
 0x294   : > { %v2116_v20 = vadd.f32 1.0, %v3257_v41  ;;  %3260 = vtanh.f32 %v2078_v32  ;;  %v1849_v63 = vadd.f32 %v4782_v40, %v4632_v59 }
 0x295   : > { %v1999_v5 = vmul.f32 0.044715, %v4790_v58  ;;  %v4799_v31 = vadd.f32 %v2925_v14, %v1833_v16  ;;  %2165 = vadd.xlane.f32.xlu0 %v4792_v25  ;;  %v2216_v27 = vmul.f32 %v4792_v25, %v4792_v25 }
 0x296   : > { %v4802_v35 = vmul.f32 %v2116_v20, %v1976_v29 }
 0x297   : > { %v2000_v62 = vmul.f32 0.044715, %v4799_v31  ;;  %v2926_v47 = vpop.f32.mrb[80].mxu1  ;;  %v2019_v8 = vmul.f32 %v1999_v5, %v4790_v58 }
 0x298   : > { %v2927_v18 = vpop.f32.mrb[81].mxu1  ;;  %2167 = vadd.xlane.f32.xlu1 %v4802_v35  ;;  %v2217_v9 = vmul.f32 %v4802_v35, %v4802_v35 }
 0x299   : > { %v2928_v33 = vadd.f32 %v2927_v18, %v2926_v47  ;;  %v2929_v37 = vpop.f32.mrb[82].mxu1  ;;  %v2039_v22 = vmul.f32 %v2019_v8, %v4790_v58  ;;  %v2020_v2 = vmul.f32 %v2000_v62, %v4799_v31  ;;  %2246 = vadd.xlane.f32.xlu0 %v2216_v27 }
 0x29a   : > { %v2930_v57 = vpop.f32.mrb[83].mxu1 }
 0x29b   : > { %v4817_v50 = vadd.f32 %v2928_v33, %v1838_v19  ;;  %v2931_v46 = vadd.f32 %v2930_v57, %v2929_v37  ;;  %v2059_v34 = vadd.f32 %v2039_v22, %v4790_v58  ;;  %v2040_v7 = vmul.f32 %v2020_v2, %v4799_v31 }
 0x29c   : > { %v3259_v43 = vpop.eup %3258  ;;  %2248 = vadd.xlane.f32.xlu1 %v2217_v9  ;;  %v1979_v37 = vmul.f32 0.5, %v4790_v58 }
 0x29d   : > { %v2001_v42 = vmul.f32 0.044715, %v4817_v50  ;;  %v4823_v0 = vadd.f32 %v2931_v46, %v1841_v49  ;;  %v2117_v30 = vadd.f32 1.0, %v3259_v43  ;;  %v2079_v45 = vmul.f32 0.7978846, %v2059_v34 }
 0x29e   : > { %v3261_v24 = vpop.eup %3260  ;;  %v2060_v26 = vadd.f32 %v2040_v7, %v4799_v31  ;;  %v1980_v46 = vmul.f32 0.5, %v4799_v31 }
 0x29f   : > { %v2002_v53 = vmul.f32 0.044715, %v4823_v0  ;;  %v2932_v3 = vpop.f32.mrb[84].mxu1  ;;  %v4828_v17 = vmul.f32 %v2117_v30, %v1977_v54  ;;  %v2118_v28 = vadd.f32 1.0, %v3261_v24  ;;  %3262 = vtanh.f32 %v2079_v45 }
 0x2a0   : > { %v2933_v1 = vpop.f32.mrb[85].mxu1  ;;  %v2080_v6 = vmul.f32 0.7978846, %v2060_v26  ;;  %v2021_v15 = vmul.f32 %v2001_v42, %v4817_v50  ;;  %v1981_v24 = vmul.f32 0.5, %v4817_v50 }
 0x2a1   : > { %v2934_v48 = vadd.f32 %v2933_v1, %v2932_v3  ;;  %v2935_v51 = vpop.f32.mrb[86].mxu1  ;;  %2169 = vadd.xlane.f32.xlu0 %v4828_v17  ;;  %v4834_v21 = vmul.f32 %v2118_v28, %v1978_v56  ;;  %v2022_v11 = vmul.f32 %v2002_v53, %v4823_v0  ;;  %v2218_v44 = vmul.f32 %v4828_v17, %v4828_v17 }
 0x2a2   : > { %v2936_v32 = vpop.f32.mrb[87].mxu1  ;;  %3264 = vtanh.f32 %v2080_v6  ;;  %v2041_v41 = vmul.f32 %v2021_v15, %v4817_v50  ;;  %v1982_v3 = vmul.f32 0.5, %v4823_v0 }
 0x2a3   : > { %v1959_v16 = vadd.f32 %v2934_v48, %v1846_v61  ;;  %v2937_v14 = vadd.f32 %v2936_v32, %v2935_v51  ;;  %2171 = vadd.xlane.f32.xlu1 %v4834_v21  ;;  %v2042_v29 = vmul.f32 %v2022_v11, %v4823_v0  ;;  %v2219_v59 = vmul.f32 %v4834_v21, %v4834_v21 }
 0x2a4   : > { %v2061_v20 = vadd.f32 %v2041_v41, %v4817_v50 }
 0x2a5   : > { %v2003_v60 = vmul.f32 0.044715, %v1959_v16  ;;  %v1962_v5 = vadd.f32 %v2937_v14, %v1849_v63  ;;  %2250 = vadd.xlane.f32.xlu0 %v2218_v44  ;;  %v2062_v40 = vadd.f32 %v2042_v29, %v4823_v0  ;;  %v1983_v15 = vmul.f32 0.5, %v1959_v16 }
 0x2a6   : > { %v2081_v62 = vmul.f32 0.7978846, %v2061_v20 }
 0x2a7   : > { %v2004_v47 = vmul.f32 0.044715, %v1962_v5  ;;  %2252 = vadd.xlane.f32.xlu1 %v2219_v59  ;;  %v2082_v8 = vmul.f32 0.7978846, %v2062_v40  ;;  %v2023_v18 = vmul.f32 %v2003_v60, %v1959_v16  ;;  %v1984_v11 = vmul.f32 0.5, %v1962_v5 }
 0x2a8   : > { %3266 = vtanh.f32 %v2081_v62 }
 0x2a9   : > { %v3263_v27 = vpop.eup %3262  ;;  %3268 = vtanh.f32 %v2082_v8  ;;  %v2043_v19 = vmul.f32 %v2023_v18, %v1959_v16  ;;  %v2024_v33 = vmul.f32 %v2004_v47, %v1962_v5 }
 0x2aa   : > { %v2119_v22 = vadd.f32 1.0, %v3263_v27 }
 0x2ab   : > { %v2063_v2 = vadd.f32 %v2043_v19, %v1959_v16  ;;  %v2044_v49 = vmul.f32 %v2024_v33, %v1962_v5 }
 0x2ac   : > { %v3265_v57 = vpop.eup %3264  ;;  %v4849_v9 = vmul.f32 %v2119_v22, %v1979_v37 }
 0x2ad   : > { %v2120_v34 = vadd.f32 1.0, %v3265_v57  ;;  %v2083_v7 = vmul.f32 0.7978846, %v2063_v2  ;;  %v2064_v43 = vadd.f32 %v2044_v49, %v1962_v5 }
 0x2ae   : > { %2173 = vadd.xlane.f32.xlu0 %v4849_v9  ;;  %v2220_v58 = vmul.f32 %v4849_v9, %v4849_v9 }
 0x2af   : > { %v4853_v54 = vmul.f32 %v2120_v34, %v1980_v46  ;;  %3270 = vtanh.f32 %v2083_v7  ;;  %v2084_v42 = vmul.f32 0.7978846, %v2064_v43 }
 0x2b1   : > { %2175 = vadd.xlane.f32.xlu1 %v4853_v54  ;;  %3272 = vtanh.f32 %v2084_v42  ;;  %v2221_v31 = vmul.f32 %v4853_v54, %v4853_v54 }
 0x2b2   : > { %v3267_v30 = vpop.eup %3266  ;;  %2254 = vadd.xlane.f32.xlu0 %v2220_v58 }
 0x2b3   : > { %v3269_v45 = vpop.eup %3268  ;;  %v2121_v56 = vadd.f32 1.0, %v3267_v30 }
 0x2b4   : > { %v2122_v26 = vadd.f32 1.0, %v3269_v45 }
 0x2b5   : > { %2256 = vadd.xlane.f32.xlu1 %v2221_v31  ;;  %v4861_v53 = vmul.f32 %v2121_v56, %v1981_v24 }
 0x2b6   : > { %v4865_v28 = vmul.f32 %v2122_v26, %v1982_v3 }
 0x2b7   : > { %2177 = vadd.xlane.f32.xlu0 %v4861_v53  ;;  %v2222_v6 = vmul.f32 %v4861_v53, %v4861_v53 }
 0x2b8   : > { %v2223_v48 = vmul.f32 %v4865_v28, %v4865_v28 }
 0x2b9   : > { %v3271_v1 = vpop.eup %3270  ;;  %2179 = vadd.xlane.f32.xlu1 %v4865_v28 }
 0x2ba   : > { %v2123_v61 = vadd.f32 1.0, %v3271_v1 }
 0x2bb   : > { %v3273_v50 = vpop.eup %3272  ;;  %2258 = vadd.xlane.f32.xlu0 %v2222_v6 }
 0x2bc   : > { %v4872_v51 = vmul.f32 %v2123_v61, %v1983_v15  ;;  %v2124_v0 = vadd.f32 1.0, %v3273_v50 }
 0x2bd   : > { %2260 = vadd.xlane.f32.xlu1 %v2223_v48 }
 0x2be   : > { %v4875_v63 = vmul.f32 %v2124_v0, %v1984_v11  ;;  %v2224_v32 = vmul.f32 %v4872_v51, %v4872_v51 }
 0x2bf   : > { %2181 = vadd.xlane.f32.xlu0 %v4872_v51 }
 0x2c0   : > { %v2225_v41 = vmul.f32 %v4875_v63, %v4875_v63 }
 0x2c1   : > { %2183 = vadd.xlane.f32.xlu1 %v4875_v63 }
 0x2c3   : > { %2262 = vadd.xlane.f32.xlu0 %v2224_v32 }
 0x2c4   : > { %v2146_v16 = vpop.xlane.xlu0 %2145 }
 0x2c5   : > { %2264 = vadd.xlane.f32.xlu1 %v2225_v41  ;;  %v2186_v44 = vmul.f32 0.0078125, %v2146_v16 }
 0x2c7   : > { %v2306_v40 = vmul.f32 %v2186_v44, %v2186_v44  ;;  %v2286_v33 = vsub.f32 %v4646_v10, %v2186_v44 }
 0x2c8   : > { %v2148_v14 = vpop.xlane.xlu0 %2147  ;;  %v2229_v29 = vpop.xlane.xlu1 %2228 }
 0x2c9   : > { %v2187_v20 = vmul.f32 0.0078125, %v2148_v14  ;;  %v2267_v60 = vmul.f32 0.0078125, %v2229_v29 }
 0x2cb   : > { %v2307_v5 = vmul.f32 %v2187_v20, %v2187_v20  ;;  %v2287_v37 = vsub.f32 %v4649_v23, %v2187_v20 }
 0x2cc   : > { %v2227_v59 = vpop.xlane.xlu0 %2226 }
 0x2cd   : > { %v2327_v62 = vsub.f32 %v2267_v60, %v2307_v5  ;;  %v2266_v47 = vmul.f32 0.0078125, %v2227_v59 }
 0x2cf   : > { %v2347_v8 = vadd.f32 1e-05, %v2327_v62  ;;  %v2326_v18 = vsub.f32 %v2266_v47, %v2306_v40 }
 0x2d1   : > { %3274 = vrsqrt.f32 %v2347_v8  ;;  %v2346_v27 = vadd.f32 1e-05, %v2326_v18 }
 0x2d3   : > { %3276 = vrsqrt.f32 %v2346_v27 }
 0x2db   : > { %v3275_v19 = vpop.eup %3274 }
 0x2dc   : > { %v2387_v49 = vmul.f32 %v3275_v19, %v2287_v37 }
 0x2dd   : > { %v3277_v22 = vpop.eup %3276  ;;  %v2150_v2 = vpop.xlane.xlu1 %2149 }
 0x2de   : > { %v2188_v57 = vmul.f32 0.0078125, %v2150_v2  ;;  %v2386_v46 = vmul.f32 %v3277_v22, %v2286_v33 }
 0x2df   : > { %v2231_v34 = vpop.xlane.xlu0 %2230 }
 0x2e0   : > { %v2308_v7 = vmul.f32 %v2188_v57, %v2188_v57  ;;  %v2268_v43 = vmul.f32 0.0078125, %v2231_v34  ;;  %v2406_v42 = vpack.c.bf16 %v2387_v49, %v2386_v46  ;;  %v2288_v50 = vsub.f32 %v4670_v39, %v2188_v57 }
 0x2e1   : > { %v2152_v58 = vpop.xlane.xlu1 %2151 }
 0x2e2   : > { %v2189_v30 = vmul.f32 0.0078125, %v2152_v58  ;;  %v2328_v45 = vsub.f32 %v2268_v43, %v2308_v7  ;;  %2972 = vmatprep.mubr.bf16.mxu0 %v2406_v42 }
 0x2e4   : > { %v2348_v31 = vadd.f32 1e-05, %v2328_v45  ;;  %v2309_v56 = vmul.f32 %v2189_v30, %v2189_v30  ;;  %v2289_v0 = vsub.f32 %v4677_v36, %v2189_v30 }
 0x2e5   : > { %v2233_v24 = vpop.xlane.xlu1 %2232 }
 0x2e6   : > { %v2269_v26 = vmul.f32 0.0078125, %v2233_v24  ;;  %3278 = vrsqrt.f32 %v2348_v31 }
 0x2e8   : > { %v2329_v10 = vsub.f32 %v2269_v26, %v2309_v56 }
 0x2ea   : > { %v2349_v23 = vadd.f32 1e-05, %v2329_v10 }
 0x2ec   : > { %3280 = vrsqrt.f32 %v2349_v23 }
 0x2f0   : > { %v2154_v3 = vpop.xlane.xlu0 %2153  ;;  %v3279_v15 = vpop.eup %3278 }
 0x2f1   : > { %v2190_v1 = vmul.f32 0.0078125, %v2154_v3  ;;  %v2388_v14 = vmul.f32 %v3279_v15, %v2288_v50 }
 0x2f2   : > { %v2156_v6 = vpop.xlane.xlu1 %2155 }
 0x2f3   : > { %v2191_v61 = vmul.f32 0.0078125, %v2156_v6  ;;  %v2310_v11 = vmul.f32 %v2190_v1, %v2190_v1  ;;  %v2290_v37 = vsub.f32 %v4691_v4, %v2190_v1 }
 0x2f4   : > { %v2235_v48 = vpop.xlane.xlu0 %2234 }
 0x2f5   : > { %v2270_v32 = vmul.f32 0.0078125, %v2235_v48  ;;  %v2311_v44 = vmul.f32 %v2191_v61, %v2191_v61  ;;  %v2291_v22 = vsub.f32 %v4694_v52, %v2191_v61 }
 0x2f6   : > { %v3281_v41 = vpop.eup %3280  ;;  %v2237_v16 = vpop.xlane.xlu1 %2236 }
 0x2f7   : > { %v2330_v29 = vsub.f32 %v2270_v32, %v2310_v11  ;;  %v2271_v20 = vmul.f32 0.0078125, %v2237_v16  ;;  %v2389_v60 = vmul.f32 %v3281_v41, %v2289_v0 }
 0x2f9   : > { %v2350_v5 = vadd.f32 1e-05, %v2330_v29  ;;  %v2331_v59 = vsub.f32 %v2271_v20, %v2311_v44  ;;  %v2407_v40 = vpack.c.bf16 %v2389_v60, %v2388_v14 }
 0x2fb   : > { %3282 = vrsqrt.f32 %v2350_v5  ;;  %v2351_v62 = vadd.f32 1e-05, %v2331_v59  ;;  %2973 = vmatmul.mubr.bf16.vlgmr.msra.gmra.mrb[72].mxu0 %v2407_v40 }
 0x2fd   : > { %3284 = vrsqrt.f32 %v2351_v62 }
 0x300   : > { %v2158_v39 = vpop.xlane.xlu0 %2157 }
 0x301   : > { %v2192_v47 = vmul.f32 0.0078125, %v2158_v39 }
 0x302   : > { %v2160_v8 = vpop.xlane.xlu1 %2159 }
 0x303   : > { %v2193_v36 = vmul.f32 0.0078125, %v2160_v8  ;;  %v2312_v19 = vmul.f32 %v2192_v47, %v2192_v47  ;;  %v2292_v10 = vsub.f32 %v4709_v13, %v2192_v47 }
 0x304   : > { %v2239_v18 = vpop.xlane.xlu0 %2238 }
 0x305   : > { %v3283_v27 = vpop.eup %3282  ;;  %v2272_v33 = vmul.f32 0.0078125, %v2239_v18  ;;  %v2313_v57 = vmul.f32 %v2193_v36, %v2193_v36  ;;  %v2293_v23 = vsub.f32 %v4712_v38, %v2193_v36 }
 0x306   : > { %v2241_v2 = vpop.xlane.xlu1 %2240  ;;  %v2390_v7 = vmul.f32 %v3283_v27, %v2290_v37 }
 0x307   : > { %v3285_v49 = vpop.eup %3284  ;;  %v2332_v46 = vsub.f32 %v2272_v33, %v2312_v19  ;;  %v2273_v34 = vmul.f32 0.0078125, %v2241_v2 }
 0x308   : > { %v2391_v43 = vmul.f32 %v3285_v49, %v2291_v22 }
 0x309   : > { %v2352_v42 = vadd.f32 1e-05, %v2332_v46  ;;  %v2333_v58 = vsub.f32 %v2273_v34, %v2313_v57 }
 0x30a   : > { %v2408_v30 = vpack.c.bf16 %v2391_v43, %v2390_v7 }
 0x30b   : > { %3286 = vrsqrt.f32 %v2352_v42  ;;  %v2353_v45 = vadd.f32 1e-05, %v2333_v58 }
 0x30c   : > { %2976 = vmatprep.mubr.bf16.mxu0 %v2408_v30 }
 0x30d   : > { %3288 = vrsqrt.f32 %v2353_v45 }
 0x311   : > { %v2162_v31 = vpop.xlane.xlu0 %2161 }
 0x312   : > { %v2194_v24 = vmul.f32 0.0078125, %v2162_v31 }
 0x313   : > { %v2164_v56 = vpop.xlane.xlu1 %2163 }
 0x314   : > { %v2195_v4 = vmul.f32 0.0078125, %v2164_v56  ;;  %v2314_v3 = vmul.f32 %v2194_v24, %v2194_v24  ;;  %v2294_v60 = vsub.f32 %v4744_v55, %v2194_v24 }
 0x315   : > { %v3287_v26 = vpop.eup %3286  ;;  %v2243_v52 = vpop.xlane.xlu0 %2242 }
 0x316   : > { %v2274_v1 = vmul.f32 0.0078125, %v2243_v52  ;;  %v2315_v15 = vmul.f32 %v2195_v4, %v2195_v4  ;;  %v2392_v0 = vmul.f32 %v3287_v26, %v2292_v10  ;;  %v2295_v5 = vsub.f32 %v4756_v12, %v2195_v4 }
 0x317   : > { %v3289_v6 = vpop.eup %3288  ;;  %v2245_v61 = vpop.xlane.xlu1 %2244 }
 0x318   : > { %v2334_v50 = vsub.f32 %v2274_v1, %v2314_v3  ;;  %v2275_v48 = vmul.f32 0.0078125, %v2245_v61  ;;  %v2393_v11 = vmul.f32 %v3289_v6, %v2293_v23 }
 0x31a   : > { %v2354_v32 = vadd.f32 1e-05, %v2334_v50  ;;  %v2335_v41 = vsub.f32 %v2275_v48, %v2315_v15  ;;  %v2409_v16 = vpack.c.bf16 %v2393_v11, %v2392_v0 }
 0x31c   : > { %3290 = vrsqrt.f32 %v2354_v32  ;;  %v2355_v14 = vadd.f32 1e-05, %v2335_v41  ;;  %2977 = vmatmul.mubr.bf16.gmra.mrb[76].mxu0 %v2409_v16 }
 0x31e   : > { %3292 = vrsqrt.f32 %v2355_v14 }
 0x322   : > { %v2166_v44 = vpop.xlane.xlu0 %2165 }
 0x323   : > { %v2196_v13 = vmul.f32 0.0078125, %v2166_v44 }
 0x325   : > { %v2168_v29 = vpop.xlane.xlu1 %2167  ;;  %v2316_v62 = vmul.f32 %v2196_v13, %v2196_v13  ;;  %v2296_v56 = vsub.f32 %v4792_v25, %v2196_v13 }
 0x326   : > { %v3291_v38 = vpop.eup %3290  ;;  %v2197_v20 = vmul.f32 0.0078125, %v2168_v29  ;;  %v2247_v59 = vpop.xlane.xlu0 %2246 }
 0x327   : > { %v2276_v39 = vmul.f32 0.0078125, %v2247_v59  ;;  %v2394_v8 = vmul.f32 %v3291_v38, %v2294_v60 }
 0x328   : > { %v3293_v40 = vpop.eup %3292  ;;  %v2317_v18 = vmul.f32 %v2197_v20, %v2197_v20  ;;  %v2297_v4 = vsub.f32 %v4802_v35, %v2197_v20 }
 0x329   : > { %v2249_v47 = vpop.xlane.xlu1 %2248  ;;  %v2395_v36 = vmul.f32 %v3293_v40, %v2295_v5  ;;  %v2336_v27 = vsub.f32 %v2276_v39, %v2316_v62 }
 0x32a   : > { %v2277_v19 = vmul.f32 0.0078125, %v2249_v47 }
 0x32b   : > { %v2410_v33 = vpack.c.bf16 %v2395_v36, %v2394_v8  ;;  %v2356_v37 = vadd.f32 1e-05, %v2336_v27 }
 0x32c   : > { %v2337_v22 = vsub.f32 %v2277_v19, %v2317_v18 }
 0x32d   : > { %2980 = vmatprep.mubr.bf16.mxu0 %v2410_v33  ;;  %3294 = vrsqrt.f32 %v2356_v37 }
 0x32e   : > { %v2357_v2 = vadd.f32 1e-05, %v2337_v22  ;;  %v2170_v49 = vpop.xlane.xlu0 %2169 }
 0x32f   : > { %v2198_v55 = vmul.f32 0.0078125, %v2170_v49 }
 0x330   : > { %3296 = vrsqrt.f32 %v2357_v2  ;;  %v2172_v12 = vpop.xlane.xlu1 %2171 }
 0x331   : > { %v2199_v57 = vmul.f32 0.0078125, %v2172_v12  ;;  %v2318_v34 = vmul.f32 %v2198_v55, %v2198_v55  ;;  %v2298_v16 = vsub.f32 %v4828_v17, %v2198_v55 }
 0x332   : > { %v2251_v46 = vpop.xlane.xlu0 %2250 }
 0x333   : > { %v2278_v7 = vmul.f32 0.0078125, %v2251_v46  ;;  %v2319_v42 = vmul.f32 %v2199_v57, %v2199_v57  ;;  %v2299_v14 = vsub.f32 %v4834_v21, %v2199_v57 }
 0x334   : > { %v2253_v43 = vpop.xlane.xlu1 %2252 }
 0x335   : > { %v2338_v58 = vsub.f32 %v2278_v7, %v2318_v34  ;;  %v2279_v30 = vmul.f32 0.0078125, %v2253_v43 }
 0x337   : > { %v2358_v45 = vadd.f32 1e-05, %v2338_v58  ;;  %v2339_v31 = vsub.f32 %v2279_v30, %v2319_v42  ;;  %v3295_v24 = vpop.eup %3294 }
 0x338   : > { %v2396_v23 = vmul.f32 %v3295_v24, %v2296_v56 }
 0x339   : > { %3298 = vrsqrt.f32 %v2358_v45  ;;  %v2359_v26 = vadd.f32 1e-05, %v2339_v31 }
 0x33a   : > { %v3297_v52 = vpop.eup %3296 }
 0x33b   : > { %3300 = vrsqrt.f32 %v2359_v26  ;;  %v2174_v10 = vpop.xlane.xlu0 %2173  ;;  %v2397_v3 = vmul.f32 %v3297_v52, %v2297_v4 }
 0x33c   : > { %v2200_v1 = vmul.f32 0.0078125, %v2174_v10 }
 0x33d   : > { %v2411_v6 = vpack.c.bf16 %v2397_v3, %v2396_v23 }
 0x33e   : > { %v2176_v15 = vpop.xlane.xlu1 %2175  ;;  %v2320_v48 = vmul.f32 %v2200_v1, %v2200_v1  ;;  %v2300_v7 = vsub.f32 %v4849_v9, %v2200_v1 }
 0x33f   : > { %v2201_v61 = vmul.f32 0.0078125, %v2176_v15  ;;  %v2255_v50 = vpop.xlane.xlu0 %2254  ;;  %2981 = vmatmul.mubr.bf16.gmra.mrb[80].mxu0 %v2411_v6 }
 0x340   : > { %v2280_v0 = vmul.f32 0.0078125, %v2255_v50 }
 0x341   : > { %v2321_v41 = vmul.f32 %v2201_v61, %v2201_v61  ;;  %v2301_v43 = vsub.f32 %v4853_v54, %v2201_v61 }
 0x342   : > { %v2340_v11 = vsub.f32 %v2280_v0, %v2320_v48  ;;  %v2257_v32 = vpop.xlane.xlu1 %2256 }
 0x343   : > { %v3299_v25 = vpop.eup %3298  ;;  %v2281_v35 = vmul.f32 0.0078125, %v2257_v32 }
 0x344   : > { %v2360_v44 = vadd.f32 1e-05, %v2340_v11  ;;  %v2178_v13 = vpop.xlane.xlu0 %2177  ;;  %v2398_v5 = vmul.f32 %v3299_v25, %v2298_v16 }
 0x345   : > { %v3301_v29 = vpop.eup %3300  ;;  %v2341_v38 = vsub.f32 %v2281_v35, %v2321_v41  ;;  %v2202_v20 = vmul.f32 0.0078125, %v2178_v13 }
 0x346   : > { %v2180_v60 = vpop.xlane.xlu1 %2179  ;;  %v2399_v59 = vmul.f32 %v3301_v29, %v2299_v14  ;;  %3302 = vrsqrt.f32 %v2360_v44 }
 0x347   : > { %v2361_v40 = vadd.f32 1e-05, %v2341_v38  ;;  %v2203_v62 = vmul.f32 0.0078125, %v2180_v60  ;;  %v2322_v8 = vmul.f32 %v2202_v20, %v2202_v20  ;;  %v2302_v3 = vsub.f32 %v4861_v53, %v2202_v20  ;;  %v2775_v53 = vld [vmem:[%s4947_s6] ss:$0 sm:$0xff] }
 0x348   : > { %v2259_v39 = vpop.xlane.xlu0 %2258  ;;  %v2412_v47 = vpack.c.bf16 %v2399_v59, %v2398_v5 }
 0x349   : > { %3304 = vrsqrt.f32 %v2361_v40  ;;  %v2282_v36 = vmul.f32 0.0078125, %v2259_v39  ;;  %v2323_v17 = vmul.f32 %v2203_v62, %v2203_v62  ;;  %v2303_v9 = vsub.f32 %v4865_v28, %v2203_v62 }
 0x34a   : > { %v2261_v18 = vpop.xlane.xlu1 %2260  ;;  %2984 = vmatprep.mubr.bf16.mxu0 %v2412_v47 }
 0x34b   : > { %v2342_v21 = vsub.f32 %v2282_v36, %v2322_v8  ;;  %v2283_v27 = vmul.f32 0.0078125, %v2261_v18 }
 0x34c   : > { %v2182_v19 = vpop.xlane.xlu0 %2181 }
 0x34d   : > { %v2362_v33 = vadd.f32 1e-05, %v2342_v21  ;;  %v2343_v37 = vsub.f32 %v2283_v27, %v2323_v17  ;;  %v2204_v22 = vmul.f32 0.0078125, %v2182_v19 }
 0x34e   : > { %v2184_v2 = vpop.xlane.xlu1 %2183 }
 0x34f   : > { %3306 = vrsqrt.f32 %v2362_v33  ;;  %v2363_v49 = vadd.f32 1e-05, %v2343_v37  ;;  %v2205_v55 = vmul.f32 0.0078125, %v2184_v2  ;;  %v2324_v46 = vmul.f32 %v2204_v22, %v2204_v22 }
 0x350   : > { %v2263_v12 = vpop.xlane.xlu0 %2262  ;;  %v3303_v57 = vpop.eup %3302  ;;  %v2304_v50 = vsub.f32 %v4872_v51, %v2204_v22 }
 0x351   : > { %3308 = vrsqrt.f32 %v2363_v49  ;;  %v2284_v34 = vmul.f32 0.0078125, %v2263_v12  ;;  %v2325_v30 = vmul.f32 %v2205_v55, %v2205_v55  ;;  %v2400_v24 = vmul.f32 %v3303_v57, %v2300_v7 }
 0x352   : > { %v2265_v42 = vpop.xlane.xlu1 %2264  ;;  %v2305_v48 = vsub.f32 %v4875_v63, %v2205_v55 }
 0x353   : > { %v3305_v58 = vpop.eup %3304  ;;  %v2344_v45 = vsub.f32 %v2284_v34, %v2324_v46  ;;  %v2285_v31 = vmul.f32 0.0078125, %v2265_v42 }
 0x354   : > { %v2401_v56 = vmul.f32 %v3305_v58, %v2301_v43 }
 0x355   : > { %v2364_v4 = vadd.f32 1e-05, %v2344_v45  ;;  %v2345_v26 = vsub.f32 %v2285_v31, %v2325_v30 }
 0x356   : > { %v2413_v52 = vpack.c.bf16 %v2401_v56, %v2400_v24 }
 0x357   : > { %3310 = vrsqrt.f32 %v2364_v4  ;;  %v2365_v10 = vadd.f32 1e-05, %v2345_v26 }
 0x358   : > { %2985 = vmatmul.mubr.bf16.gmra.mrb[84].mxu0 %v2413_v52 }
 0x359   : > { %v3307_v23 = vpop.eup %3306  ;;  %3312 = vrsqrt.f32 %v2365_v10 }
 0x35a   : > { %v2402_v1 = vmul.f32 %v3307_v23, %v2302_v3 }
 0x35b   : > { %v3309_v54 = vpop.eup %3308 }
 0x35c   : > { %v2403_v6 = vmul.f32 %v3309_v54, %v2303_v9 }
 0x35e   : > { %v2414_v15 = vpack.c.bf16 %v2403_v6, %v2402_v1 }
 0x360   : > { %2988 = vmatprep.mubr.bf16.mxu0 %v2414_v15 }
 0x361   : > { %v3311_v61 = vpop.eup %3310 }
 0x362   : > { %v2404_v11 = vmul.f32 %v3311_v61, %v2304_v50 }
 0x363   : > { %v3313_v0 = vpop.eup %3312 }
 0x364   : > { %v2405_v32 = vmul.f32 %v3313_v0, %v2305_v48 }
 0x366   : > { %v2415_v25 = vpack.c.bf16 %v2405_v32, %v2404_v11 }
 0x368   : > { %2989 = vmatmul.mubr.bf16.gmra.mrb[88].mxu0 %v2415_v25 }
 0x3ce   : > { %v2974_v28 = vpop.f32.mrb[72].mxu0 }
 0x3cf   : > { %v2530_v51 = vadd.f32 %v2974_v28, %v2775_v53  ;;  %v2521_v63 = vpop.f32.mrb[73].mxu0 }
 0x3d0   : > { %v2522_v41 = vadd.f32 %v2775_v53, %v2521_v63  ;;  %v2975_v35 = vpop.f32.mrb[74].mxu0 }
 0x3d1   : > { %2602 = vst [vmem:[%s4910_s28 + $0x10] sm:$0xff] %v2530_v51  ;;  %v2533_v16 = vadd.f32 %v2975_v35, %v2775_v53  ;;  %v2524_v14 = vpop.f32.mrb[75].mxu0 }
 0x3d2   : > { %2600 = vst [vmem:[%s4910_s28] sm:$0xff] %v2522_v41  ;;  %v2525_v44 = vadd.f32 %v2775_v53, %v2524_v14 }
 0x3d3   : > { %2603 = vst [vmem:[%s4910_s28 + $0x18] sm:$0xff] %v2533_v16 }
 0x3d4   : > { %2601 = vst [vmem:[%s4910_s28 + $0x8] sm:$0xff] %v2525_v44 }
 0x3ef   : > { %v2978_v13 = vpop.f32.mrb[76].mxu0 }
 0x3f0   : > { %v2546_v29 = vadd.f32 %v2978_v13, %v2775_v53  ;;  %v2537_v38 = vpop.f32.mrb[77].mxu0 }
 0x3f1   : > { %v2538_v20 = vadd.f32 %v2775_v53, %v2537_v38  ;;  %v2979_v60 = vpop.f32.mrb[78].mxu0 }
 0x3f2   : > { %2606 = vst [vmem:[%s4910_s28 + $0x30] sm:$0xff] %v2546_v29  ;;  %v2549_v5 = vadd.f32 %v2979_v60, %v2775_v53  ;;  %v2540_v59 = vpop.f32.mrb[79].mxu0 }
 0x3f3   : > { %2604 = vst [vmem:[%s4910_s28 + $0x20] sm:$0xff] %v2538_v20  ;;  %v2541_v40 = vadd.f32 %v2775_v53, %v2540_v59 }
 0x3f4   : > { %2607 = vst [vmem:[%s4910_s28 + $0x38] sm:$0xff] %v2549_v5 }
 0x3f5   : > { %2605 = vst [vmem:[%s4910_s28 + $0x28] sm:$0xff] %v2541_v40 }
 0x412   : > { %v2982_v62 = vpop.f32.mrb[80].mxu0 }
 0x413   : > { %v2562_v39 = vadd.f32 %v2982_v62, %v2775_v53  ;;  %v2553_v47 = vpop.f32.mrb[81].mxu0 }
 0x414   : > { %v2554_v8 = vadd.f32 %v2775_v53, %v2553_v47  ;;  %v2983_v36 = vpop.f32.mrb[82].mxu0 }
 0x415   : > { %2610 = vst [vmem:[%s4910_s28 + $0x50] sm:$0xff] %v2562_v39  ;;  %v2565_v18 = vadd.f32 %v2983_v36, %v2775_v53  ;;  %v2556_v17 = vpop.f32.mrb[83].mxu0 }
 0x416   : > { %2608 = vst [vmem:[%s4910_s28 + $0x40] sm:$0xff] %v2554_v8  ;;  %v2557_v21 = vadd.f32 %v2775_v53, %v2556_v17 }
 0x417   : > { %2611 = vst [vmem:[%s4910_s28 + $0x58] sm:$0xff] %v2565_v18 }
 0x418   : > { %2609 = vst [vmem:[%s4910_s28 + $0x48] sm:$0xff] %v2557_v21 }
 0x42b   : > { %v2986_v27 = vpop.f32.mrb[84].mxu0 }
 0x42c   : > { %v2578_v19 = vadd.f32 %v2986_v27, %v2775_v53  ;;  %v2569_v33 = vpop.f32.mrb[85].mxu0 }
 0x42d   : > { %v2570_v37 = vadd.f32 %v2775_v53, %v2569_v33  ;;  %v2987_v22 = vpop.f32.mrb[86].mxu0 }
 0x42e   : > { %2614 = vst [vmem:[%s4910_s28 + $0x70] sm:$0xff] %v2578_v19  ;;  %v2581_v2 = vadd.f32 %v2987_v22, %v2775_v53  ;;  %v2572_v49 = vpop.f32.mrb[87].mxu0 }
 0x42f   : > { %2612 = vst [vmem:[%s4910_s28 + $0x60] sm:$0xff] %v2570_v37  ;;  %v2573_v55 = vadd.f32 %v2775_v53, %v2572_v49 }
 0x430   : > { %2615 = vst [vmem:[%s4910_s28 + $0x78] sm:$0xff] %v2581_v2 }
 0x431   : > { %2613 = vst [vmem:[%s4910_s28 + $0x68] sm:$0xff] %v2573_v55 }
 0x43b   : > { %v2990_v12 = vpop.f32.mrb[88].mxu0 }
 0x43c   : > { %v2594_v57 = vadd.f32 %v2990_v12, %v2775_v53  ;;  %v2585_v46 = vpop.f32.mrb[89].mxu0 }
 0x43d   : > { %v2586_v34 = vadd.f32 %v2775_v53, %v2585_v46  ;;  %v2991_v7 = vpop.f32.mrb[90].mxu0 }
 0x43e   : > { %2618 = vst [vmem:[%s4910_s28 + $0x90] sm:$0xff] %v2594_v57  ;;  %v2597_v43 = vadd.f32 %v2991_v7, %v2775_v53  ;;  %v2588_v42 = vpop.f32.mrb[91].mxu0 }
 0x43f   : > { %2616 = vst [vmem:[%s4910_s28 + $0x80] sm:$0xff] %v2586_v34  ;;  %v2589_v58 = vadd.f32 %v2775_v53, %v2588_v42 }
 0x440   : > { %2619 = vst [vmem:[%s4910_s28 + $0x98] sm:$0xff] %v2597_v43 }
 0x441   : > { %2617 = vst [vmem:[%s4910_s28 + $0x88] sm:$0xff] %v2589_v58 }
 0x442 PF: > { %s17_s26 = sadd.s32 1, %s3336_s26   ;;  %s5198_s24 = smov %s3332_s25 }
 0x443   : > { %p14_p5 = scmp.ge.s32.totalorder %s17_s26, 4   ;;  %s5199_s25 = smov %s5201_s27 }
 0x445   :  { %16 = sbr.rel (!%p14_p5) target bundleno = 2 (0x2), region = 78 }

</bundles_post_ra>
